<compile_context>
chip_gen: v6e
topology: v6e:2x2x1
jax: 0.10.0
libtpu: 0.0.40
codegen_flags: <defaults>
</compile_context>

<pallas_src>
import functools

import jax
import jax.numpy as jnp
from jax.experimental import pallas as pl
from jax.experimental.pallas import tpu as pltpu


def _round_up(x, m):
    return ((x + m - 1) // m) * m


# ----------------------------------------------------------------------------
# Pallas kernel: fused complex 2-layer block MLP + bias + ReLU + softshrink
# ----------------------------------------------------------------------------
def _afno_mlp_kernel(x_ref, w1_ref, w2_ref, b1_ref, b2_ref, o_ref, *,
                     num_groups, gin, lam):
    """x_ref : (TN, ng*gin) bf16  -- packed [real | imag] per group, lane-aligned
       w1_ref: (ng, gin, ghid) bf16  stacked complex weights [[w0, w1], [-w1, w0]]
       w2_ref: (ng, ghid, gin) bf16
       b1_ref: (ng, 1, ghid) f32 ;  b2_ref: (ng, 1, gin) f32
       o_ref : (TN, ng*gin) f32."""
    for g in range(num_groups):                     # ng is small: fully unrolled
        lo, hi = g * gin, (g + 1) * gin
        xg = x_ref[:, lo:hi]                        # contiguous lane-aligned slab
        h = jnp.dot(xg, w1_ref[g], preferred_element_type=jnp.float32) + b1_ref[g]
        h = jnp.maximum(h, 0.0).astype(jnp.bfloat16)        # bf16 for 2nd MXU pass
        o2 = jnp.dot(h, w2_ref[g], preferred_element_type=jnp.float32) + b2_ref[g]
        # softshrink(x) = x - clip(x, -lam, lam)   (exact; softshrink(0) == 0)
        o_ref[:, lo:hi] = o2 - jnp.clip(o2, -lam, lam)


# ----------------------------------------------------------------------------
# Wrapper-side helpers
# ----------------------------------------------------------------------------
def _stack_complex(w0, w1):
    """Real 2x-sized weight [[w0, w1], [-w1, w0]] implementing
    (xr + i*xi) @ (w0 + i*w1) on packed [xr | xi] rows."""
    top = jnp.concatenate([w0, w1], axis=-1)
    bot = jnp.concatenate([-w1, w0], axis=-1)
    return jnp.concatenate([top, bot], axis=-2)


def _block_diag(blocks):
    """(nb, a, b) -> (nb*a, nb*b) block-diagonal matrix."""
    nb, a, b = blocks.shape
    eye = jnp.eye(nb, dtype=blocks.dtype)
    return jnp.einsum('ij,ipq->ipjq', eye, blocks).reshape(nb * a, nb * b)


def _pack_real_imag(xr, xi, nb, bs, bs_pack, total_cols):
    """(N, C), (N, C) -> (N, total_cols) with per-block contiguous
    [real(bs_pack) | imag(bs_pack)] columns (zero-padded)."""
    n = xr.shape[0]
    xrb = xr.reshape(n, nb, bs)
    xib = xi.reshape(n, nb, bs)
    if bs_pack > bs:
        pad = ((0, 0), (0, 0), (0, bs_pack - bs))
        xrb, xib = jnp.pad(xrb, pad), jnp.pad(xib, pad)
    x = jnp.stack([xrb, xib], axis=2).reshape(n, nb * 2 * bs_pack)
    if total_cols > x.shape[1]:
        x = jnp.pad(x, ((0, 0), (0, total_cols - x.shape[1])))
    return x


@functools.lru_cache(maxsize=None)
def _vmem_budgets():
    """(tiling budget, vmem_limit_bytes), derived from the chip's VMEM capacity.
    v7x (64 MiB/TC): ~28 MiB budget / 40 MiB limit.
    v5e/v6e (128 MiB): ~56 MiB budget / 80 MiB limit."""
    cap = 64 << 20
    try:
        info = pltpu.get_tpu_info()
        cap = int(getattr(info, "vmem_capacity_bytes", cap) or cap)
    except Exception:          # older runtime / no TPU: keep conservative default
        pass
    limit = max(min(cap - (8 << 20), (cap * 5) // 8), 16 << 20)
    budget = (limit * 7) // 10      # leave room for in-kernel temporaries
    return budget, limit


def _row_tiling(n, bytes_per_row, resident_bytes, budget_bytes):
    """Row tile TN (multiple of 8, <= 2048), padded rows Np and grid steps.
    Guarantees >= 4 grid steps when there is enough work so the BlockSpec
    pipeline has something to overlap and both v7x TensorCores get tiles."""
    avail = max(budget_bytes - resident_bytes, bytes_per_row * 8)
    cap = max(8, min(2048, avail // bytes_per_row))
    cap -= cap % 8
    cap = max(cap, 8)
    steps = max(-(-n // cap), min(4, -(-n // 8)))
    tn = _round_up(-(-n // steps), 8)
    steps = -(-n // tn)
    return tn, steps * tn, steps


# ----------------------------------------------------------------------------
# Spectral block MLP (the Pallas call)
# ----------------------------------------------------------------------------
def afno_spectral_mlp(xr, xi, w1, b1, w2, b2, sparsity_threshold):
    """xr, xi: (N, C) float32 spectra.  Returns softshrunk (real, imag) (N, C) f32."""
    N, C = xr.shape
    _, nb, bs, bsf = w1.shape
    lam = float(sparsity_threshold)

    fused = (2 * bs < 128)
    if fused:
        # Tiny blocks: a per-block GEMM would use <2% of an MXU tile.  Fuse all
        # blocks into one block-diagonal stacked weight and do a single GEMM
        # per layer (zero off-diagonal FLOPs are cheaper than tiny GEMMs).
        ng = 1
        bs_pack = bs
        gin_raw, ghid_raw = 2 * nb * bs, 2 * nb * bsf
        gin, ghid = _round_up(gin_raw, 128), _round_up(ghid_raw, 128)
        W1s = jnp.pad(_block_diag(_stack_complex(w1[0], w1[1])),
                      ((0, gin - gin_raw), (0, ghid - ghid_raw)))[None]
        W2s = jnp.pad(_block_diag(_stack_complex(w2[0], w2[1])),
                      ((0, ghid - ghid_raw), (0, gin - gin_raw)))[None]
        B1s = jnp.pad(jnp.concatenate([b1[0], b1[1]], -1).reshape(-1),
                      (0, ghid - ghid_raw)).reshape(1, 1, ghid)
        B2s = jnp.pad(jnp.concatenate([b2[0], b2[1]], -1).reshape(-1),
                      (0, gin - gin_raw)).reshape(1, 1, gin)
    else:
        # One GEMM per block; pad each real/imag half so the per-block slab
        # width (2*bs_pad, 2*bsf_pad) is a multiple of 128 -> lane-aligned
        # slices and unmasked stores.
        ng = nb
        bs_pad, bsf_pad = _round_up(bs, 64), _round_up(bsf, 64)
        bs_pack = bs_pad
        gin, ghid = 2 * bs_pad, 2 * bsf_pad
        pw1 = ((0, 0), (0, bs_pad - bs), (0, bsf_pad - bsf))
        pw2 = ((0, 0), (0, bsf_pad - bsf), (0, bs_pad - bs))
        W1s = _stack_complex(jnp.pad(w1[0], pw1), jnp.pad(w1[1], pw1))
        W2s = _stack_complex(jnp.pad(w2[0], pw2), jnp.pad(w2[1], pw2))
        pb1 = ((0, 0), (0, bsf_pad - bsf))
        pb2 = ((0, 0), (0, bs_pad - bs))
        B1s = jnp.concatenate([jnp.pad(b1[0], pb1), jnp.pad(b1[1], pb1)],
                              -1).reshape(nb, 1, ghid)
        B2s = jnp.concatenate([jnp.pad(b2[0], pb2), jnp.pad(b2[1], pb2)],
                              -1).reshape(nb, 1, gin)

    Ctot = ng * gin

    # Pre-packed [real | imag] per block (lane-aligned): no in-kernel concats.
    xcat = _pack_real_imag(xr, xi, nb, bs, bs_pack, Ctot)

    # bf16 MXU operands; f32 accumulation happens inside the kernel.
    xcat = xcat.astype(jnp.bfloat16)
    W1s, W2s = W1s.astype(jnp.bfloat16), W2s.astype(jnp.bfloat16)
    B1s, B2s = B1s.astype(jnp.float32), B2s.astype(jnp.float32)

    weight_bytes = (W1s.size + W2s.size) * 2 + (B1s.size + B2s.size) * 4
    # Double-buffered activations (bf16 in + f32 out) + per-group temporaries.
    bytes_per_row = Ctot * (2 * 2 + 2 * 4) + (gin + ghid) * 8
    budget, vmem_limit = _vmem_budgets()
    TN, Np, steps = _row_tiling(N, bytes_per_row,
                                resident_bytes=2 * weight_bytes,
                                budget_bytes=budget)
    if Np != N:
        # Padded rows produce garbage that is discarded by the [:N] slice below.
        xcat = jnp.pad(xcat, ((0, Np - N), (0, 0)))

    kernel = functools.partial(_afno_mlp_kernel, num_groups=ng, gin=gin, lam=lam)
    cost = pl.CostEstimate(
        flops=4 * Np * ng * gin * ghid,
        transcendentals=0,
        bytes_accessed=Np * Ctot * (2 + 4) + weight_bytes)

    ocat = pl.pallas_call(
        kernel,
        out_shape=jax.ShapeDtypeStruct((Np, Ctot), jnp.float32),
        grid=(steps,),
        in_specs=[
            pl.BlockSpec((TN, Ctot), lambda i: (i, 0)),
            pl.BlockSpec((ng, gin, ghid), lambda i: (0, 0, 0)),
            pl.BlockSpec((ng, ghid, gin), lambda i: (0, 0, 0)),
            pl.BlockSpec((ng, 1, ghid), lambda i: (0, 0, 0)),
            pl.BlockSpec((ng, 1, gin), lambda i: (0, 0, 0)),
        ],
        out_specs=pl.BlockSpec((TN, Ctot), lambda i: (i, 0)),
        compiler_params=pltpu.CompilerParams(
            dimension_semantics=("parallel",),
            vmem_limit_bytes=int(vmem_limit)),
        cost_estimate=cost,
    )(xcat, W1s, W2s, B1s, B2s)

    o = ocat[:N, :nb * 2 * bs_pack].reshape(N, nb, 2, bs_pack)
    o_r = o[:, :, 0, :bs].reshape(N, C)
    o_i = o[:, :, 1, :bs].reshape(N, C)
    return o_r, o_i


# ----------------------------------------------------------------------------
# Full AFNO2DLayer forward
# ----------------------------------------------------------------------------
def afno2d_forward(x, params, *, num_blocks, sparsity_threshold=0.01,
                   hard_thresholding_fraction=1.0, hidden_size_factor=1):
    del num_blocks, hidden_size_factor   # derived from weight shapes
    bias = x
    dtype = x.dtype
    x32 = x.astype(jnp.float32)
    B, H, W, C = x.shape
    Wh = W // 2 + 1

    # TODO(synk): rfft2/irfft2 have no Pallas TPU equivalent; done in plain JAX/XLA.
    xf = jnp.fft.rfft2(x32, axes=(1, 2), norm="ortho")     # (B, H, Wh, C) c64

    total_modes = H // 2 + 1
    kept_modes = int(total_modes * hard_thresholding_fraction)
    if kept_modes <= 0:
        return bias                      # spectrum stays 0 -> irfft is 0 -> +bias
    y_lo = max(total_modes - kept_modes, 0)
    y_hi = min(total_modes + kept_modes, H)
    x_hi = min(kept_modes, Wh)
    full_cover = (y_lo == 0) and (y_hi == H) and (x_hi == Wh)

    # Only kept modes are transformed; the reference leaves zeros elsewhere and
    # softshrink(0) == 0, so the rest of the spectrum is exactly zero.
    xs = xf if full_cover else xf[:, y_lo:y_hi, :x_hi, :]
    hb, wb = xs.shape[1], xs.shape[2]
    N = B * hb * wb
    xr = jnp.real(xs).reshape(N, C)
    xi = jnp.imag(xs).reshape(N, C)

    o_r, o_i = afno_spectral_mlp(xr, xi, params["w1"], params["b1"],
                                 params["w2"], params["b2"], sparsity_threshold)
    o_r = o_r.reshape(B, hb, wb, C)
    o_i = o_i.reshape(B, hb, wb, C)
    if not full_cover:
        zeros = jnp.zeros((B, H, Wh, C), jnp.float32)
        o_r = zeros.at[:, y_lo:y_hi, :x_hi, :].set(o_r)
        o_i = zeros.at[:, y_lo:y_hi, :x_hi, :].set(o_i)

    y = jnp.fft.irfft2(jax.lax.complex(o_r, o_i), s=(H, W), axes=(1, 2),
                       norm="ortho")
    return y.astype(dtype) + bias


# ----------------------------------------------------------------------------
# Pure-JAX f32 reference (mirrors the PyTorch module) for correctness checking
# ----------------------------------------------------------------------------
def _afno2d_reference(x, params, *, num_blocks, sparsity_threshold=0.01,
                      hard_thresholding_fraction=1.0):
    bias = x
    dtype = x.dtype
    x = x.astype(jnp.float32)
    B, H, W, C = x.shape
    bs = C // num_blocks
    Wh = W // 2 + 1
    xf = jnp.fft.rfft2(x, axes=(1, 2), norm="ortho")
    xr = jnp.real(xf).reshape(B, H, Wh, num_blocks, bs)
    xi = jnp.imag(xf).reshape(B, H, Wh, num_blocks, bs)
    w1, b1, w2, b2 = params["w1"], params["b1"], params["w2"], params["b2"]

    o1r = jnp.maximum(jnp.einsum('nyxbi,bio->nyxbo', xr, w1[0])
                      - jnp.einsum('nyxbi,bio->nyxbo', xi, w1[1]) + b1[0], 0.0)
    o1i = jnp.maximum(jnp.einsum('nyxbi,bio->nyxbo', xi, w1[0])
                      + jnp.einsum('nyxbi,bio->nyxbo', xr, w1[1]) + b1[1], 0.0)
    o2r = (jnp.einsum('nyxbi,bio->nyxbo', o1r, w2[0])
           - jnp.einsum('nyxbi,bio->nyxbo', o1i, w2[1]) + b2[0])
    o2i = (jnp.einsum('nyxbi,bio->nyxbo', o1i, w2[0])
           + jnp.einsum('nyxbi,bio->nyxbo', o1r, w2[1]) + b2[1])

    lam = sparsity_threshold
    shrink = lambda v: jnp.sign(v) * jnp.maximum(jnp.abs(v) - lam, 0.0)
    o2r, o2i = shrink(o2r), shrink(o2i)

    total_modes = H // 2 + 1
    kept = int(total_modes * hard_thresholding_fraction)
    y_idx = jnp.arange(H)
    x_idx = jnp.arange(Wh)
    mask = ((y_idx[:, None] >= total_modes - kept)
            & (y_idx[:, None] < total_modes + kept)
            & (x_idx[None, :] < kept)).astype(jnp.float32)[None, :, :, None, None]
    o2r = o2r * mask
    o2i = o2i * mask

    xc = (o2r + 1j * o2i).reshape(B, H, Wh, C)
    out = jnp.fft.irfft2(xc, s=(H, W), axes=(1, 2), norm="ortho")
    return out.astype(dtype) + bias


def init_params(key, hidden_size, num_blocks, hidden_size_factor=1, scale=0.02):
    bs = hidden_size // num_blocks
    k1, k2, k3, k4 = jax.random.split(key, 4)
    return {
        "w1": scale * jax.random.normal(
            k1, (2, num_blocks, bs, bs * hidden_size_factor), jnp.float32),
        "b1": scale * jax.random.normal(
            k2, (2, num_blocks, bs * hidden_size_factor), jnp.float32),
        "w2": scale * jax.random.normal(
            k3, (2, num_blocks, bs * hidden_size_factor, bs), jnp.float32),
        "b2": scale * jax.random.normal(
            k4, (2, num_blocks, bs), jnp.float32),
    }


if __name__ == "__main__":
    B, H, W = 2, 16, 16
    hidden_size = 32
    num_blocks = 4
    key = jax.random.PRNGKey(0)
    kx, kp = jax.random.split(key)

    x = jax.random.normal(kx, (B, H, W, hidden_size), jnp.float32)
    params = init_params(kp, hidden_size, num_blocks)

    # Full-coverage (default) path.
    fwd = jax.jit(functools.partial(
        afno2d_forward, num_blocks=num_blocks, sparsity_threshold=0.01,
        hard_thresholding_fraction=1.0, hidden_size_factor=1))
    out = fwd(x, params)
    jax.block_until_ready(out)
    assert out.shape == (B, H, W, hidden_size)

    ref = _afno2d_reference(x, params, num_blocks=num_blocks,
                            sparsity_threshold=0.01,
                            hard_thresholding_fraction=1.0)
    err = float(jnp.max(jnp.abs(out - ref)))
    assert err < 2e-2, f"max abs err {err}"   # bf16 MXU operands -> relaxed tol

    # Partial hard-thresholding path (kernel runs only on kept modes).
    fwd2 = jax.jit(functools.partial(
        afno2d_forward, num_blocks=num_blocks, sparsity_threshold=0.01,
        hard_thresholding_fraction=0.5, hidden_size_factor=1))
    out2 = fwd2(x, params)
    jax.block_until_ready(out2)
    ref2 = _afno2d_reference(x, params, num_blocks=num_blocks,
                             sparsity_threshold=0.01,
                             hard_thresholding_fraction=0.5)
    err2 = float(jnp.max(jnp.abs(out2 - ref2)))
    assert err2 < 2e-2, f"max abs err (thresholded) {err2}"

    print("KERNEL_OK")
</pallas_src>

<mosaic_0001>
module attributes {stable_mosaic.version = 11 : i64} {
  func.func @_afno_mlp_kernel(%arg0: i32, %arg1: memref<72x128xbf16, #tpu.memory_space<vmem>>, %arg2: memref<1x128x128xbf16, #tpu.memory_space<vmem>>, %arg3: memref<1x128x128xbf16, #tpu.memory_space<vmem>>, %arg4: memref<1x1x128xf32, #tpu.memory_space<vmem>>, %arg5: memref<1x1x128xf32, #tpu.memory_space<vmem>>, %arg6: memref<72x128xf32, #tpu.memory_space<vmem>>) attributes {dimension_semantics = [#tpu.dimension_semantics<parallel>], iteration_bounds = array<i64: 4>, scalar_prefetch = 0 : i64, scratch_operands = 0 : i64, tpu.core_type = #tpu.core_type<tc>, window_params = [{transform_indices = @transform_0, window_bounds = array<i64: 72, 128>}, {pipeline_mode = #tpu.pipeline_mode<synchronous>, transform_indices = @transform_1, window_bounds = array<i64: 1, 128, 128>}, {pipeline_mode = #tpu.pipeline_mode<synchronous>, transform_indices = @transform_2, window_bounds = array<i64: 1, 128, 128>}, {pipeline_mode = #tpu.pipeline_mode<synchronous>, transform_indices = @transform_3, window_bounds = array<i64: 1, 1, 128>}, {pipeline_mode = #tpu.pipeline_mode<synchronous>, transform_indices = @transform_4, window_bounds = array<i64: 1, 1, 128>}, {transform_indices = @transform_5, window_bounds = array<i64: 72, 128>}]} {
    %c0 = arith.constant 0 : index
    %c0_0 = arith.constant 0 : index
    %0 = vector.load %arg1[%c0, %c0_0] : memref<72x128xbf16, #tpu.memory_space<vmem>>, vector<72x128xbf16>
    %c0_1 = arith.constant 0 : index
    %c0_2 = arith.constant 0 : index
    %c0_3 = arith.constant 0 : index
    %1 = vector.load %arg2[%c0_1, %c0_2, %c0_3] : memref<1x128x128xbf16, #tpu.memory_space<vmem>>, vector<1x128x128xbf16>
    %2 = vector.shape_cast %1 : vector<1x128x128xbf16> to vector<128x128xbf16>
    %cst = arith.constant dense<0.000000e+00> : vector<72x128xf32>
    %3 = tpu.matmul %0, %2, %cst {dimension_numbers = #tpu.dot_dimension_numbers<[1], [0], [0], [1], [0, 0, 1, 1], [], []>} : vector<72x128xbf16>, vector<128x128xbf16>, vector<72x128xf32> -> vector<72x128xf32>
    %c0_4 = arith.constant 0 : index
    %c0_5 = arith.constant 0 : index
    %c0_6 = arith.constant 0 : index
    %4 = vector.load %arg4[%c0_4, %c0_5, %c0_6] : memref<1x1x128xf32, #tpu.memory_space<vmem>>, vector<1x1x128xf32>
    %5 = vector.shape_cast %4 : vector<1x1x128xf32> to vector<1x128xf32>
    %6 = vector.broadcast %5 : vector<1x128xf32> to vector<72x128xf32>
    %7 = arith.addf %3, %6 : vector<72x128xf32>
    %cst_7 = arith.constant 0.000000e+00 : f32
    %8 = vector.broadcast %cst_7 : f32 to vector<72x128xf32>
    %9 = arith.maximumf %7, %8 : vector<72x128xf32>
    %10 = arith.truncf %9 : vector<72x128xf32> to vector<72x128xbf16>
    %c0_8 = arith.constant 0 : index
    %c0_9 = arith.constant 0 : index
    %c0_10 = arith.constant 0 : index
    %11 = vector.load %arg3[%c0_8, %c0_9, %c0_10] : memref<1x128x128xbf16, #tpu.memory_space<vmem>>, vector<1x128x128xbf16>
    %12 = vector.shape_cast %11 : vector<1x128x128xbf16> to vector<128x128xbf16>
    %cst_11 = arith.constant dense<0.000000e+00> : vector<72x128xf32>
    %13 = tpu.matmul %10, %12, %cst_11 {dimension_numbers = #tpu.dot_dimension_numbers<[1], [0], [0], [1], [0, 0, 1, 1], [], []>} : vector<72x128xbf16>, vector<128x128xbf16>, vector<72x128xf32> -> vector<72x128xf32>
    %c0_12 = arith.constant 0 : index
    %c0_13 = arith.constant 0 : index
    %c0_14 = arith.constant 0 : index
    %14 = vector.load %arg5[%c0_12, %c0_13, %c0_14] : memref<1x1x128xf32, #tpu.memory_space<vmem>>, vector<1x1x128xf32>
    %15 = vector.shape_cast %14 : vector<1x1x128xf32> to vector<1x128xf32>
    %16 = vector.broadcast %15 : vector<1x128xf32> to vector<72x128xf32>
    %17 = arith.addf %13, %16 : vector<72x128xf32>
    %cst_15 = arith.constant -0.00999999977 : f32
    %cst_16 = arith.constant 0.00999999977 : f32
    %18 = vector.broadcast %cst_15 : f32 to vector<72x128xf32>
    %19 = arith.maximumf %18, %17 : vector<72x128xf32>
    %20 = vector.broadcast %cst_16 : f32 to vector<72x128xf32>
    %21 = arith.minimumf %20, %19 : vector<72x128xf32>
    %22 = arith.subf %17, %21 : vector<72x128xf32>
    %c0_17 = arith.constant 0 : index
    %c0_18 = arith.constant 0 : index
    %23 = vector.load %arg6[%c0_17, %c0_18] : memref<72x128xf32, #tpu.memory_space<vmem>>, vector<72x128xf32>
    tpu.vector_store %arg6[%c0_17, %c0_18], %22 {strides = array<i32>} : memref<72x128xf32, #tpu.memory_space<vmem>>, vector<72x128xf32>,
    return
  }
  func.func @transform_0(%arg0: i32) -> (i32, i32) {
    %c0_i32 = arith.constant 0 : i32
    %c0_i32_0 = arith.constant 0 : i32
    return %arg0, %c0_i32 : i32, i32
  }
  func.func @transform_1(%arg0: i32) -> (i32, i32, i32) {
    %c0_i32 = arith.constant 0 : i32
    %c0_i32_0 = arith.constant 0 : i32
    %c0_i32_1 = arith.constant 0 : i32
    %c0_i32_2 = arith.constant 0 : i32
    return %c0_i32, %c0_i32_0, %c0_i32_1 : i32, i32, i32
  }
  func.func @transform_2(%arg0: i32) -> (i32, i32, i32) {
    %c0_i32 = arith.constant 0 : i32
    %c0_i32_0 = arith.constant 0 : i32
    %c0_i32_1 = arith.constant 0 : i32
    %c0_i32_2 = arith.constant 0 : i32
    return %c0_i32, %c0_i32_0, %c0_i32_1 : i32, i32, i32
  }
  func.func @transform_3(%arg0: i32) -> (i32, i32, i32) {
    %c0_i32 = arith.constant 0 : i32
    %c0_i32_0 = arith.constant 0 : i32
    %c0_i32_1 = arith.constant 0 : i32
    %c0_i32_2 = arith.constant 0 : i32
    return %c0_i32, %c0_i32_0, %c0_i32_1 : i32, i32, i32
  }
  func.func @transform_4(%arg0: i32) -> (i32, i32, i32) {
    %c0_i32 = arith.constant 0 : i32
    %c0_i32_0 = arith.constant 0 : i32
    %c0_i32_1 = arith.constant 0 : i32
    %c0_i32_2 = arith.constant 0 : i32
    return %c0_i32, %c0_i32_0, %c0_i32_1 : i32, i32, i32
  }
  func.func @transform_5(%arg0: i32) -> (i32, i32) {
    %c0_i32 = arith.constant 0 : i32
    %c0_i32_0 = arith.constant 0 : i32
    return %arg0, %c0_i32 : i32, i32
  }
}

</mosaic_0001>

<bundles_post_ra>
// kernel: squeeze.18
= control target key start
LH: loop header
LB: loop body
LE: loop exit
PB: predicated region body
PF: predicated region fallthrough
CT: control target
= control target key end

     0   :  { %s4073_s10 = smov 123   ;;  %s4074_s19 = smov 121   ;;  %vm3_vm0 = vcmask 72704   ;;  %vm2503_vm1 = vcmask 1014784   ;;  %vm2670_vm2 = vcmask 1031168   ;;  %vm2507_vm3 = vcmask 31744   ;;  %s8718_s0 = inlined_call_operand.vmem [shape: f32[288,4,1,8], index: 0, kind: input, shape index: {}]   ;;  %s8719_s1 = inlined_call_operand.vmem [shape: f32[2,16,9,32], index: 1, kind: output, shape index: {}]  }
   0x1   :  { %v2886_v0 = vld [vmem:[%s8718_s0 + $0x40] sm:$0xff]   ;;  %v2868_v1 = vld [vmem:[%s8718_s0 + $0x10] sm:$0xff]   ;;  %v2895_v2 = vld [vmem:[%s8718_s0 + $0x58] sm:$0xff]   ;;  %s4075_s28 = smov 119   ;;  %s4076_s4 = smov 114   ;;  %vm2524_vm4 = vcmask 72736  }
   0x2   :  { %120 = vrot.lane.b32.xlu1 %v2886_v0, %s4073_s10  ;;  %78 = vrot.lane.b32.xlu0 %v2868_v1, %s4073_s10  ;;  %v2877_v3 = vld [vmem:[%s8718_s0 + $0x28] sm:$0xff]   ;;  %v4129_v4 = vld [vmem:[%s8718_s0 + $0x20] sm:$0xff]   ;;  %s4077_s5 = smov 112   ;;  %s4078_s6 = smov 110   ;;  %vm2674_vm5 = vcmask 15360   ;;  %vm2691_vm6 = vcmask 72720  }
   0x3   :  { %v4134_v5 = vld [vmem:[%s8718_s0 + $0x8] sm:$0xff]   ;;  %v4141_v6 = vld [vmem:[%s8718_s0 + $0x50] sm:$0xff]   ;;  %v4146_v7 = vld [vmem:[%s8718_s0 + $0x38] sm:$0xff]   ;;  %s4079_s7 = smov 105   ;;  %s4080_s8 = smov 103  }
   0x4   :  { %v4153_v8 = vld [vmem:[%s8718_s0 + $0x18] sm:$0xff]   ;;  %v4158_v9 = vld [vmem:[%s8718_s0] sm:$0xff]   ;;  %v4165_v10 = vld [vmem:[%s8718_s0 + $0x48] sm:$0xff]   ;;  %s4081_s9 = smov 101   ;;  %s4083_s11 = smov 92  }
   0x5   :  { %v4170_v11 = vld [vmem:[%s8718_s0 + $0x30] sm:$0xff]   ;;  %s4084_s12 = smov 85   ;;  %s4085_s13 = smov 83   ;;  %v5337_v46 = vld [vmem:[%s8718_s0 + $0x20] sm:$0xff]   ;;  %v5342_v47 = vld [vmem:[%s8718_s0 + $0x8] sm:$0xff]  }
   0x6   :  { %141 = vrot.lane.b32.xlu1 %v2895_v2, %s4073_s10  ;;  %99 = vrot.lane.b32.xlu0 %v2877_v3, %s4073_s10  ;;  %s4082_s10 = smov 94   ;;  %s4086_s14 = smov 76   ;;  %v3900_v50 = vld [vmem:[%s8718_s0 + $0x10] sm:$0xff]   ;;  %v5420_v52 = vld [vmem:[%s8718_s0 + $0x38] sm:$0xff]  }
   0x7   :  { %s4087_s15 = smov 74   ;;  %s4088_s22 = smov 67   ;;  %v2504_v51 = vsel %vm2503_vm1, %v3900_v50, %v5342_v47  ;;  %v3936_v55 = vld [vmem:[%s8718_s0 + $0x40] sm:$0xff]   ;;  %v3918_v56 = vld [vmem:[%s8718_s0 + $0x28] sm:$0xff]   ;;  %v5507_v62 = vld [vmem:[%s8718_s0 + $0x50] sm:$0xff]  }
   0x8   :  { %s4089_s29 = smov 65   ;;  %s4092_s21 = smov 49   ;;  %v2588_v57 = vsel %vm2503_vm1, %v3936_v55, %v5420_v52  ;;  %v2546_v58 = vsel %vm2503_vm1, %v3918_v56, %v5337_v46  ;;  %v5502_v61 = vld [vmem:[%s8718_s0] sm:$0xff]   ;;  %v3954_v63 = vld [vmem:[%s8718_s0 + $0x58] sm:$0xff]  }
   0x9   :  { %s4098_s3 = smov 2   ;;  %s4099_s18 = smov 29  }
   0xa   :  { %183 = vrot.lane.b32.xlu1 %v4129_v4, %s4074_s19  ;;  %162 = vrot.lane.b32.xlu0 %v4134_v5, %s4074_s19  ;;  %s4100_s24 = smov 22   ;;  %s4103_s27 = smov 11  }
   0xe   :  { %225 = vrot.lane.b32.xlu1 %v4141_v6, %s4074_s19  ;;  %204 = vrot.lane.b32.xlu0 %v4146_v7, %s4074_s19 }
  0x12   :  { %266 = vrot.lane.b32.xlu1 %v4153_v8, %s4075_s28  ;;  %245 = vrot.lane.b32.xlu0 %v4158_v9, %s4075_s28 }
  0x16   :  { %308 = vrot.lane.b32.xlu1 %v4165_v10, %s4075_s28  ;;  %287 = vrot.lane.b32.xlu0 %v4170_v11, %s4075_s28  ;;  %s4093_s28 = smov 47  }
  0x1a   :  { %350 = vrot.lane.b32.xlu1 %v2877_v3, %s4076_s4  ;;  %329 = vrot.lane.b32.xlu0 %v2868_v1, %s4076_s4 }
  0x1e   :  { %392 = vrot.lane.b32.xlu1 %v2895_v2, %s4076_s4  ;;  %371 = vrot.lane.b32.xlu0 %v2886_v0, %s4076_s4 }
  0x22   :  { %434 = vrot.lane.b32.xlu1 %v4129_v4, %s4077_s5  ;;  %413 = vrot.lane.b32.xlu0 %v4134_v5, %s4077_s5 }
  0x26   :  { %476 = vrot.lane.b32.xlu1 %v4141_v6, %s4077_s5  ;;  %455 = vrot.lane.b32.xlu0 %v4146_v7, %s4077_s5 }
  0x2a   :  { %517 = vrot.lane.b32.xlu1 %v4153_v8, %s4078_s6  ;;  %496 = vrot.lane.b32.xlu0 %v4158_v9, %s4078_s6 }
  0x2e   :  { %559 = vrot.lane.b32.xlu1 %v4165_v10, %s4078_s6  ;;  %538 = vrot.lane.b32.xlu0 %v4170_v11, %s4078_s6  ;;  %s4094_s6 = smov 40  }
  0x32   :  { %601 = vrot.lane.b32.xlu1 %v2877_v3, %s4079_s7  ;;  %580 = vrot.lane.b32.xlu0 %v2868_v1, %s4079_s7  ;;  %v2630_v1 = vsel %vm2503_vm1, %v3954_v63, %v5507_v62 }
  0x36   :  { %643 = vrot.lane.b32.xlu1 %v2895_v2, %s4079_s7  ;;  %622 = vrot.lane.b32.xlu0 %v2886_v0, %s4079_s7  ;;  %s4090_s7 = smov 58   ;;  %v2671_v0 = vsel %vm2670_vm2, %v5342_v47, %v5502_v61 }
  0x3a   :  { %685 = vrot.lane.b32.xlu1 %v4129_v4, %s4080_s8  ;;  %664 = vrot.lane.b32.xlu0 %v4134_v5, %s4080_s8 }
  0x3e   :  { %727 = vrot.lane.b32.xlu1 %v4141_v6, %s4080_s8  ;;  %706 = vrot.lane.b32.xlu0 %v4146_v7, %s4080_s8 }
  0x42   :  { %768 = vrot.lane.b32.xlu1 %v4153_v8, %s4081_s9  ;;  %747 = vrot.lane.b32.xlu0 %v4158_v9, %s4081_s9 }
  0x46   :  { %810 = vrot.lane.b32.xlu1 %v4165_v10, %s4081_s9  ;;  %789 = vrot.lane.b32.xlu0 %v4170_v11, %s4081_s9 }
  0x4a   :  { %852 = vrot.lane.b32.xlu1 %v4129_v4, %s4082_s10  ;;  %831 = vrot.lane.b32.xlu0 %v4134_v5, %s4082_s10 }
  0x4e   :  { %894 = vrot.lane.b32.xlu1 %v4141_v6, %s4082_s10  ;;  %873 = vrot.lane.b32.xlu0 %v4146_v7, %s4082_s10  ;;  %s4097_s10 = smov 4  }
  0x52   :  { %935 = vrot.lane.b32.xlu1 %v4153_v8, %s4083_s11  ;;  %914 = vrot.lane.b32.xlu0 %v4158_v9, %s4083_s11 }
  0x56   :  { %977 = vrot.lane.b32.xlu1 %v4165_v10, %s4083_s11  ;;  %956 = vrot.lane.b32.xlu0 %v4170_v11, %s4083_s11 }
  0x5a   :  { %1019 = vrot.lane.b32.xlu1 %v4129_v4, %s4084_s12  ;;  %998 = vrot.lane.b32.xlu0 %v4134_v5, %s4084_s12 }
  0x5e   :  { %1061 = vrot.lane.b32.xlu1 %v4141_v6, %s4084_s12  ;;  %1040 = vrot.lane.b32.xlu0 %v4146_v7, %s4084_s12 }
  0x62   :  { %1102 = vrot.lane.b32.xlu1 %v4153_v8, %s4085_s13  ;;  %1081 = vrot.lane.b32.xlu0 %v4158_v9, %s4085_s13 }
  0x66   :  { %1144 = vrot.lane.b32.xlu1 %v4165_v10, %s4085_s13  ;;  %1123 = vrot.lane.b32.xlu0 %v4170_v11, %s4085_s13  ;;  %s4095_s13 = smov 38  }
  0x6a   :  { %1186 = vrot.lane.b32.xlu1 %v4129_v4, %s4086_s14  ;;  %1165 = vrot.lane.b32.xlu0 %v4134_v5, %s4086_s14 }
  0x6e   :  { %1228 = vrot.lane.b32.xlu1 %v4141_v6, %s4086_s14  ;;  %1207 = vrot.lane.b32.xlu0 %v4146_v7, %s4086_s14  ;;  %s4091_s14 = smov 56  }
  0x72   :  { %1269 = vrot.lane.b32.xlu1 %v4153_v8, %s4087_s15  ;;  %1248 = vrot.lane.b32.xlu0 %v4158_v9, %s4087_s15 }
  0x74   :  { %v121_v12 = vpop.permute.xlu1 %120   ;;  %v79_v13 = vpop.permute.xlu0 %78  }
  0x75   :  { %2887 = vst.msk [vmem:[%s8719_s1 + $0x21d] sm:$0x1] %vm3_vm0, %v121_v12   ;;  %2888 = vst.msk [vmem:[%s8719_s1 + $0x23c] sm:$0x2] %vm3_vm0, %v121_v12  }
  0x76   :  { %2889 = vst.msk [vmem:[%s8719_s1 + $0x25b] sm:$0x4] %vm3_vm0, %v121_v12   ;;  %2890 = vst.msk [vmem:[%s8719_s1 + $0x27a] sm:$0x8] %vm3_vm0, %v121_v12   ;;  %1311 = vrot.lane.b32.xlu1 %v4165_v10, %s4087_s15  ;;  %1290 = vrot.lane.b32.xlu0 %v4170_v11, %s4087_s15 }
  0x77   :  { %2891 = vst.msk [vmem:[%s8719_s1 + $0x299] sm:$0x10] %vm3_vm0, %v121_v12   ;;  %2892 = vst.msk [vmem:[%s8719_s1 + $0x2b8] sm:$0x20] %vm3_vm0, %v121_v12  }
  0x78   :  { %2893 = vst.msk [vmem:[%s8719_s1 + $0x2d7] sm:$0x40] %vm3_vm0, %v121_v12   ;;  %2894 = vst.msk [vmem:[%s8719_s1 + $0x2f6] sm:$0x80] %vm3_vm0, %v121_v12   ;;  %v142_v14 = vpop.permute.xlu1 %141   ;;  %v100_v15 = vpop.permute.xlu0 %99  }
  0x79   :  { %2869 = vst.msk [vmem:[%s8719_s1 + $0x1d] sm:$0x1] %vm3_vm0, %v79_v13   ;;  %2870 = vst.msk [vmem:[%s8719_s1 + $0x3c] sm:$0x2] %vm3_vm0, %v79_v13  }
  0x7a   :  { %2871 = vst.msk [vmem:[%s8719_s1 + $0x5b] sm:$0x4] %vm3_vm0, %v79_v13   ;;  %2872 = vst.msk [vmem:[%s8719_s1 + $0x7a] sm:$0x8] %vm3_vm0, %v79_v13   ;;  %1353 = vrot.lane.b32.xlu1 %v4129_v4, %s4088_s22  ;;  %1332 = vrot.lane.b32.xlu0 %v4134_v5, %s4088_s22 }
  0x7b   :  { %2873 = vst.msk [vmem:[%s8719_s1 + $0x99] sm:$0x10] %vm3_vm0, %v79_v13   ;;  %2874 = vst.msk [vmem:[%s8719_s1 + $0xb8] sm:$0x20] %vm3_vm0, %v79_v13  }
  0x7c   :  { %2875 = vst.msk [vmem:[%s8719_s1 + $0xd7] sm:$0x40] %vm3_vm0, %v79_v13   ;;  %2876 = vst.msk [vmem:[%s8719_s1 + $0xf6] sm:$0x80] %vm3_vm0, %v79_v13   ;;  %v184_v16 = vpop.permute.xlu1 %183   ;;  %v163_v17 = vpop.permute.xlu0 %162  }
  0x7d   :  { %2896 = vst.msk [vmem:[%s8719_s1 + $0x31d] sm:$0x1] %vm3_vm0, %v142_v14   ;;  %2897 = vst.msk [vmem:[%s8719_s1 + $0x33c] sm:$0x2] %vm3_vm0, %v142_v14  }
  0x7e   :  { %2898 = vst.msk [vmem:[%s8719_s1 + $0x35b] sm:$0x4] %vm3_vm0, %v142_v14   ;;  %2899 = vst.msk [vmem:[%s8719_s1 + $0x37a] sm:$0x8] %vm3_vm0, %v142_v14   ;;  %1395 = vrot.lane.b32.xlu1 %v4141_v6, %s4088_s22  ;;  %1374 = vrot.lane.b32.xlu0 %v4146_v7, %s4088_s22  ;;  %s4096_s22 = smov 31  }
  0x7f   :  { %2900 = vst.msk [vmem:[%s8719_s1 + $0x399] sm:$0x10] %vm3_vm0, %v142_v14   ;;  %2901 = vst.msk [vmem:[%s8719_s1 + $0x3b8] sm:$0x20] %vm3_vm0, %v142_v14  }
  0x80   :  { %2902 = vst.msk [vmem:[%s8719_s1 + $0x3d7] sm:$0x40] %vm3_vm0, %v142_v14   ;;  %2903 = vst.msk [vmem:[%s8719_s1 + $0x3f6] sm:$0x80] %vm3_vm0, %v142_v14   ;;  %v226_v18 = vpop.permute.xlu1 %225   ;;  %v205_v19 = vpop.permute.xlu0 %204  }
  0x81   :  { %2878 = vst.msk [vmem:[%s8719_s1 + $0x11d] sm:$0x1] %vm3_vm0, %v100_v15   ;;  %2879 = vst.msk [vmem:[%s8719_s1 + $0x13c] sm:$0x2] %vm3_vm0, %v100_v15  }
  0x82   :  { %2880 = vst.msk [vmem:[%s8719_s1 + $0x15b] sm:$0x4] %vm3_vm0, %v100_v15   ;;  %2881 = vst.msk [vmem:[%s8719_s1 + $0x17a] sm:$0x8] %vm3_vm0, %v100_v15   ;;  %1436 = vrot.lane.b32.xlu1 %v4153_v8, %s4089_s29  ;;  %1415 = vrot.lane.b32.xlu0 %v4158_v9, %s4089_s29 }
  0x83   :  { %2882 = vst.msk [vmem:[%s8719_s1 + $0x199] sm:$0x10] %vm3_vm0, %v100_v15   ;;  %2883 = vst.msk [vmem:[%s8719_s1 + $0x1b8] sm:$0x20] %vm3_vm0, %v100_v15  }
  0x84   :  { %2884 = vst.msk [vmem:[%s8719_s1 + $0x1d7] sm:$0x40] %vm3_vm0, %v100_v15   ;;  %2885 = vst.msk [vmem:[%s8719_s1 + $0x1f6] sm:$0x80] %vm3_vm0, %v100_v15   ;;  %v267_v20 = vpop.permute.xlu1 %266   ;;  %v246_v21 = vpop.permute.xlu0 %245  }
  0x85   :  { %2914 = vst.msk [vmem:[%s8719_s1 + $0x10f] sm:$0x1] %vm3_vm0, %v184_v16   ;;  %2915 = vst.msk [vmem:[%s8719_s1 + $0x12e] sm:$0x2] %vm3_vm0, %v184_v16  }
  0x86   :  { %2916 = vst.msk [vmem:[%s8719_s1 + $0x14d] sm:$0x4] %vm3_vm0, %v184_v16   ;;  %2917 = vst.msk [vmem:[%s8719_s1 + $0x16c] sm:$0x8] %vm3_vm0, %v184_v16   ;;  %1478 = vrot.lane.b32.xlu1 %v4165_v10, %s4089_s29  ;;  %1457 = vrot.lane.b32.xlu0 %v4170_v11, %s4089_s29 }
  0x87   :  { %2918 = vst.msk [vmem:[%s8719_s1 + $0x18b] sm:$0x10] %vm3_vm0, %v184_v16   ;;  %2919 = vst.msk [vmem:[%s8719_s1 + $0x1aa] sm:$0x20] %vm3_vm0, %v184_v16  }
  0x88   :  { %2920 = vst.msk [vmem:[%s8719_s1 + $0x1c9] sm:$0x40] %vm3_vm0, %v184_v16   ;;  %2921 = vst.msk [vmem:[%s8719_s1 + $0x1e8] sm:$0x80] %vm3_vm0, %v184_v16   ;;  %v309_v22 = vpop.permute.xlu1 %308   ;;  %v288_v23 = vpop.permute.xlu0 %287  }
  0x89   :  { %2905 = vst.msk [vmem:[%s8719_s1 + $0xf] sm:$0x1] %vm3_vm0, %v163_v17   ;;  %2906 = vst.msk [vmem:[%s8719_s1 + $0x2e] sm:$0x2] %vm3_vm0, %v163_v17  }
  0x8a   :  { %2907 = vst.msk [vmem:[%s8719_s1 + $0x4d] sm:$0x4] %vm3_vm0, %v163_v17   ;;  %2908 = vst.msk [vmem:[%s8719_s1 + $0x6c] sm:$0x8] %vm3_vm0, %v163_v17   ;;  %1520 = vrot.lane.b32.xlu1 %v4129_v4, %s4090_s7  ;;  %1499 = vrot.lane.b32.xlu0 %v4134_v5, %s4090_s7 }
  0x8b   :  { %2909 = vst.msk [vmem:[%s8719_s1 + $0x8b] sm:$0x10] %vm3_vm0, %v163_v17   ;;  %2910 = vst.msk [vmem:[%s8719_s1 + $0xaa] sm:$0x20] %vm3_vm0, %v163_v17  }
  0x8c   :  { %2911 = vst.msk [vmem:[%s8719_s1 + $0xc9] sm:$0x40] %vm3_vm0, %v163_v17   ;;  %2912 = vst.msk [vmem:[%s8719_s1 + $0xe8] sm:$0x80] %vm3_vm0, %v163_v17   ;;  %v351_v24 = vpop.permute.xlu1 %350   ;;  %v330_v25 = vpop.permute.xlu0 %329  }
  0x8d   :  { %2932 = vst.msk [vmem:[%s8719_s1 + $0x30f] sm:$0x1] %vm3_vm0, %v226_v18   ;;  %2933 = vst.msk [vmem:[%s8719_s1 + $0x32e] sm:$0x2] %vm3_vm0, %v226_v18  }
  0x8e   :  { %2934 = vst.msk [vmem:[%s8719_s1 + $0x34d] sm:$0x4] %vm3_vm0, %v226_v18   ;;  %2935 = vst.msk [vmem:[%s8719_s1 + $0x36c] sm:$0x8] %vm3_vm0, %v226_v18   ;;  %1562 = vrot.lane.b32.xlu1 %v4141_v6, %s4090_s7  ;;  %1541 = vrot.lane.b32.xlu0 %v4146_v7, %s4090_s7 }
  0x8f   :  { %2936 = vst.msk [vmem:[%s8719_s1 + $0x38b] sm:$0x10] %vm3_vm0, %v226_v18   ;;  %2937 = vst.msk [vmem:[%s8719_s1 + $0x3aa] sm:$0x20] %vm3_vm0, %v226_v18  }
  0x90   :  { %2938 = vst.msk [vmem:[%s8719_s1 + $0x3c9] sm:$0x40] %vm3_vm0, %v226_v18   ;;  %2939 = vst.msk [vmem:[%s8719_s1 + $0x3e8] sm:$0x80] %vm3_vm0, %v226_v18   ;;  %v393_v26 = vpop.permute.xlu1 %392   ;;  %v372_v27 = vpop.permute.xlu0 %371  }
  0x91   :  { %2923 = vst.msk [vmem:[%s8719_s1 + $0x20f] sm:$0x1] %vm3_vm0, %v205_v19   ;;  %2924 = vst.msk [vmem:[%s8719_s1 + $0x22e] sm:$0x2] %vm3_vm0, %v205_v19  }
  0x92   :  { %2925 = vst.msk [vmem:[%s8719_s1 + $0x24d] sm:$0x4] %vm3_vm0, %v205_v19   ;;  %2926 = vst.msk [vmem:[%s8719_s1 + $0x26c] sm:$0x8] %vm3_vm0, %v205_v19   ;;  %1603 = vrot.lane.b32.xlu1 %v4153_v8, %s4091_s14  ;;  %1582 = vrot.lane.b32.xlu0 %v4158_v9, %s4091_s14 }
  0x93   :  { %2927 = vst.msk [vmem:[%s8719_s1 + $0x28b] sm:$0x10] %vm3_vm0, %v205_v19   ;;  %2928 = vst.msk [vmem:[%s8719_s1 + $0x2aa] sm:$0x20] %vm3_vm0, %v205_v19  }
  0x94   :  { %2929 = vst.msk [vmem:[%s8719_s1 + $0x2c9] sm:$0x40] %vm3_vm0, %v205_v19   ;;  %2930 = vst.msk [vmem:[%s8719_s1 + $0x2e8] sm:$0x80] %vm3_vm0, %v205_v19   ;;  %v435_v28 = vpop.permute.xlu1 %434   ;;  %v414_v29 = vpop.permute.xlu0 %413  }
  0x95   :  { %2949 = vst.msk [vmem:[%s8719_s1 + $0x101] sm:$0x1] %vm3_vm0, %v267_v20   ;;  %2950 = vst.msk [vmem:[%s8719_s1 + $0x120] sm:$0x2] %vm3_vm0, %v267_v20  }
  0x96   :  { %2951 = vst.msk [vmem:[%s8719_s1 + $0x13f] sm:$0x4] %vm3_vm0, %v267_v20   ;;  %2952 = vst.msk [vmem:[%s8719_s1 + $0x15e] sm:$0x8] %vm3_vm0, %v267_v20   ;;  %1645 = vrot.lane.b32.xlu1 %v4165_v10, %s4091_s14  ;;  %1624 = vrot.lane.b32.xlu0 %v4170_v11, %s4091_s14 }
  0x97   :  { %2953 = vst.msk [vmem:[%s8719_s1 + $0x17d] sm:$0x10] %vm3_vm0, %v267_v20   ;;  %2954 = vst.msk [vmem:[%s8719_s1 + $0x19c] sm:$0x20] %vm3_vm0, %v267_v20  }
  0x98   :  { %2955 = vst.msk [vmem:[%s8719_s1 + $0x1bb] sm:$0x40] %vm3_vm0, %v267_v20   ;;  %2956 = vst.msk [vmem:[%s8719_s1 + $0x1da] sm:$0x80] %vm3_vm0, %v267_v20   ;;  %v477_v30 = vpop.permute.xlu1 %476   ;;  %v456_v31 = vpop.permute.xlu0 %455  }
  0x99   :  { %2940 = vst.msk [vmem:[%s8719_s1 + $0x1] sm:$0x1] %vm3_vm0, %v246_v21   ;;  %2941 = vst.msk [vmem:[%s8719_s1 + $0x20] sm:$0x2] %vm3_vm0, %v246_v21  }
  0x9a   :  { %2942 = vst.msk [vmem:[%s8719_s1 + $0x3f] sm:$0x4] %vm3_vm0, %v246_v21   ;;  %2943 = vst.msk [vmem:[%s8719_s1 + $0x5e] sm:$0x8] %vm3_vm0, %v246_v21   ;;  %1687 = vrot.lane.b32.xlu1 %v4129_v4, %s4092_s21  ;;  %1666 = vrot.lane.b32.xlu0 %v4134_v5, %s4092_s21 }
  0x9b   :  { %2944 = vst.msk [vmem:[%s8719_s1 + $0x7d] sm:$0x10] %vm3_vm0, %v246_v21   ;;  %2945 = vst.msk [vmem:[%s8719_s1 + $0x9c] sm:$0x20] %vm3_vm0, %v246_v21  }
  0x9c   :  { %2946 = vst.msk [vmem:[%s8719_s1 + $0xbb] sm:$0x40] %vm3_vm0, %v246_v21   ;;  %2947 = vst.msk [vmem:[%s8719_s1 + $0xda] sm:$0x80] %vm3_vm0, %v246_v21   ;;  %v518_v32 = vpop.permute.xlu1 %517   ;;  %v497_v33 = vpop.permute.xlu0 %496  }
  0x9d   :  { %2967 = vst.msk [vmem:[%s8719_s1 + $0x301] sm:$0x1] %vm3_vm0, %v309_v22   ;;  %2968 = vst.msk [vmem:[%s8719_s1 + $0x320] sm:$0x2] %vm3_vm0, %v309_v22  }
  0x9e   :  { %2969 = vst.msk [vmem:[%s8719_s1 + $0x33f] sm:$0x4] %vm3_vm0, %v309_v22   ;;  %2970 = vst.msk [vmem:[%s8719_s1 + $0x35e] sm:$0x8] %vm3_vm0, %v309_v22   ;;  %1729 = vrot.lane.b32.xlu1 %v4141_v6, %s4092_s21  ;;  %1708 = vrot.lane.b32.xlu0 %v4146_v7, %s4092_s21 }
  0x9f   :  { %2971 = vst.msk [vmem:[%s8719_s1 + $0x37d] sm:$0x10] %vm3_vm0, %v309_v22   ;;  %2972 = vst.msk [vmem:[%s8719_s1 + $0x39c] sm:$0x20] %vm3_vm0, %v309_v22  }
  0xa0   :  { %2973 = vst.msk [vmem:[%s8719_s1 + $0x3bb] sm:$0x40] %vm3_vm0, %v309_v22   ;;  %2974 = vst.msk [vmem:[%s8719_s1 + $0x3da] sm:$0x80] %vm3_vm0, %v309_v22   ;;  %v560_v34 = vpop.permute.xlu1 %559   ;;  %v539_v35 = vpop.permute.xlu0 %538  }
  0xa1   :  { %2958 = vst.msk [vmem:[%s8719_s1 + $0x201] sm:$0x1] %vm3_vm0, %v288_v23   ;;  %2959 = vst.msk [vmem:[%s8719_s1 + $0x220] sm:$0x2] %vm3_vm0, %v288_v23  }
  0xa2   :  { %2960 = vst.msk [vmem:[%s8719_s1 + $0x23f] sm:$0x4] %vm3_vm0, %v288_v23   ;;  %2961 = vst.msk [vmem:[%s8719_s1 + $0x25e] sm:$0x8] %vm3_vm0, %v288_v23   ;;  %1770 = vrot.lane.b32.xlu1 %v4153_v8, %s4093_s28  ;;  %1749 = vrot.lane.b32.xlu0 %v4158_v9, %s4093_s28 }
  0xa3   :  { %2962 = vst.msk [vmem:[%s8719_s1 + $0x27d] sm:$0x10] %vm3_vm0, %v288_v23   ;;  %2963 = vst.msk [vmem:[%s8719_s1 + $0x29c] sm:$0x20] %vm3_vm0, %v288_v23  }
  0xa4   :  { %2964 = vst.msk [vmem:[%s8719_s1 + $0x2bb] sm:$0x40] %vm3_vm0, %v288_v23   ;;  %2965 = vst.msk [vmem:[%s8719_s1 + $0x2da] sm:$0x80] %vm3_vm0, %v288_v23   ;;  %v602_v36 = vpop.permute.xlu1 %601   ;;  %v581_v37 = vpop.permute.xlu0 %580  }
  0xa5   :  { %2985 = vst.msk [vmem:[%s8719_s1 + $0x11e] sm:$0x1] %vm3_vm0, %v351_v24   ;;  %2986 = vst.msk [vmem:[%s8719_s1 + $0x13d] sm:$0x2] %vm3_vm0, %v351_v24  }
  0xa6   :  { %2987 = vst.msk [vmem:[%s8719_s1 + $0x15c] sm:$0x4] %vm3_vm0, %v351_v24   ;;  %2988 = vst.msk [vmem:[%s8719_s1 + $0x17b] sm:$0x8] %vm3_vm0, %v351_v24   ;;  %1812 = vrot.lane.b32.xlu1 %v4165_v10, %s4093_s28  ;;  %1791 = vrot.lane.b32.xlu0 %v4170_v11, %s4093_s28 }
  0xa7   :  { %2989 = vst.msk [vmem:[%s8719_s1 + $0x19a] sm:$0x10] %vm3_vm0, %v351_v24   ;;  %2990 = vst.msk [vmem:[%s8719_s1 + $0x1b9] sm:$0x20] %vm3_vm0, %v351_v24  }
  0xa8   :  { %2991 = vst.msk [vmem:[%s8719_s1 + $0x1d8] sm:$0x40] %vm3_vm0, %v351_v24   ;;  %2992 = vst.msk [vmem:[%s8719_s1 + $0x1f7] sm:$0x80] %vm3_vm0, %v351_v24   ;;  %v644_v38 = vpop.permute.xlu1 %643   ;;  %v623_v39 = vpop.permute.xlu0 %622  }
  0xa9   :  { %2976 = vst.msk [vmem:[%s8719_s1 + $0x1e] sm:$0x1] %vm3_vm0, %v330_v25   ;;  %2977 = vst.msk [vmem:[%s8719_s1 + $0x3d] sm:$0x2] %vm3_vm0, %v330_v25  }
  0xaa   :  { %2978 = vst.msk [vmem:[%s8719_s1 + $0x5c] sm:$0x4] %vm3_vm0, %v330_v25   ;;  %2979 = vst.msk [vmem:[%s8719_s1 + $0x7b] sm:$0x8] %vm3_vm0, %v330_v25   ;;  %1854 = vrot.lane.b32.xlu1 %v4129_v4, %s4094_s6  ;;  %1833 = vrot.lane.b32.xlu0 %v4134_v5, %s4094_s6 }
  0xab   :  { %2980 = vst.msk [vmem:[%s8719_s1 + $0x9a] sm:$0x10] %vm3_vm0, %v330_v25   ;;  %2981 = vst.msk [vmem:[%s8719_s1 + $0xb9] sm:$0x20] %vm3_vm0, %v330_v25   ;;  %v5586_v4 = vld [vmem:[%s8718_s0 + $0x30] sm:$0xff]   ;;  %v5591_v5 = vld [vmem:[%s8718_s0 + $0x18] sm:$0xff]  }
  0xac   :  { %2982 = vst.msk [vmem:[%s8719_s1 + $0xd8] sm:$0x40] %vm3_vm0, %v330_v25   ;;  %2983 = vst.msk [vmem:[%s8719_s1 + $0xf7] sm:$0x80] %vm3_vm0, %v330_v25   ;;  %v686_v40 = vpop.permute.xlu1 %685   ;;  %v665_v41 = vpop.permute.xlu0 %664  }
  0xad   :  { %3003 = vst.msk [vmem:[%s8719_s1 + $0x31e] sm:$0x1] %vm3_vm0, %v393_v26   ;;  %3004 = vst.msk [vmem:[%s8719_s1 + $0x33d] sm:$0x2] %vm3_vm0, %v393_v26  }
  0xae   :  { %3005 = vst.msk [vmem:[%s8719_s1 + $0x35c] sm:$0x4] %vm3_vm0, %v393_v26   ;;  %3006 = vst.msk [vmem:[%s8719_s1 + $0x37b] sm:$0x8] %vm3_vm0, %v393_v26   ;;  %1896 = vrot.lane.b32.xlu1 %v4141_v6, %s4094_s6  ;;  %1875 = vrot.lane.b32.xlu0 %v4146_v7, %s4094_s6  ;;  %v2755_v6 = vsel %vm2670_vm2, %v5420_v52, %v5586_v4  ;;  %v2713_v7 = vsel %vm2670_vm2, %v5337_v46, %v5591_v5 }
  0xaf   :  { %3007 = vst.msk [vmem:[%s8719_s1 + $0x39a] sm:$0x10] %vm3_vm0, %v393_v26   ;;  %3008 = vst.msk [vmem:[%s8719_s1 + $0x3b9] sm:$0x20] %vm3_vm0, %v393_v26  }
  0xb0   :  { %3009 = vst.msk [vmem:[%s8719_s1 + $0x3d8] sm:$0x40] %vm3_vm0, %v393_v26   ;;  %3010 = vst.msk [vmem:[%s8719_s1 + $0x3f7] sm:$0x80] %vm3_vm0, %v393_v26   ;;  %v728_v42 = vpop.permute.xlu1 %727   ;;  %v707_v43 = vpop.permute.xlu0 %706  }
  0xb1   :  { %2994 = vst.msk [vmem:[%s8719_s1 + $0x21e] sm:$0x1] %vm3_vm0, %v372_v27   ;;  %2995 = vst.msk [vmem:[%s8719_s1 + $0x23d] sm:$0x2] %vm3_vm0, %v372_v27  }
  0xb2   :  { %2996 = vst.msk [vmem:[%s8719_s1 + $0x25c] sm:$0x4] %vm3_vm0, %v372_v27   ;;  %2997 = vst.msk [vmem:[%s8719_s1 + $0x27b] sm:$0x8] %vm3_vm0, %v372_v27   ;;  %1937 = vrot.lane.b32.xlu1 %v4153_v8, %s4095_s13  ;;  %1916 = vrot.lane.b32.xlu0 %v4158_v9, %s4095_s13 }
  0xb3   :  { %2998 = vst.msk [vmem:[%s8719_s1 + $0x29a] sm:$0x10] %vm3_vm0, %v372_v27   ;;  %2999 = vst.msk [vmem:[%s8719_s1 + $0x2b9] sm:$0x20] %vm3_vm0, %v372_v27  }
  0xb4   :  { %3000 = vst.msk [vmem:[%s8719_s1 + $0x2d8] sm:$0x40] %vm3_vm0, %v372_v27   ;;  %3001 = vst.msk [vmem:[%s8719_s1 + $0x2f7] sm:$0x80] %vm3_vm0, %v372_v27   ;;  %v769_v44 = vpop.permute.xlu1 %768   ;;  %v748_v45 = vpop.permute.xlu0 %747  }
  0xb5   :  { %3021 = vst.msk [vmem:[%s8719_s1 + $0x110] sm:$0x1] %vm3_vm0, %v435_v28   ;;  %3022 = vst.msk [vmem:[%s8719_s1 + $0x12f] sm:$0x2] %vm3_vm0, %v435_v28  }
  0xb6   :  { %3023 = vst.msk [vmem:[%s8719_s1 + $0x14e] sm:$0x4] %vm3_vm0, %v435_v28   ;;  %3024 = vst.msk [vmem:[%s8719_s1 + $0x16d] sm:$0x8] %vm3_vm0, %v435_v28   ;;  %1979 = vrot.lane.b32.xlu1 %v4165_v10, %s4095_s13  ;;  %1958 = vrot.lane.b32.xlu0 %v4170_v11, %s4095_s13 }
  0xb7   :  { %3025 = vst.msk [vmem:[%s8719_s1 + $0x18c] sm:$0x10] %vm3_vm0, %v435_v28   ;;  %3026 = vst.msk [vmem:[%s8719_s1 + $0x1ab] sm:$0x20] %vm3_vm0, %v435_v28   ;;  %v5668_v10 = vld [vmem:[%s8718_s0 + $0x48] sm:$0xff]  }
  0xb8   :  { %3027 = vst.msk [vmem:[%s8719_s1 + $0x1ca] sm:$0x40] %vm3_vm0, %v435_v28   ;;  %3028 = vst.msk [vmem:[%s8719_s1 + $0x1e9] sm:$0x80] %vm3_vm0, %v435_v28   ;;  %v811_v48 = vpop.permute.xlu1 %810   ;;  %v790_v49 = vpop.permute.xlu0 %789   ;;  %v2797_v11 = vsel %vm2670_vm2, %v5507_v62, %v5668_v10  ;;  %v2_v28 = vld [vmem:[%s8718_s0] sm:$0xff]  }
  0xb9   :  { %3012 = vst.msk [vmem:[%s8719_s1 + $0x10] sm:$0x1] %vm3_vm0, %v414_v29   ;;  %3013 = vst.msk [vmem:[%s8719_s1 + $0x2f] sm:$0x2] %vm3_vm0, %v414_v29  }
  0xba   :  { %3014 = vst.msk [vmem:[%s8719_s1 + $0x4e] sm:$0x4] %vm3_vm0, %v414_v29   ;;  %3015 = vst.msk [vmem:[%s8719_s1 + $0x6d] sm:$0x8] %vm3_vm0, %v414_v29   ;;  %2021 = vrot.lane.b32.xlu1 %v5337_v46, %s4096_s22  ;;  %2000 = vrot.lane.b32.xlu0 %v5342_v47, %s4096_s22 }
  0xbb   :  { %3016 = vst.msk [vmem:[%s8719_s1 + $0x8c] sm:$0x10] %vm3_vm0, %v414_v29   ;;  %3017 = vst.msk [vmem:[%s8719_s1 + $0xab] sm:$0x20] %vm3_vm0, %v414_v29  }
  0xbc   :  { %3018 = vst.msk [vmem:[%s8719_s1 + $0xca] sm:$0x40] %vm3_vm0, %v414_v29   ;;  %3019 = vst.msk [vmem:[%s8719_s1 + $0xe9] sm:$0x80] %vm3_vm0, %v414_v29   ;;  %v853_v53 = vpop.permute.xlu1 %852   ;;  %v832_v54 = vpop.permute.xlu0 %831   ;;  %v2841_v29 = vld [vmem:[%s8718_s0 + $0x18] sm:$0xff]  }
  0xbd   :  { %3039 = vst.msk [vmem:[%s8719_s1 + $0x310] sm:$0x1] %vm3_vm0, %v477_v30   ;;  %3040 = vst.msk [vmem:[%s8719_s1 + $0x32f] sm:$0x2] %vm3_vm0, %v477_v30  }
  0xbe   :  { %3041 = vst.msk [vmem:[%s8719_s1 + $0x34e] sm:$0x4] %vm3_vm0, %v477_v30   ;;  %3042 = vst.msk [vmem:[%s8719_s1 + $0x36d] sm:$0x8] %vm3_vm0, %v477_v30   ;;  %2505 = vrot.lane.b32.xlu1 %v2504_v51, %s4097_s10  ;;  %2042 = vrot.lane.b32.xlu0 %v5420_v52, %s4096_s22 }
  0xbf   :  { %3043 = vst.msk [vmem:[%s8719_s1 + $0x38c] sm:$0x10] %vm3_vm0, %v477_v30   ;;  %3044 = vst.msk [vmem:[%s8719_s1 + $0x3ab] sm:$0x20] %vm3_vm0, %v477_v30  }
  0xc0   :  { %3045 = vst.msk [vmem:[%s8719_s1 + $0x3ca] sm:$0x40] %vm3_vm0, %v477_v30   ;;  %3046 = vst.msk [vmem:[%s8719_s1 + $0x3e9] sm:$0x80] %vm3_vm0, %v477_v30   ;;  %v895_v59 = vpop.permute.xlu1 %894   ;;  %v874_v60 = vpop.permute.xlu0 %873   ;;  %v2850_v30 = vld [vmem:[%s8718_s0 + $0x30] sm:$0xff]  }
  0xc1   :  { %3030 = vst.msk [vmem:[%s8719_s1 + $0x210] sm:$0x1] %vm3_vm0, %v456_v31   ;;  %3031 = vst.msk [vmem:[%s8719_s1 + $0x22f] sm:$0x2] %vm3_vm0, %v456_v31  }
  0xc2   :  { %3032 = vst.msk [vmem:[%s8719_s1 + $0x24e] sm:$0x4] %vm3_vm0, %v456_v31   ;;  %3033 = vst.msk [vmem:[%s8719_s1 + $0x26d] sm:$0x8] %vm3_vm0, %v456_v31   ;;  %2589 = vrot.lane.b32.xlu1 %v2588_v57, %s4097_s10  ;;  %2547 = vrot.lane.b32.xlu0 %v2546_v58, %s4097_s10 }
  0xc3   :  { %3034 = vst.msk [vmem:[%s8719_s1 + $0x28c] sm:$0x10] %vm3_vm0, %v456_v31   ;;  %3035 = vst.msk [vmem:[%s8719_s1 + $0x2ab] sm:$0x20] %vm3_vm0, %v456_v31  }
  0xc4   :  { %3036 = vst.msk [vmem:[%s8719_s1 + $0x2ca] sm:$0x40] %vm3_vm0, %v456_v31   ;;  %3037 = vst.msk [vmem:[%s8719_s1 + $0x2e9] sm:$0x80] %vm3_vm0, %v456_v31   ;;  %v936_v2 = vpop.permute.xlu1 %935   ;;  %v915_v3 = vpop.permute.xlu0 %914   ;;  %v2859_v31 = vld [vmem:[%s8718_s0 + $0x48] sm:$0xff]   ;;  %s4102_s0 = smov 13  }
  0xc5   :  { %3056 = vst.msk [vmem:[%s8719_s1 + $0x102] sm:$0x1] %vm3_vm0, %v518_v32   ;;  %3057 = vst.msk [vmem:[%s8719_s1 + $0x121] sm:$0x2] %vm3_vm0, %v518_v32  }
  0xc6   :  { %3058 = vst.msk [vmem:[%s8719_s1 + $0x140] sm:$0x4] %vm3_vm0, %v518_v32   ;;  %3059 = vst.msk [vmem:[%s8719_s1 + $0x15f] sm:$0x8] %vm3_vm0, %v518_v32   ;;  %2672 = vrot.lane.b32.xlu1 %v2671_v0, %s4098_s3  ;;  %2631 = vrot.lane.b32.xlu0 %v2630_v1, %s4097_s10  ;;  %s4101_s10 = smov 20  }
  0xc7   :  { %3060 = vst.msk [vmem:[%s8719_s1 + $0x17e] sm:$0x10] %vm3_vm0, %v518_v32   ;;  %3061 = vst.msk [vmem:[%s8719_s1 + $0x19d] sm:$0x20] %vm3_vm0, %v518_v32  }
  0xc8   :  { %3062 = vst.msk [vmem:[%s8719_s1 + $0x1bc] sm:$0x40] %vm3_vm0, %v518_v32   ;;  %3063 = vst.msk [vmem:[%s8719_s1 + $0x1db] sm:$0x80] %vm3_vm0, %v518_v32   ;;  %v978_v8 = vpop.permute.xlu1 %977   ;;  %v957_v9 = vpop.permute.xlu0 %956  }
  0xc9   :  { %3047 = vst.msk [vmem:[%s8719_s1 + $0x2] sm:$0x1] %vm3_vm0, %v497_v33   ;;  %3048 = vst.msk [vmem:[%s8719_s1 + $0x21] sm:$0x2] %vm3_vm0, %v497_v33  }
  0xca   :  { %3049 = vst.msk [vmem:[%s8719_s1 + $0x40] sm:$0x4] %vm3_vm0, %v497_v33   ;;  %3050 = vst.msk [vmem:[%s8719_s1 + $0x5f] sm:$0x8] %vm3_vm0, %v497_v33   ;;  %2756 = vrot.lane.b32.xlu1 %v2755_v6, %s4098_s3  ;;  %2714 = vrot.lane.b32.xlu0 %v2713_v7, %s4098_s3 }
  0xcb   :  { %3051 = vst.msk [vmem:[%s8719_s1 + $0x7e] sm:$0x10] %vm3_vm0, %v497_v33   ;;  %3052 = vst.msk [vmem:[%s8719_s1 + $0x9d] sm:$0x20] %vm3_vm0, %v497_v33  }
  0xcc   :  { %3053 = vst.msk [vmem:[%s8719_s1 + $0xbc] sm:$0x40] %vm3_vm0, %v497_v33   ;;  %3054 = vst.msk [vmem:[%s8719_s1 + $0xdb] sm:$0x80] %vm3_vm0, %v497_v33   ;;  %v1020_v12 = vpop.permute.xlu1 %1019   ;;  %v999_v13 = vpop.permute.xlu0 %998  }
  0xcd   :  { %3074 = vst.msk [vmem:[%s8719_s1 + $0x302] sm:$0x1] %vm3_vm0, %v560_v34   ;;  %3075 = vst.msk [vmem:[%s8719_s1 + $0x321] sm:$0x2] %vm3_vm0, %v560_v34  }
  0xce   :  { %3076 = vst.msk [vmem:[%s8719_s1 + $0x340] sm:$0x4] %vm3_vm0, %v560_v34   ;;  %3077 = vst.msk [vmem:[%s8719_s1 + $0x35f] sm:$0x8] %vm3_vm0, %v560_v34   ;;  %2063 = vrot.lane.b32.xlu1 %v5507_v62, %s4096_s22  ;;  %2798 = vrot.lane.b32.xlu0 %v2797_v11, %s4098_s3 }
  0xcf   :  { %3078 = vst.msk [vmem:[%s8719_s1 + $0x37e] sm:$0x10] %vm3_vm0, %v560_v34   ;;  %3079 = vst.msk [vmem:[%s8719_s1 + $0x39d] sm:$0x20] %vm3_vm0, %v560_v34  }
  0xd0   :  { %3080 = vst.msk [vmem:[%s8719_s1 + $0x3bc] sm:$0x40] %vm3_vm0, %v560_v34   ;;  %3081 = vst.msk [vmem:[%s8719_s1 + $0x3db] sm:$0x80] %vm3_vm0, %v560_v34   ;;  %v1062_v14 = vpop.permute.xlu1 %1061   ;;  %v1041_v15 = vpop.permute.xlu0 %1040  }
  0xd1   :  { %3065 = vst.msk [vmem:[%s8719_s1 + $0x202] sm:$0x1] %vm3_vm0, %v539_v35   ;;  %3066 = vst.msk [vmem:[%s8719_s1 + $0x221] sm:$0x2] %vm3_vm0, %v539_v35  }
  0xd2   :  { %3067 = vst.msk [vmem:[%s8719_s1 + $0x240] sm:$0x4] %vm3_vm0, %v539_v35   ;;  %3068 = vst.msk [vmem:[%s8719_s1 + $0x25f] sm:$0x8] %vm3_vm0, %v539_v35   ;;  %2104 = vrot.lane.b32.xlu1 %v5591_v5, %s4099_s18  ;;  %2083 = vrot.lane.b32.xlu0 %v5502_v61, %s4099_s18 }
  0xd3   :  { %3069 = vst.msk [vmem:[%s8719_s1 + $0x27e] sm:$0x10] %vm3_vm0, %v539_v35   ;;  %3070 = vst.msk [vmem:[%s8719_s1 + $0x29d] sm:$0x20] %vm3_vm0, %v539_v35  }
  0xd4   :  { %3071 = vst.msk [vmem:[%s8719_s1 + $0x2bc] sm:$0x40] %vm3_vm0, %v539_v35   ;;  %3072 = vst.msk [vmem:[%s8719_s1 + $0x2db] sm:$0x80] %vm3_vm0, %v539_v35   ;;  %v1103_v16 = vpop.permute.xlu1 %1102   ;;  %v1082_v17 = vpop.permute.xlu0 %1081  }
  0xd5   :  { %3092 = vst.msk [vmem:[%s8719_s1 + $0x11f] sm:$0x1] %vm3_vm0, %v602_v36   ;;  %3093 = vst.msk [vmem:[%s8719_s1 + $0x13e] sm:$0x2] %vm3_vm0, %v602_v36  }
  0xd6   :  { %3094 = vst.msk [vmem:[%s8719_s1 + $0x15d] sm:$0x4] %vm3_vm0, %v602_v36   ;;  %3095 = vst.msk [vmem:[%s8719_s1 + $0x17c] sm:$0x8] %vm3_vm0, %v602_v36   ;;  %2146 = vrot.lane.b32.xlu1 %v5668_v10, %s4099_s18  ;;  %2125 = vrot.lane.b32.xlu0 %v5586_v4, %s4099_s18 }
  0xd7   :  { %3096 = vst.msk [vmem:[%s8719_s1 + $0x19b] sm:$0x10] %vm3_vm0, %v602_v36   ;;  %3097 = vst.msk [vmem:[%s8719_s1 + $0x1ba] sm:$0x20] %vm3_vm0, %v602_v36  }
  0xd8   :  { %3098 = vst.msk [vmem:[%s8719_s1 + $0x1d9] sm:$0x40] %vm3_vm0, %v602_v36   ;;  %3099 = vst.msk [vmem:[%s8719_s1 + $0x1f8] sm:$0x80] %vm3_vm0, %v602_v36   ;;  %v1145_v18 = vpop.permute.xlu1 %1144   ;;  %v1124_v19 = vpop.permute.xlu0 %1123  }
  0xd9   :  { %3083 = vst.msk [vmem:[%s8719_s1 + $0x1f] sm:$0x1] %vm3_vm0, %v581_v37   ;;  %3084 = vst.msk [vmem:[%s8719_s1 + $0x3e] sm:$0x2] %vm3_vm0, %v581_v37  }
  0xda   :  { %3085 = vst.msk [vmem:[%s8719_s1 + $0x5d] sm:$0x4] %vm3_vm0, %v581_v37   ;;  %3086 = vst.msk [vmem:[%s8719_s1 + $0x7c] sm:$0x8] %vm3_vm0, %v581_v37   ;;  %2188 = vrot.lane.b32.xlu1 %v5337_v46, %s4100_s24  ;;  %2167 = vrot.lane.b32.xlu0 %v5342_v47, %s4100_s24 }
  0xdb   :  { %3087 = vst.msk [vmem:[%s8719_s1 + $0x9b] sm:$0x10] %vm3_vm0, %v581_v37   ;;  %3088 = vst.msk [vmem:[%s8719_s1 + $0xba] sm:$0x20] %vm3_vm0, %v581_v37  }
  0xdc   :  { %3089 = vst.msk [vmem:[%s8719_s1 + $0xd9] sm:$0x40] %vm3_vm0, %v581_v37   ;;  %3090 = vst.msk [vmem:[%s8719_s1 + $0xf8] sm:$0x80] %vm3_vm0, %v581_v37   ;;  %v1187_v20 = vpop.permute.xlu1 %1186   ;;  %v1166_v21 = vpop.permute.xlu0 %1165  }
  0xdd   :  { %3110 = vst.msk [vmem:[%s8719_s1 + $0x31f] sm:$0x1] %vm3_vm0, %v644_v38   ;;  %3111 = vst.msk [vmem:[%s8719_s1 + $0x33e] sm:$0x2] %vm3_vm0, %v644_v38  }
  0xde   :  { %3112 = vst.msk [vmem:[%s8719_s1 + $0x35d] sm:$0x4] %vm3_vm0, %v644_v38   ;;  %3113 = vst.msk [vmem:[%s8719_s1 + $0x37c] sm:$0x8] %vm3_vm0, %v644_v38   ;;  %2230 = vrot.lane.b32.xlu1 %v5507_v62, %s4100_s24  ;;  %2209 = vrot.lane.b32.xlu0 %v5420_v52, %s4100_s24 }
  0xdf   :  { %3114 = vst.msk [vmem:[%s8719_s1 + $0x39b] sm:$0x10] %vm3_vm0, %v644_v38   ;;  %3115 = vst.msk [vmem:[%s8719_s1 + $0x3ba] sm:$0x20] %vm3_vm0, %v644_v38  }
  0xe0   :  { %3116 = vst.msk [vmem:[%s8719_s1 + $0x3d9] sm:$0x40] %vm3_vm0, %v644_v38   ;;  %3117 = vst.msk [vmem:[%s8719_s1 + $0x3f8] sm:$0x80] %vm3_vm0, %v644_v38   ;;  %v1229_v22 = vpop.permute.xlu1 %1228   ;;  %v1208_v23 = vpop.permute.xlu0 %1207  }
  0xe1   :  { %3101 = vst.msk [vmem:[%s8719_s1 + $0x21f] sm:$0x1] %vm3_vm0, %v623_v39   ;;  %3102 = vst.msk [vmem:[%s8719_s1 + $0x23e] sm:$0x2] %vm3_vm0, %v623_v39  }
  0xe2   :  { %3103 = vst.msk [vmem:[%s8719_s1 + $0x25d] sm:$0x4] %vm3_vm0, %v623_v39   ;;  %3104 = vst.msk [vmem:[%s8719_s1 + $0x27c] sm:$0x8] %vm3_vm0, %v623_v39   ;;  %2271 = vrot.lane.b32.xlu1 %v5591_v5, %s4101_s10  ;;  %2250 = vrot.lane.b32.xlu0 %v5502_v61, %s4101_s10 }
  0xe3   :  { %3105 = vst.msk [vmem:[%s8719_s1 + $0x29b] sm:$0x10] %vm3_vm0, %v623_v39   ;;  %3106 = vst.msk [vmem:[%s8719_s1 + $0x2ba] sm:$0x20] %vm3_vm0, %v623_v39  }
  0xe4   :  { %3107 = vst.msk [vmem:[%s8719_s1 + $0x2d9] sm:$0x40] %vm3_vm0, %v623_v39   ;;  %3108 = vst.msk [vmem:[%s8719_s1 + $0x2f8] sm:$0x80] %vm3_vm0, %v623_v39   ;;  %v1270_v24 = vpop.permute.xlu1 %1269   ;;  %v1249_v25 = vpop.permute.xlu0 %1248  }
  0xe5   :  { %3128 = vst.msk [vmem:[%s8719_s1 + $0x111] sm:$0x1] %vm3_vm0, %v686_v40   ;;  %3129 = vst.msk [vmem:[%s8719_s1 + $0x130] sm:$0x2] %vm3_vm0, %v686_v40  }
  0xe6   :  { %3130 = vst.msk [vmem:[%s8719_s1 + $0x14f] sm:$0x4] %vm3_vm0, %v686_v40   ;;  %3131 = vst.msk [vmem:[%s8719_s1 + $0x16e] sm:$0x8] %vm3_vm0, %v686_v40   ;;  %2313 = vrot.lane.b32.xlu1 %v5668_v10, %s4101_s10  ;;  %2292 = vrot.lane.b32.xlu0 %v5586_v4, %s4101_s10 }
  0xe7   :  { %3132 = vst.msk [vmem:[%s8719_s1 + $0x18d] sm:$0x10] %vm3_vm0, %v686_v40   ;;  %3133 = vst.msk [vmem:[%s8719_s1 + $0x1ac] sm:$0x20] %vm3_vm0, %v686_v40  }
  0xe8   :  { %3134 = vst.msk [vmem:[%s8719_s1 + $0x1cb] sm:$0x40] %vm3_vm0, %v686_v40   ;;  %3135 = vst.msk [vmem:[%s8719_s1 + $0x1ea] sm:$0x80] %vm3_vm0, %v686_v40   ;;  %v1312_v26 = vpop.permute.xlu1 %1311   ;;  %v1291_v27 = vpop.permute.xlu0 %1290  }
  0xe9   :  { %3119 = vst.msk [vmem:[%s8719_s1 + $0x11] sm:$0x1] %vm3_vm0, %v665_v41   ;;  %3120 = vst.msk [vmem:[%s8719_s1 + $0x30] sm:$0x2] %vm3_vm0, %v665_v41  }
  0xea   :  { %3121 = vst.msk [vmem:[%s8719_s1 + $0x4f] sm:$0x4] %vm3_vm0, %v665_v41   ;;  %3122 = vst.msk [vmem:[%s8719_s1 + $0x6e] sm:$0x8] %vm3_vm0, %v665_v41   ;;  %2355 = vrot.lane.b32.xlu1 %v5337_v46, %s4102_s0  ;;  %2334 = vrot.lane.b32.xlu0 %v5342_v47, %s4102_s0 }
  0xeb   :  { %3123 = vst.msk [vmem:[%s8719_s1 + $0x8d] sm:$0x10] %vm3_vm0, %v665_v41   ;;  %3124 = vst.msk [vmem:[%s8719_s1 + $0xac] sm:$0x20] %vm3_vm0, %v665_v41  }
  0xec   :  { %3125 = vst.msk [vmem:[%s8719_s1 + $0xcb] sm:$0x40] %vm3_vm0, %v665_v41   ;;  %3126 = vst.msk [vmem:[%s8719_s1 + $0xea] sm:$0x80] %vm3_vm0, %v665_v41   ;;  %v1354_v32 = vpop.permute.xlu1 %1353   ;;  %v1333_v33 = vpop.permute.xlu0 %1332  }
  0xed   :  { %3146 = vst.msk [vmem:[%s8719_s1 + $0x311] sm:$0x1] %vm3_vm0, %v728_v42   ;;  %3147 = vst.msk [vmem:[%s8719_s1 + $0x330] sm:$0x2] %vm3_vm0, %v728_v42  }
  0xee   :  { %3148 = vst.msk [vmem:[%s8719_s1 + $0x34f] sm:$0x4] %vm3_vm0, %v728_v42   ;;  %3149 = vst.msk [vmem:[%s8719_s1 + $0x36e] sm:$0x8] %vm3_vm0, %v728_v42   ;;  %2397 = vrot.lane.b32.xlu1 %v5507_v62, %s4102_s0  ;;  %2376 = vrot.lane.b32.xlu0 %v5420_v52, %s4102_s0 }
  0xef   :  { %3150 = vst.msk [vmem:[%s8719_s1 + $0x38d] sm:$0x10] %vm3_vm0, %v728_v42   ;;  %3151 = vst.msk [vmem:[%s8719_s1 + $0x3ac] sm:$0x20] %vm3_vm0, %v728_v42  }
  0xf0   :  { %3152 = vst.msk [vmem:[%s8719_s1 + $0x3cb] sm:$0x40] %vm3_vm0, %v728_v42   ;;  %3153 = vst.msk [vmem:[%s8719_s1 + $0x3ea] sm:$0x80] %vm3_vm0, %v728_v42   ;;  %v1396_v34 = vpop.permute.xlu1 %1395   ;;  %v1375_v35 = vpop.permute.xlu0 %1374  }
  0xf1   :  { %3137 = vst.msk [vmem:[%s8719_s1 + $0x211] sm:$0x1] %vm3_vm0, %v707_v43   ;;  %3138 = vst.msk [vmem:[%s8719_s1 + $0x230] sm:$0x2] %vm3_vm0, %v707_v43  }
  0xf2   :  { %3139 = vst.msk [vmem:[%s8719_s1 + $0x24f] sm:$0x4] %vm3_vm0, %v707_v43   ;;  %3140 = vst.msk [vmem:[%s8719_s1 + $0x26e] sm:$0x8] %vm3_vm0, %v707_v43   ;;  %2438 = vrot.lane.b32.xlu1 %v5591_v5, %s4103_s27  ;;  %2417 = vrot.lane.b32.xlu0 %v5502_v61, %s4103_s27 }
  0xf3   :  { %3141 = vst.msk [vmem:[%s8719_s1 + $0x28d] sm:$0x10] %vm3_vm0, %v707_v43   ;;  %3142 = vst.msk [vmem:[%s8719_s1 + $0x2ac] sm:$0x20] %vm3_vm0, %v707_v43  }
  0xf4   :  { %3143 = vst.msk [vmem:[%s8719_s1 + $0x2cb] sm:$0x40] %vm3_vm0, %v707_v43   ;;  %3144 = vst.msk [vmem:[%s8719_s1 + $0x2ea] sm:$0x80] %vm3_vm0, %v707_v43   ;;  %v1437_v36 = vpop.permute.xlu1 %1436   ;;  %v1416_v37 = vpop.permute.xlu0 %1415  }
  0xf5   :  { %3163 = vst.msk [vmem:[%s8719_s1 + $0x103] sm:$0x1] %vm3_vm0, %v769_v44   ;;  %3164 = vst.msk [vmem:[%s8719_s1 + $0x122] sm:$0x2] %vm3_vm0, %v769_v44  }
  0xf6   :  { %3165 = vst.msk [vmem:[%s8719_s1 + $0x141] sm:$0x4] %vm3_vm0, %v769_v44   ;;  %3166 = vst.msk [vmem:[%s8719_s1 + $0x160] sm:$0x8] %vm3_vm0, %v769_v44   ;;  %2480 = vrot.lane.b32.xlu1 %v5668_v10, %s4103_s27  ;;  %2459 = vrot.lane.b32.xlu0 %v5586_v4, %s4103_s27 }
  0xf7   :  { %3167 = vst.msk [vmem:[%s8719_s1 + $0x17f] sm:$0x10] %vm3_vm0, %v769_v44   ;;  %3168 = vst.msk [vmem:[%s8719_s1 + $0x19e] sm:$0x20] %vm3_vm0, %v769_v44  }
  0xf8   :  { %3169 = vst.msk [vmem:[%s8719_s1 + $0x1bd] sm:$0x40] %vm3_vm0, %v769_v44   ;;  %3170 = vst.msk [vmem:[%s8719_s1 + $0x1dc] sm:$0x80] %vm3_vm0, %v769_v44   ;;  %v1479_v38 = vpop.permute.xlu1 %1478   ;;  %v1458_v39 = vpop.permute.xlu0 %1457  }
  0xf9   :  { %3154 = vst.msk [vmem:[%s8719_s1 + $0x3] sm:$0x1] %vm3_vm0, %v748_v45   ;;  %3155 = vst.msk [vmem:[%s8719_s1 + $0x22] sm:$0x2] %vm3_vm0, %v748_v45  }
  0xfa   :  { %3156 = vst.msk [vmem:[%s8719_s1 + $0x41] sm:$0x4] %vm3_vm0, %v748_v45   ;;  %3157 = vst.msk [vmem:[%s8719_s1 + $0x60] sm:$0x8] %vm3_vm0, %v748_v45  }
  0xfb   :  { %3158 = vst.msk [vmem:[%s8719_s1 + $0x7f] sm:$0x10] %vm3_vm0, %v748_v45   ;;  %3159 = vst.msk [vmem:[%s8719_s1 + $0x9e] sm:$0x20] %vm3_vm0, %v748_v45  }
  0xfc   :  { %3160 = vst.msk [vmem:[%s8719_s1 + $0xbd] sm:$0x40] %vm3_vm0, %v748_v45   ;;  %3161 = vst.msk [vmem:[%s8719_s1 + $0xdc] sm:$0x80] %vm3_vm0, %v748_v45   ;;  %v1521_v40 = vpop.permute.xlu1 %1520   ;;  %v1500_v41 = vpop.permute.xlu0 %1499  }
  0xfd   :  { %3181 = vst.msk [vmem:[%s8719_s1 + $0x303] sm:$0x1] %vm3_vm0, %v811_v48   ;;  %3182 = vst.msk [vmem:[%s8719_s1 + $0x322] sm:$0x2] %vm3_vm0, %v811_v48  }
  0xfe   :  { %3183 = vst.msk [vmem:[%s8719_s1 + $0x341] sm:$0x4] %vm3_vm0, %v811_v48   ;;  %3184 = vst.msk [vmem:[%s8719_s1 + $0x360] sm:$0x8] %vm3_vm0, %v811_v48  }
  0xff   :  { %3185 = vst.msk [vmem:[%s8719_s1 + $0x37f] sm:$0x10] %vm3_vm0, %v811_v48   ;;  %3186 = vst.msk [vmem:[%s8719_s1 + $0x39e] sm:$0x20] %vm3_vm0, %v811_v48  }
 0x100   :  { %3187 = vst.msk [vmem:[%s8719_s1 + $0x3bd] sm:$0x40] %vm3_vm0, %v811_v48   ;;  %3188 = vst.msk [vmem:[%s8719_s1 + $0x3dc] sm:$0x80] %vm3_vm0, %v811_v48   ;;  %v1563_v42 = vpop.permute.xlu1 %1562   ;;  %v1542_v43 = vpop.permute.xlu0 %1541  }
 0x101   :  { %3172 = vst.msk [vmem:[%s8719_s1 + $0x203] sm:$0x1] %vm3_vm0, %v790_v49   ;;  %3173 = vst.msk [vmem:[%s8719_s1 + $0x222] sm:$0x2] %vm3_vm0, %v790_v49  }
 0x102   :  { %3174 = vst.msk [vmem:[%s8719_s1 + $0x241] sm:$0x4] %vm3_vm0, %v790_v49   ;;  %3175 = vst.msk [vmem:[%s8719_s1 + $0x260] sm:$0x8] %vm3_vm0, %v790_v49  }
 0x103   :  { %3176 = vst.msk [vmem:[%s8719_s1 + $0x27f] sm:$0x10] %vm3_vm0, %v790_v49   ;;  %3177 = vst.msk [vmem:[%s8719_s1 + $0x29e] sm:$0x20] %vm3_vm0, %v790_v49  }
 0x104   :  { %3178 = vst.msk [vmem:[%s8719_s1 + $0x2bd] sm:$0x40] %vm3_vm0, %v790_v49   ;;  %3179 = vst.msk [vmem:[%s8719_s1 + $0x2dc] sm:$0x80] %vm3_vm0, %v790_v49   ;;  %v1604_v44 = vpop.permute.xlu1 %1603   ;;  %v1583_v45 = vpop.permute.xlu0 %1582  }
 0x105   :  { %3199 = vst.msk [vmem:[%s8719_s1 + $0x112] sm:$0x1] %vm3_vm0, %v853_v53   ;;  %3200 = vst.msk [vmem:[%s8719_s1 + $0x131] sm:$0x2] %vm3_vm0, %v853_v53  }
 0x106   :  { %3201 = vst.msk [vmem:[%s8719_s1 + $0x150] sm:$0x4] %vm3_vm0, %v853_v53   ;;  %3202 = vst.msk [vmem:[%s8719_s1 + $0x16f] sm:$0x8] %vm3_vm0, %v853_v53  }
 0x107   :  { %3203 = vst.msk [vmem:[%s8719_s1 + $0x18e] sm:$0x10] %vm3_vm0, %v853_v53   ;;  %3204 = vst.msk [vmem:[%s8719_s1 + $0x1ad] sm:$0x20] %vm3_vm0, %v853_v53  }
 0x108   :  { %3205 = vst.msk [vmem:[%s8719_s1 + $0x1cc] sm:$0x40] %vm3_vm0, %v853_v53   ;;  %3206 = vst.msk [vmem:[%s8719_s1 + $0x1eb] sm:$0x80] %vm3_vm0, %v853_v53   ;;  %v1646_v46 = vpop.permute.xlu1 %1645   ;;  %v1625_v47 = vpop.permute.xlu0 %1624  }
 0x109   :  { %3190 = vst.msk [vmem:[%s8719_s1 + $0x12] sm:$0x1] %vm3_vm0, %v832_v54   ;;  %3191 = vst.msk [vmem:[%s8719_s1 + $0x31] sm:$0x2] %vm3_vm0, %v832_v54  }
 0x10a   :  { %3192 = vst.msk [vmem:[%s8719_s1 + $0x50] sm:$0x4] %vm3_vm0, %v832_v54   ;;  %3193 = vst.msk [vmem:[%s8719_s1 + $0x6f] sm:$0x8] %vm3_vm0, %v832_v54  }
 0x10b   :  { %3194 = vst.msk [vmem:[%s8719_s1 + $0x8e] sm:$0x10] %vm3_vm0, %v832_v54   ;;  %3195 = vst.msk [vmem:[%s8719_s1 + $0xad] sm:$0x20] %vm3_vm0, %v832_v54  }
 0x10c   :  { %3196 = vst.msk [vmem:[%s8719_s1 + $0xcc] sm:$0x40] %vm3_vm0, %v832_v54   ;;  %3197 = vst.msk [vmem:[%s8719_s1 + $0xeb] sm:$0x80] %vm3_vm0, %v832_v54   ;;  %v1688_v48 = vpop.permute.xlu1 %1687   ;;  %v1667_v49 = vpop.permute.xlu0 %1666  }
 0x10d   :  { %3217 = vst.msk [vmem:[%s8719_s1 + $0x312] sm:$0x1] %vm3_vm0, %v895_v59   ;;  %3218 = vst.msk [vmem:[%s8719_s1 + $0x331] sm:$0x2] %vm3_vm0, %v895_v59  }
 0x10e   :  { %3219 = vst.msk [vmem:[%s8719_s1 + $0x350] sm:$0x4] %vm3_vm0, %v895_v59   ;;  %3220 = vst.msk [vmem:[%s8719_s1 + $0x36f] sm:$0x8] %vm3_vm0, %v895_v59  }
 0x10f   :  { %3221 = vst.msk [vmem:[%s8719_s1 + $0x38e] sm:$0x10] %vm3_vm0, %v895_v59   ;;  %3222 = vst.msk [vmem:[%s8719_s1 + $0x3ad] sm:$0x20] %vm3_vm0, %v895_v59  }
 0x110   :  { %3223 = vst.msk [vmem:[%s8719_s1 + $0x3cc] sm:$0x40] %vm3_vm0, %v895_v59   ;;  %3224 = vst.msk [vmem:[%s8719_s1 + $0x3eb] sm:$0x80] %vm3_vm0, %v895_v59   ;;  %v1730_v50 = vpop.permute.xlu1 %1729   ;;  %v1709_v51 = vpop.permute.xlu0 %1708  }
 0x111   :  { %3208 = vst.msk [vmem:[%s8719_s1 + $0x212] sm:$0x1] %vm3_vm0, %v874_v60   ;;  %3209 = vst.msk [vmem:[%s8719_s1 + $0x231] sm:$0x2] %vm3_vm0, %v874_v60  }
 0x112   :  { %3210 = vst.msk [vmem:[%s8719_s1 + $0x250] sm:$0x4] %vm3_vm0, %v874_v60   ;;  %3211 = vst.msk [vmem:[%s8719_s1 + $0x26f] sm:$0x8] %vm3_vm0, %v874_v60  }
 0x113   :  { %3212 = vst.msk [vmem:[%s8719_s1 + $0x28e] sm:$0x10] %vm3_vm0, %v874_v60   ;;  %3213 = vst.msk [vmem:[%s8719_s1 + $0x2ad] sm:$0x20] %vm3_vm0, %v874_v60  }
 0x114   :  { %3214 = vst.msk [vmem:[%s8719_s1 + $0x2cc] sm:$0x40] %vm3_vm0, %v874_v60   ;;  %3215 = vst.msk [vmem:[%s8719_s1 + $0x2eb] sm:$0x80] %vm3_vm0, %v874_v60   ;;  %v1771_v52 = vpop.permute.xlu1 %1770   ;;  %v1750_v53 = vpop.permute.xlu0 %1749  }
 0x115   :  { %3234 = vst.msk [vmem:[%s8719_s1 + $0x104] sm:$0x1] %vm3_vm0, %v936_v2   ;;  %3235 = vst.msk [vmem:[%s8719_s1 + $0x123] sm:$0x2] %vm3_vm0, %v936_v2  }
 0x116   :  { %3236 = vst.msk [vmem:[%s8719_s1 + $0x142] sm:$0x4] %vm3_vm0, %v936_v2   ;;  %3237 = vst.msk [vmem:[%s8719_s1 + $0x161] sm:$0x8] %vm3_vm0, %v936_v2  }
 0x117   :  { %3238 = vst.msk [vmem:[%s8719_s1 + $0x180] sm:$0x10] %vm3_vm0, %v936_v2   ;;  %3239 = vst.msk [vmem:[%s8719_s1 + $0x19f] sm:$0x20] %vm3_vm0, %v936_v2  }
 0x118   :  { %3240 = vst.msk [vmem:[%s8719_s1 + $0x1be] sm:$0x40] %vm3_vm0, %v936_v2   ;;  %3241 = vst.msk [vmem:[%s8719_s1 + $0x1dd] sm:$0x80] %vm3_vm0, %v936_v2   ;;  %v1813_v54 = vpop.permute.xlu1 %1812   ;;  %v1792_v55 = vpop.permute.xlu0 %1791  }
 0x119   :  { %3225 = vst.msk [vmem:[%s8719_s1 + $0x4] sm:$0x1] %vm3_vm0, %v915_v3   ;;  %3226 = vst.msk [vmem:[%s8719_s1 + $0x23] sm:$0x2] %vm3_vm0, %v915_v3  }
 0x11a   :  { %3227 = vst.msk [vmem:[%s8719_s1 + $0x42] sm:$0x4] %vm3_vm0, %v915_v3   ;;  %3228 = vst.msk [vmem:[%s8719_s1 + $0x61] sm:$0x8] %vm3_vm0, %v915_v3  }
 0x11b   :  { %3229 = vst.msk [vmem:[%s8719_s1 + $0x80] sm:$0x10] %vm3_vm0, %v915_v3   ;;  %3230 = vst.msk [vmem:[%s8719_s1 + $0x9f] sm:$0x20] %vm3_vm0, %v915_v3  }
 0x11c   :  { %3231 = vst.msk [vmem:[%s8719_s1 + $0xbe] sm:$0x40] %vm3_vm0, %v915_v3   ;;  %3232 = vst.msk [vmem:[%s8719_s1 + $0xdd] sm:$0x80] %vm3_vm0, %v915_v3   ;;  %v1855_v56 = vpop.permute.xlu1 %1854   ;;  %v1834_v57 = vpop.permute.xlu0 %1833  }
 0x11d   :  { %3252 = vst.msk [vmem:[%s8719_s1 + $0x304] sm:$0x1] %vm3_vm0, %v978_v8   ;;  %3253 = vst.msk [vmem:[%s8719_s1 + $0x323] sm:$0x2] %vm3_vm0, %v978_v8  }
 0x11e   :  { %3254 = vst.msk [vmem:[%s8719_s1 + $0x342] sm:$0x4] %vm3_vm0, %v978_v8   ;;  %3255 = vst.msk [vmem:[%s8719_s1 + $0x361] sm:$0x8] %vm3_vm0, %v978_v8  }
 0x11f   :  { %3256 = vst.msk [vmem:[%s8719_s1 + $0x380] sm:$0x10] %vm3_vm0, %v978_v8   ;;  %3257 = vst.msk [vmem:[%s8719_s1 + $0x39f] sm:$0x20] %vm3_vm0, %v978_v8  }
 0x120   :  { %3258 = vst.msk [vmem:[%s8719_s1 + $0x3be] sm:$0x40] %vm3_vm0, %v978_v8   ;;  %3259 = vst.msk [vmem:[%s8719_s1 + $0x3dd] sm:$0x80] %vm3_vm0, %v978_v8   ;;  %v1897_v58 = vpop.permute.xlu1 %1896   ;;  %v1876_v59 = vpop.permute.xlu0 %1875  }
 0x121   :  { %3243 = vst.msk [vmem:[%s8719_s1 + $0x204] sm:$0x1] %vm3_vm0, %v957_v9   ;;  %3244 = vst.msk [vmem:[%s8719_s1 + $0x223] sm:$0x2] %vm3_vm0, %v957_v9  }
 0x122   :  { %3245 = vst.msk [vmem:[%s8719_s1 + $0x242] sm:$0x4] %vm3_vm0, %v957_v9   ;;  %3246 = vst.msk [vmem:[%s8719_s1 + $0x261] sm:$0x8] %vm3_vm0, %v957_v9  }
 0x123   :  { %3247 = vst.msk [vmem:[%s8719_s1 + $0x280] sm:$0x10] %vm3_vm0, %v957_v9   ;;  %3248 = vst.msk [vmem:[%s8719_s1 + $0x29f] sm:$0x20] %vm3_vm0, %v957_v9  }
 0x124   :  { %3249 = vst.msk [vmem:[%s8719_s1 + $0x2be] sm:$0x40] %vm3_vm0, %v957_v9   ;;  %3250 = vst.msk [vmem:[%s8719_s1 + $0x2dd] sm:$0x80] %vm3_vm0, %v957_v9   ;;  %v1938_v60 = vpop.permute.xlu1 %1937   ;;  %v1917_v61 = vpop.permute.xlu0 %1916  }
 0x125   :  { %3270 = vst.msk [vmem:[%s8719_s1 + $0x113] sm:$0x1] %vm3_vm0, %v1020_v12   ;;  %3271 = vst.msk [vmem:[%s8719_s1 + $0x132] sm:$0x2] %vm3_vm0, %v1020_v12  }
 0x126   :  { %3272 = vst.msk [vmem:[%s8719_s1 + $0x151] sm:$0x4] %vm3_vm0, %v1020_v12   ;;  %3273 = vst.msk [vmem:[%s8719_s1 + $0x170] sm:$0x8] %vm3_vm0, %v1020_v12  }
 0x127   :  { %3274 = vst.msk [vmem:[%s8719_s1 + $0x18f] sm:$0x10] %vm3_vm0, %v1020_v12   ;;  %3275 = vst.msk [vmem:[%s8719_s1 + $0x1ae] sm:$0x20] %vm3_vm0, %v1020_v12  }
 0x128   :  { %3276 = vst.msk [vmem:[%s8719_s1 + $0x1cd] sm:$0x40] %vm3_vm0, %v1020_v12   ;;  %3277 = vst.msk [vmem:[%s8719_s1 + $0x1ec] sm:$0x80] %vm3_vm0, %v1020_v12   ;;  %v1980_v62 = vpop.permute.xlu1 %1979   ;;  %v1959_v63 = vpop.permute.xlu0 %1958  }
 0x129   :  { %3261 = vst.msk [vmem:[%s8719_s1 + $0x13] sm:$0x1] %vm3_vm0, %v999_v13   ;;  %3262 = vst.msk [vmem:[%s8719_s1 + $0x32] sm:$0x2] %vm3_vm0, %v999_v13  }
 0x12a   :  { %3263 = vst.msk [vmem:[%s8719_s1 + $0x51] sm:$0x4] %vm3_vm0, %v999_v13   ;;  %3264 = vst.msk [vmem:[%s8719_s1 + $0x70] sm:$0x8] %vm3_vm0, %v999_v13  }
 0x12b   :  { %3265 = vst.msk [vmem:[%s8719_s1 + $0x8f] sm:$0x10] %vm3_vm0, %v999_v13   ;;  %3266 = vst.msk [vmem:[%s8719_s1 + $0xae] sm:$0x20] %vm3_vm0, %v999_v13  }
 0x12c   :  { %3267 = vst.msk [vmem:[%s8719_s1 + $0xcd] sm:$0x40] %vm3_vm0, %v999_v13   ;;  %3268 = vst.msk [vmem:[%s8719_s1 + $0xec] sm:$0x80] %vm3_vm0, %v999_v13   ;;  %v2022_v0 = vpop.permute.xlu1 %2021   ;;  %v2001_v1 = vpop.permute.xlu0 %2000  }
 0x12d   :  { %3288 = vst.msk [vmem:[%s8719_s1 + $0x313] sm:$0x1] %vm3_vm0, %v1062_v14   ;;  %3289 = vst.msk [vmem:[%s8719_s1 + $0x332] sm:$0x2] %vm3_vm0, %v1062_v14  }
 0x12e   :  { %3290 = vst.msk [vmem:[%s8719_s1 + $0x351] sm:$0x4] %vm3_vm0, %v1062_v14   ;;  %3291 = vst.msk [vmem:[%s8719_s1 + $0x370] sm:$0x8] %vm3_vm0, %v1062_v14  }
 0x12f   :  { %3292 = vst.msk [vmem:[%s8719_s1 + $0x38f] sm:$0x10] %vm3_vm0, %v1062_v14   ;;  %3293 = vst.msk [vmem:[%s8719_s1 + $0x3ae] sm:$0x20] %vm3_vm0, %v1062_v14  }
 0x130   :  { %3294 = vst.msk [vmem:[%s8719_s1 + $0x3cd] sm:$0x40] %vm3_vm0, %v1062_v14   ;;  %3295 = vst.msk [vmem:[%s8719_s1 + $0x3ec] sm:$0x80] %vm3_vm0, %v1062_v14   ;;  %v2506_v2 = vpop.permute.xlu1 %2505   ;;  %v2043_v3 = vpop.permute.xlu0 %2042  }
 0x131   :  { %3279 = vst.msk [vmem:[%s8719_s1 + $0x213] sm:$0x1] %vm3_vm0, %v1041_v15   ;;  %3280 = vst.msk [vmem:[%s8719_s1 + $0x232] sm:$0x2] %vm3_vm0, %v1041_v15  }
 0x132   :  { %3281 = vst.msk [vmem:[%s8719_s1 + $0x251] sm:$0x4] %vm3_vm0, %v1041_v15   ;;  %3282 = vst.msk [vmem:[%s8719_s1 + $0x270] sm:$0x8] %vm3_vm0, %v1041_v15  }
 0x133   :  { %3283 = vst.msk [vmem:[%s8719_s1 + $0x28f] sm:$0x10] %vm3_vm0, %v1041_v15   ;;  %3284 = vst.msk [vmem:[%s8719_s1 + $0x2ae] sm:$0x20] %vm3_vm0, %v1041_v15  }
 0x134   :  { %3285 = vst.msk [vmem:[%s8719_s1 + $0x2cd] sm:$0x40] %vm3_vm0, %v1041_v15   ;;  %3286 = vst.msk [vmem:[%s8719_s1 + $0x2ec] sm:$0x80] %vm3_vm0, %v1041_v15   ;;  %v2590_v4 = vpop.permute.xlu1 %2589   ;;  %v2548_v5 = vpop.permute.xlu0 %2547  }
 0x135   :  { %3305 = vst.msk [vmem:[%s8719_s1 + $0x105] sm:$0x1] %vm3_vm0, %v1103_v16   ;;  %3306 = vst.msk [vmem:[%s8719_s1 + $0x124] sm:$0x2] %vm3_vm0, %v1103_v16  }
 0x136   :  { %3307 = vst.msk [vmem:[%s8719_s1 + $0x143] sm:$0x4] %vm3_vm0, %v1103_v16   ;;  %3308 = vst.msk [vmem:[%s8719_s1 + $0x162] sm:$0x8] %vm3_vm0, %v1103_v16  }
 0x137   :  { %3309 = vst.msk [vmem:[%s8719_s1 + $0x181] sm:$0x10] %vm3_vm0, %v1103_v16   ;;  %3310 = vst.msk [vmem:[%s8719_s1 + $0x1a0] sm:$0x20] %vm3_vm0, %v1103_v16  }
 0x138   :  { %3311 = vst.msk [vmem:[%s8719_s1 + $0x1bf] sm:$0x40] %vm3_vm0, %v1103_v16   ;;  %3312 = vst.msk [vmem:[%s8719_s1 + $0x1de] sm:$0x80] %vm3_vm0, %v1103_v16   ;;  %v2673_v6 = vpop.permute.xlu1 %2672   ;;  %v2632_v7 = vpop.permute.xlu0 %2631  }
 0x139   :  { %3296 = vst.msk [vmem:[%s8719_s1 + $0x5] sm:$0x1] %vm3_vm0, %v1082_v17   ;;  %3297 = vst.msk [vmem:[%s8719_s1 + $0x24] sm:$0x2] %vm3_vm0, %v1082_v17  }
 0x13a   :  { %3298 = vst.msk [vmem:[%s8719_s1 + $0x43] sm:$0x4] %vm3_vm0, %v1082_v17   ;;  %3299 = vst.msk [vmem:[%s8719_s1 + $0x62] sm:$0x8] %vm3_vm0, %v1082_v17  }
 0x13b   :  { %3300 = vst.msk [vmem:[%s8719_s1 + $0x81] sm:$0x10] %vm3_vm0, %v1082_v17   ;;  %3301 = vst.msk [vmem:[%s8719_s1 + $0xa0] sm:$0x20] %vm3_vm0, %v1082_v17  }
 0x13c   :  { %3302 = vst.msk [vmem:[%s8719_s1 + $0xbf] sm:$0x40] %vm3_vm0, %v1082_v17   ;;  %3303 = vst.msk [vmem:[%s8719_s1 + $0xde] sm:$0x80] %vm3_vm0, %v1082_v17   ;;  %v2757_v8 = vpop.permute.xlu1 %2756   ;;  %v2715_v9 = vpop.permute.xlu0 %2714  }
 0x13d   :  { %3323 = vst.msk [vmem:[%s8719_s1 + $0x305] sm:$0x1] %vm3_vm0, %v1145_v18   ;;  %3324 = vst.msk [vmem:[%s8719_s1 + $0x324] sm:$0x2] %vm3_vm0, %v1145_v18  }
 0x13e   :  { %3325 = vst.msk [vmem:[%s8719_s1 + $0x343] sm:$0x4] %vm3_vm0, %v1145_v18   ;;  %3326 = vst.msk [vmem:[%s8719_s1 + $0x362] sm:$0x8] %vm3_vm0, %v1145_v18  }
 0x13f   :  { %3327 = vst.msk [vmem:[%s8719_s1 + $0x381] sm:$0x10] %vm3_vm0, %v1145_v18   ;;  %3328 = vst.msk [vmem:[%s8719_s1 + $0x3a0] sm:$0x20] %vm3_vm0, %v1145_v18  }
 0x140   :  { %3329 = vst.msk [vmem:[%s8719_s1 + $0x3bf] sm:$0x40] %vm3_vm0, %v1145_v18   ;;  %3330 = vst.msk [vmem:[%s8719_s1 + $0x3de] sm:$0x80] %vm3_vm0, %v1145_v18   ;;  %v2064_v10 = vpop.permute.xlu1 %2063   ;;  %v2799_v11 = vpop.permute.xlu0 %2798  }
 0x141   :  { %3314 = vst.msk [vmem:[%s8719_s1 + $0x205] sm:$0x1] %vm3_vm0, %v1124_v19   ;;  %3315 = vst.msk [vmem:[%s8719_s1 + $0x224] sm:$0x2] %vm3_vm0, %v1124_v19  }
 0x142   :  { %3316 = vst.msk [vmem:[%s8719_s1 + $0x243] sm:$0x4] %vm3_vm0, %v1124_v19   ;;  %3317 = vst.msk [vmem:[%s8719_s1 + $0x262] sm:$0x8] %vm3_vm0, %v1124_v19  }
 0x143   :  { %3318 = vst.msk [vmem:[%s8719_s1 + $0x281] sm:$0x10] %vm3_vm0, %v1124_v19   ;;  %3319 = vst.msk [vmem:[%s8719_s1 + $0x2a0] sm:$0x20] %vm3_vm0, %v1124_v19  }
 0x144   :  { %3320 = vst.msk [vmem:[%s8719_s1 + $0x2bf] sm:$0x40] %vm3_vm0, %v1124_v19   ;;  %3321 = vst.msk [vmem:[%s8719_s1 + $0x2de] sm:$0x80] %vm3_vm0, %v1124_v19   ;;  %v2105_v12 = vpop.permute.xlu1 %2104   ;;  %v2084_v13 = vpop.permute.xlu0 %2083  }
 0x145   :  { %3341 = vst.msk [vmem:[%s8719_s1 + $0x114] sm:$0x1] %vm3_vm0, %v1187_v20   ;;  %3342 = vst.msk [vmem:[%s8719_s1 + $0x133] sm:$0x2] %vm3_vm0, %v1187_v20  }
 0x146   :  { %3343 = vst.msk [vmem:[%s8719_s1 + $0x152] sm:$0x4] %vm3_vm0, %v1187_v20   ;;  %3344 = vst.msk [vmem:[%s8719_s1 + $0x171] sm:$0x8] %vm3_vm0, %v1187_v20  }
 0x147   :  { %3345 = vst.msk [vmem:[%s8719_s1 + $0x190] sm:$0x10] %vm3_vm0, %v1187_v20   ;;  %3346 = vst.msk [vmem:[%s8719_s1 + $0x1af] sm:$0x20] %vm3_vm0, %v1187_v20  }
 0x148   :  { %3347 = vst.msk [vmem:[%s8719_s1 + $0x1ce] sm:$0x40] %vm3_vm0, %v1187_v20   ;;  %3348 = vst.msk [vmem:[%s8719_s1 + $0x1ed] sm:$0x80] %vm3_vm0, %v1187_v20   ;;  %v2147_v14 = vpop.permute.xlu1 %2146   ;;  %v2126_v15 = vpop.permute.xlu0 %2125  }
 0x149   :  { %3332 = vst.msk [vmem:[%s8719_s1 + $0x14] sm:$0x1] %vm3_vm0, %v1166_v21   ;;  %3333 = vst.msk [vmem:[%s8719_s1 + $0x33] sm:$0x2] %vm3_vm0, %v1166_v21  }
 0x14a   :  { %3334 = vst.msk [vmem:[%s8719_s1 + $0x52] sm:$0x4] %vm3_vm0, %v1166_v21   ;;  %3335 = vst.msk [vmem:[%s8719_s1 + $0x71] sm:$0x8] %vm3_vm0, %v1166_v21  }
 0x14b   :  { %3336 = vst.msk [vmem:[%s8719_s1 + $0x90] sm:$0x10] %vm3_vm0, %v1166_v21   ;;  %3337 = vst.msk [vmem:[%s8719_s1 + $0xaf] sm:$0x20] %vm3_vm0, %v1166_v21  }
 0x14c   :  { %3338 = vst.msk [vmem:[%s8719_s1 + $0xce] sm:$0x40] %vm3_vm0, %v1166_v21   ;;  %3339 = vst.msk [vmem:[%s8719_s1 + $0xed] sm:$0x80] %vm3_vm0, %v1166_v21   ;;  %v2189_v16 = vpop.permute.xlu1 %2188   ;;  %v2168_v17 = vpop.permute.xlu0 %2167  }
 0x14d   :  { %3359 = vst.msk [vmem:[%s8719_s1 + $0x314] sm:$0x1] %vm3_vm0, %v1229_v22   ;;  %3360 = vst.msk [vmem:[%s8719_s1 + $0x333] sm:$0x2] %vm3_vm0, %v1229_v22  }
 0x14e   :  { %3361 = vst.msk [vmem:[%s8719_s1 + $0x352] sm:$0x4] %vm3_vm0, %v1229_v22   ;;  %3362 = vst.msk [vmem:[%s8719_s1 + $0x371] sm:$0x8] %vm3_vm0, %v1229_v22  }
 0x14f   :  { %3363 = vst.msk [vmem:[%s8719_s1 + $0x390] sm:$0x10] %vm3_vm0, %v1229_v22   ;;  %3364 = vst.msk [vmem:[%s8719_s1 + $0x3af] sm:$0x20] %vm3_vm0, %v1229_v22  }
 0x150   :  { %3365 = vst.msk [vmem:[%s8719_s1 + $0x3ce] sm:$0x40] %vm3_vm0, %v1229_v22   ;;  %3366 = vst.msk [vmem:[%s8719_s1 + $0x3ed] sm:$0x80] %vm3_vm0, %v1229_v22   ;;  %v2231_v18 = vpop.permute.xlu1 %2230   ;;  %v2210_v19 = vpop.permute.xlu0 %2209  }
 0x151   :  { %3350 = vst.msk [vmem:[%s8719_s1 + $0x214] sm:$0x1] %vm3_vm0, %v1208_v23   ;;  %3351 = vst.msk [vmem:[%s8719_s1 + $0x233] sm:$0x2] %vm3_vm0, %v1208_v23  }
 0x152   :  { %3352 = vst.msk [vmem:[%s8719_s1 + $0x252] sm:$0x4] %vm3_vm0, %v1208_v23   ;;  %3353 = vst.msk [vmem:[%s8719_s1 + $0x271] sm:$0x8] %vm3_vm0, %v1208_v23  }
 0x153   :  { %3354 = vst.msk [vmem:[%s8719_s1 + $0x290] sm:$0x10] %vm3_vm0, %v1208_v23   ;;  %3355 = vst.msk [vmem:[%s8719_s1 + $0x2af] sm:$0x20] %vm3_vm0, %v1208_v23  }
 0x154   :  { %3356 = vst.msk [vmem:[%s8719_s1 + $0x2ce] sm:$0x40] %vm3_vm0, %v1208_v23   ;;  %3357 = vst.msk [vmem:[%s8719_s1 + $0x2ed] sm:$0x80] %vm3_vm0, %v1208_v23   ;;  %v2272_v20 = vpop.permute.xlu1 %2271   ;;  %v2251_v21 = vpop.permute.xlu0 %2250  }
 0x155   :  { %3376 = vst.msk [vmem:[%s8719_s1 + $0x106] sm:$0x1] %vm3_vm0, %v1270_v24   ;;  %3377 = vst.msk [vmem:[%s8719_s1 + $0x125] sm:$0x2] %vm3_vm0, %v1270_v24  }
 0x156   :  { %3378 = vst.msk [vmem:[%s8719_s1 + $0x144] sm:$0x4] %vm3_vm0, %v1270_v24   ;;  %3379 = vst.msk [vmem:[%s8719_s1 + $0x163] sm:$0x8] %vm3_vm0, %v1270_v24  }
 0x157   :  { %3380 = vst.msk [vmem:[%s8719_s1 + $0x182] sm:$0x10] %vm3_vm0, %v1270_v24   ;;  %3381 = vst.msk [vmem:[%s8719_s1 + $0x1a1] sm:$0x20] %vm3_vm0, %v1270_v24  }
 0x158   :  { %3382 = vst.msk [vmem:[%s8719_s1 + $0x1c0] sm:$0x40] %vm3_vm0, %v1270_v24   ;;  %3383 = vst.msk [vmem:[%s8719_s1 + $0x1df] sm:$0x80] %vm3_vm0, %v1270_v24   ;;  %v2314_v22 = vpop.permute.xlu1 %2313   ;;  %v2293_v23 = vpop.permute.xlu0 %2292  }
 0x159   :  { %3367 = vst.msk [vmem:[%s8719_s1 + $0x6] sm:$0x1] %vm3_vm0, %v1249_v25   ;;  %3368 = vst.msk [vmem:[%s8719_s1 + $0x25] sm:$0x2] %vm3_vm0, %v1249_v25  }
 0x15a   :  { %3369 = vst.msk [vmem:[%s8719_s1 + $0x44] sm:$0x4] %vm3_vm0, %v1249_v25   ;;  %3370 = vst.msk [vmem:[%s8719_s1 + $0x63] sm:$0x8] %vm3_vm0, %v1249_v25  }
 0x15b   :  { %3371 = vst.msk [vmem:[%s8719_s1 + $0x82] sm:$0x10] %vm3_vm0, %v1249_v25   ;;  %3372 = vst.msk [vmem:[%s8719_s1 + $0xa1] sm:$0x20] %vm3_vm0, %v1249_v25  }
 0x15c   :  { %3373 = vst.msk [vmem:[%s8719_s1 + $0xc0] sm:$0x40] %vm3_vm0, %v1249_v25   ;;  %3374 = vst.msk [vmem:[%s8719_s1 + $0xdf] sm:$0x80] %vm3_vm0, %v1249_v25   ;;  %v2356_v24 = vpop.permute.xlu1 %2355   ;;  %v2335_v25 = vpop.permute.xlu0 %2334  }
 0x15d   :  { %3394 = vst.msk [vmem:[%s8719_s1 + $0x306] sm:$0x1] %vm3_vm0, %v1312_v26   ;;  %3395 = vst.msk [vmem:[%s8719_s1 + $0x325] sm:$0x2] %vm3_vm0, %v1312_v26  }
 0x15e   :  { %3396 = vst.msk [vmem:[%s8719_s1 + $0x344] sm:$0x4] %vm3_vm0, %v1312_v26   ;;  %3397 = vst.msk [vmem:[%s8719_s1 + $0x363] sm:$0x8] %vm3_vm0, %v1312_v26  }
 0x15f   :  { %3398 = vst.msk [vmem:[%s8719_s1 + $0x382] sm:$0x10] %vm3_vm0, %v1312_v26   ;;  %3399 = vst.msk [vmem:[%s8719_s1 + $0x3a1] sm:$0x20] %vm3_vm0, %v1312_v26  }
 0x160   :  { %3400 = vst.msk [vmem:[%s8719_s1 + $0x3c0] sm:$0x40] %vm3_vm0, %v1312_v26   ;;  %3401 = vst.msk [vmem:[%s8719_s1 + $0x3df] sm:$0x80] %vm3_vm0, %v1312_v26   ;;  %v2398_v26 = vpop.permute.xlu1 %2397  }
 0x161   :  { %3385 = vst.msk [vmem:[%s8719_s1 + $0x206] sm:$0x1] %vm3_vm0, %v1291_v27   ;;  %3386 = vst.msk [vmem:[%s8719_s1 + $0x225] sm:$0x2] %vm3_vm0, %v1291_v27  }
 0x162   :  { %3387 = vst.msk [vmem:[%s8719_s1 + $0x244] sm:$0x4] %vm3_vm0, %v1291_v27   ;;  %3388 = vst.msk [vmem:[%s8719_s1 + $0x263] sm:$0x8] %vm3_vm0, %v1291_v27  }
 0x163   :  { %3389 = vst.msk [vmem:[%s8719_s1 + $0x282] sm:$0x10] %vm3_vm0, %v1291_v27   ;;  %3390 = vst.msk [vmem:[%s8719_s1 + $0x2a1] sm:$0x20] %vm3_vm0, %v1291_v27  }
 0x164   :  { %3391 = vst.msk [vmem:[%s8719_s1 + $0x2c0] sm:$0x40] %vm3_vm0, %v1291_v27   ;;  %3392 = vst.msk [vmem:[%s8719_s1 + $0x2df] sm:$0x80] %vm3_vm0, %v1291_v27   ;;  %v2377_v27 = vpop.permute.xlu0 %2376  }
 0x165   :  { %4 = vst.msk [vmem:[%s8719_s1] sm:$0x1] %vm3_vm0, %v2_v28   ;;  %2834 = vst.msk [vmem:[%s8719_s1 + $0x1f] sm:$0x2] %vm3_vm0, %v2_v28  }
 0x166   :  { %2835 = vst.msk [vmem:[%s8719_s1 + $0x3e] sm:$0x4] %vm3_vm0, %v2_v28   ;;  %2836 = vst.msk [vmem:[%s8719_s1 + $0x5d] sm:$0x8] %vm3_vm0, %v2_v28  }
 0x167   :  { %2837 = vst.msk [vmem:[%s8719_s1 + $0x7c] sm:$0x10] %vm3_vm0, %v2_v28   ;;  %2838 = vst.msk [vmem:[%s8719_s1 + $0x9b] sm:$0x20] %vm3_vm0, %v2_v28  }
 0x168   :  { %2839 = vst.msk [vmem:[%s8719_s1 + $0xba] sm:$0x40] %vm3_vm0, %v2_v28   ;;  %2840 = vst.msk [vmem:[%s8719_s1 + $0xd9] sm:$0x80] %vm3_vm0, %v2_v28   ;;  %v2439_v28 = vpop.permute.xlu1 %2438  }
 0x169   :  { %2842 = vst.msk [vmem:[%s8719_s1 + $0x100] sm:$0x1] %vm3_vm0, %v2841_v29   ;;  %2843 = vst.msk [vmem:[%s8719_s1 + $0x11f] sm:$0x2] %vm3_vm0, %v2841_v29  }
 0x16a   :  { %2844 = vst.msk [vmem:[%s8719_s1 + $0x13e] sm:$0x4] %vm3_vm0, %v2841_v29   ;;  %2845 = vst.msk [vmem:[%s8719_s1 + $0x15d] sm:$0x8] %vm3_vm0, %v2841_v29  }
 0x16b   :  { %2846 = vst.msk [vmem:[%s8719_s1 + $0x17c] sm:$0x10] %vm3_vm0, %v2841_v29   ;;  %2847 = vst.msk [vmem:[%s8719_s1 + $0x19b] sm:$0x20] %vm3_vm0, %v2841_v29  }
 0x16c   :  { %2848 = vst.msk [vmem:[%s8719_s1 + $0x1ba] sm:$0x40] %vm3_vm0, %v2841_v29   ;;  %2849 = vst.msk [vmem:[%s8719_s1 + $0x1d9] sm:$0x80] %vm3_vm0, %v2841_v29   ;;  %v2418_v29 = vpop.permute.xlu0 %2417  }
 0x16d   :  { %2851 = vst.msk [vmem:[%s8719_s1 + $0x200] sm:$0x1] %vm3_vm0, %v2850_v30   ;;  %2852 = vst.msk [vmem:[%s8719_s1 + $0x21f] sm:$0x2] %vm3_vm0, %v2850_v30  }
 0x16e   :  { %2853 = vst.msk [vmem:[%s8719_s1 + $0x23e] sm:$0x4] %vm3_vm0, %v2850_v30   ;;  %2854 = vst.msk [vmem:[%s8719_s1 + $0x25d] sm:$0x8] %vm3_vm0, %v2850_v30  }
 0x16f   :  { %2855 = vst.msk [vmem:[%s8719_s1 + $0x27c] sm:$0x10] %vm3_vm0, %v2850_v30   ;;  %2856 = vst.msk [vmem:[%s8719_s1 + $0x29b] sm:$0x20] %vm3_vm0, %v2850_v30  }
 0x170   :  { %2857 = vst.msk [vmem:[%s8719_s1 + $0x2ba] sm:$0x40] %vm3_vm0, %v2850_v30   ;;  %2858 = vst.msk [vmem:[%s8719_s1 + $0x2d9] sm:$0x80] %vm3_vm0, %v2850_v30   ;;  %v2481_v30 = vpop.permute.xlu1 %2480  }
 0x171   :  { %2860 = vst.msk [vmem:[%s8719_s1 + $0x300] sm:$0x1] %vm3_vm0, %v2859_v31   ;;  %2861 = vst.msk [vmem:[%s8719_s1 + $0x31f] sm:$0x2] %vm3_vm0, %v2859_v31  }
 0x172   :  { %2862 = vst.msk [vmem:[%s8719_s1 + $0x33e] sm:$0x4] %vm3_vm0, %v2859_v31   ;;  %2863 = vst.msk [vmem:[%s8719_s1 + $0x35d] sm:$0x8] %vm3_vm0, %v2859_v31  }
 0x173   :  { %2864 = vst.msk [vmem:[%s8719_s1 + $0x37c] sm:$0x10] %vm3_vm0, %v2859_v31   ;;  %2865 = vst.msk [vmem:[%s8719_s1 + $0x39b] sm:$0x20] %vm3_vm0, %v2859_v31  }
 0x174   :  { %2866 = vst.msk [vmem:[%s8719_s1 + $0x3ba] sm:$0x40] %vm3_vm0, %v2859_v31   ;;  %2867 = vst.msk [vmem:[%s8719_s1 + $0x3d9] sm:$0x80] %vm3_vm0, %v2859_v31   ;;  %v2460_v31 = vpop.permute.xlu0 %2459  }
 0x175   :  { %3412 = vst.msk [vmem:[%s8719_s1 + $0x115] sm:$0x1] %vm3_vm0, %v1354_v32   ;;  %3413 = vst.msk [vmem:[%s8719_s1 + $0x134] sm:$0x2] %vm3_vm0, %v1354_v32  }
 0x176   :  { %3414 = vst.msk [vmem:[%s8719_s1 + $0x153] sm:$0x4] %vm3_vm0, %v1354_v32   ;;  %3415 = vst.msk [vmem:[%s8719_s1 + $0x172] sm:$0x8] %vm3_vm0, %v1354_v32  }
 0x177   :  { %3416 = vst.msk [vmem:[%s8719_s1 + $0x191] sm:$0x10] %vm3_vm0, %v1354_v32   ;;  %3417 = vst.msk [vmem:[%s8719_s1 + $0x1b0] sm:$0x20] %vm3_vm0, %v1354_v32  }
 0x178   :  { %3418 = vst.msk [vmem:[%s8719_s1 + $0x1cf] sm:$0x40] %vm3_vm0, %v1354_v32   ;;  %3419 = vst.msk [vmem:[%s8719_s1 + $0x1ee] sm:$0x80] %vm3_vm0, %v1354_v32  }
 0x179   :  { %3403 = vst.msk [vmem:[%s8719_s1 + $0x15] sm:$0x1] %vm3_vm0, %v1333_v33   ;;  %3404 = vst.msk [vmem:[%s8719_s1 + $0x34] sm:$0x2] %vm3_vm0, %v1333_v33  }
 0x17a   :  { %3405 = vst.msk [vmem:[%s8719_s1 + $0x53] sm:$0x4] %vm3_vm0, %v1333_v33   ;;  %3406 = vst.msk [vmem:[%s8719_s1 + $0x72] sm:$0x8] %vm3_vm0, %v1333_v33  }
 0x17b   :  { %3407 = vst.msk [vmem:[%s8719_s1 + $0x91] sm:$0x10] %vm3_vm0, %v1333_v33   ;;  %3408 = vst.msk [vmem:[%s8719_s1 + $0xb0] sm:$0x20] %vm3_vm0, %v1333_v33  }
 0x17c   :  { %3409 = vst.msk [vmem:[%s8719_s1 + $0xcf] sm:$0x40] %vm3_vm0, %v1333_v33   ;;  %3410 = vst.msk [vmem:[%s8719_s1 + $0xee] sm:$0x80] %vm3_vm0, %v1333_v33  }
 0x17d   :  { %3430 = vst.msk [vmem:[%s8719_s1 + $0x315] sm:$0x1] %vm3_vm0, %v1396_v34   ;;  %3431 = vst.msk [vmem:[%s8719_s1 + $0x334] sm:$0x2] %vm3_vm0, %v1396_v34  }
 0x17e   :  { %3432 = vst.msk [vmem:[%s8719_s1 + $0x353] sm:$0x4] %vm3_vm0, %v1396_v34   ;;  %3433 = vst.msk [vmem:[%s8719_s1 + $0x372] sm:$0x8] %vm3_vm0, %v1396_v34  }
 0x17f   :  { %3434 = vst.msk [vmem:[%s8719_s1 + $0x391] sm:$0x10] %vm3_vm0, %v1396_v34   ;;  %3435 = vst.msk [vmem:[%s8719_s1 + $0x3b0] sm:$0x20] %vm3_vm0, %v1396_v34  }
 0x180   :  { %3436 = vst.msk [vmem:[%s8719_s1 + $0x3cf] sm:$0x40] %vm3_vm0, %v1396_v34   ;;  %3437 = vst.msk [vmem:[%s8719_s1 + $0x3ee] sm:$0x80] %vm3_vm0, %v1396_v34  }
 0x181   :  { %3421 = vst.msk [vmem:[%s8719_s1 + $0x215] sm:$0x1] %vm3_vm0, %v1375_v35   ;;  %3422 = vst.msk [vmem:[%s8719_s1 + $0x234] sm:$0x2] %vm3_vm0, %v1375_v35  }
 0x182   :  { %3423 = vst.msk [vmem:[%s8719_s1 + $0x253] sm:$0x4] %vm3_vm0, %v1375_v35   ;;  %3424 = vst.msk [vmem:[%s8719_s1 + $0x272] sm:$0x8] %vm3_vm0, %v1375_v35  }
 0x183   :  { %3425 = vst.msk [vmem:[%s8719_s1 + $0x291] sm:$0x10] %vm3_vm0, %v1375_v35   ;;  %3426 = vst.msk [vmem:[%s8719_s1 + $0x2b0] sm:$0x20] %vm3_vm0, %v1375_v35  }
 0x184   :  { %3427 = vst.msk [vmem:[%s8719_s1 + $0x2cf] sm:$0x40] %vm3_vm0, %v1375_v35   ;;  %3428 = vst.msk [vmem:[%s8719_s1 + $0x2ee] sm:$0x80] %vm3_vm0, %v1375_v35  }
 0x185   :  { %3447 = vst.msk [vmem:[%s8719_s1 + $0x107] sm:$0x1] %vm3_vm0, %v1437_v36   ;;  %3448 = vst.msk [vmem:[%s8719_s1 + $0x126] sm:$0x2] %vm3_vm0, %v1437_v36  }
 0x186   :  { %3449 = vst.msk [vmem:[%s8719_s1 + $0x145] sm:$0x4] %vm3_vm0, %v1437_v36   ;;  %3450 = vst.msk [vmem:[%s8719_s1 + $0x164] sm:$0x8] %vm3_vm0, %v1437_v36  }
 0x187   :  { %3451 = vst.msk [vmem:[%s8719_s1 + $0x183] sm:$0x10] %vm3_vm0, %v1437_v36   ;;  %3452 = vst.msk [vmem:[%s8719_s1 + $0x1a2] sm:$0x20] %vm3_vm0, %v1437_v36  }
 0x188   :  { %3453 = vst.msk [vmem:[%s8719_s1 + $0x1c1] sm:$0x40] %vm3_vm0, %v1437_v36   ;;  %3454 = vst.msk [vmem:[%s8719_s1 + $0x1e0] sm:$0x80] %vm3_vm0, %v1437_v36  }
 0x189   :  { %3438 = vst.msk [vmem:[%s8719_s1 + $0x7] sm:$0x1] %vm3_vm0, %v1416_v37   ;;  %3439 = vst.msk [vmem:[%s8719_s1 + $0x26] sm:$0x2] %vm3_vm0, %v1416_v37  }
 0x18a   :  { %3440 = vst.msk [vmem:[%s8719_s1 + $0x45] sm:$0x4] %vm3_vm0, %v1416_v37   ;;  %3441 = vst.msk [vmem:[%s8719_s1 + $0x64] sm:$0x8] %vm3_vm0, %v1416_v37  }
 0x18b   :  { %3442 = vst.msk [vmem:[%s8719_s1 + $0x83] sm:$0x10] %vm3_vm0, %v1416_v37   ;;  %3443 = vst.msk [vmem:[%s8719_s1 + $0xa2] sm:$0x20] %vm3_vm0, %v1416_v37  }
 0x18c   :  { %3444 = vst.msk [vmem:[%s8719_s1 + $0xc1] sm:$0x40] %vm3_vm0, %v1416_v37   ;;  %3445 = vst.msk [vmem:[%s8719_s1 + $0xe0] sm:$0x80] %vm3_vm0, %v1416_v37  }
 0x18d   :  { %3465 = vst.msk [vmem:[%s8719_s1 + $0x307] sm:$0x1] %vm3_vm0, %v1479_v38   ;;  %3466 = vst.msk [vmem:[%s8719_s1 + $0x326] sm:$0x2] %vm3_vm0, %v1479_v38  }
 0x18e   :  { %3467 = vst.msk [vmem:[%s8719_s1 + $0x345] sm:$0x4] %vm3_vm0, %v1479_v38   ;;  %3468 = vst.msk [vmem:[%s8719_s1 + $0x364] sm:$0x8] %vm3_vm0, %v1479_v38  }
 0x18f   :  { %3469 = vst.msk [vmem:[%s8719_s1 + $0x383] sm:$0x10] %vm3_vm0, %v1479_v38   ;;  %3470 = vst.msk [vmem:[%s8719_s1 + $0x3a2] sm:$0x20] %vm3_vm0, %v1479_v38  }
 0x190   :  { %3471 = vst.msk [vmem:[%s8719_s1 + $0x3c1] sm:$0x40] %vm3_vm0, %v1479_v38   ;;  %3472 = vst.msk [vmem:[%s8719_s1 + $0x3e0] sm:$0x80] %vm3_vm0, %v1479_v38  }
 0x191   :  { %3456 = vst.msk [vmem:[%s8719_s1 + $0x207] sm:$0x1] %vm3_vm0, %v1458_v39   ;;  %3457 = vst.msk [vmem:[%s8719_s1 + $0x226] sm:$0x2] %vm3_vm0, %v1458_v39  }
 0x192   :  { %3458 = vst.msk [vmem:[%s8719_s1 + $0x245] sm:$0x4] %vm3_vm0, %v1458_v39   ;;  %3459 = vst.msk [vmem:[%s8719_s1 + $0x264] sm:$0x8] %vm3_vm0, %v1458_v39  }
 0x193   :  { %3460 = vst.msk [vmem:[%s8719_s1 + $0x283] sm:$0x10] %vm3_vm0, %v1458_v39   ;;  %3461 = vst.msk [vmem:[%s8719_s1 + $0x2a2] sm:$0x20] %vm3_vm0, %v1458_v39  }
 0x194   :  { %3462 = vst.msk [vmem:[%s8719_s1 + $0x2c1] sm:$0x40] %vm3_vm0, %v1458_v39   ;;  %3463 = vst.msk [vmem:[%s8719_s1 + $0x2e0] sm:$0x80] %vm3_vm0, %v1458_v39  }
 0x195   :  { %3483 = vst.msk [vmem:[%s8719_s1 + $0x116] sm:$0x1] %vm3_vm0, %v1521_v40   ;;  %3484 = vst.msk [vmem:[%s8719_s1 + $0x135] sm:$0x2] %vm3_vm0, %v1521_v40  }
 0x196   :  { %3485 = vst.msk [vmem:[%s8719_s1 + $0x154] sm:$0x4] %vm3_vm0, %v1521_v40   ;;  %3486 = vst.msk [vmem:[%s8719_s1 + $0x173] sm:$0x8] %vm3_vm0, %v1521_v40  }
 0x197   :  { %3487 = vst.msk [vmem:[%s8719_s1 + $0x192] sm:$0x10] %vm3_vm0, %v1521_v40   ;;  %3488 = vst.msk [vmem:[%s8719_s1 + $0x1b1] sm:$0x20] %vm3_vm0, %v1521_v40  }
 0x198   :  { %3489 = vst.msk [vmem:[%s8719_s1 + $0x1d0] sm:$0x40] %vm3_vm0, %v1521_v40   ;;  %3490 = vst.msk [vmem:[%s8719_s1 + $0x1ef] sm:$0x80] %vm3_vm0, %v1521_v40  }
 0x199   :  { %3474 = vst.msk [vmem:[%s8719_s1 + $0x16] sm:$0x1] %vm3_vm0, %v1500_v41   ;;  %3475 = vst.msk [vmem:[%s8719_s1 + $0x35] sm:$0x2] %vm3_vm0, %v1500_v41  }
 0x19a   :  { %3476 = vst.msk [vmem:[%s8719_s1 + $0x54] sm:$0x4] %vm3_vm0, %v1500_v41   ;;  %3477 = vst.msk [vmem:[%s8719_s1 + $0x73] sm:$0x8] %vm3_vm0, %v1500_v41  }
 0x19b   :  { %3478 = vst.msk [vmem:[%s8719_s1 + $0x92] sm:$0x10] %vm3_vm0, %v1500_v41   ;;  %3479 = vst.msk [vmem:[%s8719_s1 + $0xb1] sm:$0x20] %vm3_vm0, %v1500_v41  }
 0x19c   :  { %3480 = vst.msk [vmem:[%s8719_s1 + $0xd0] sm:$0x40] %vm3_vm0, %v1500_v41   ;;  %3481 = vst.msk [vmem:[%s8719_s1 + $0xef] sm:$0x80] %vm3_vm0, %v1500_v41  }
 0x19d   :  { %3501 = vst.msk [vmem:[%s8719_s1 + $0x316] sm:$0x1] %vm3_vm0, %v1563_v42   ;;  %3502 = vst.msk [vmem:[%s8719_s1 + $0x335] sm:$0x2] %vm3_vm0, %v1563_v42  }
 0x19e   :  { %3503 = vst.msk [vmem:[%s8719_s1 + $0x354] sm:$0x4] %vm3_vm0, %v1563_v42   ;;  %3504 = vst.msk [vmem:[%s8719_s1 + $0x373] sm:$0x8] %vm3_vm0, %v1563_v42  }
 0x19f   :  { %3505 = vst.msk [vmem:[%s8719_s1 + $0x392] sm:$0x10] %vm3_vm0, %v1563_v42   ;;  %3506 = vst.msk [vmem:[%s8719_s1 + $0x3b1] sm:$0x20] %vm3_vm0, %v1563_v42  }
 0x1a0   :  { %3507 = vst.msk [vmem:[%s8719_s1 + $0x3d0] sm:$0x40] %vm3_vm0, %v1563_v42   ;;  %3508 = vst.msk [vmem:[%s8719_s1 + $0x3ef] sm:$0x80] %vm3_vm0, %v1563_v42  }
 0x1a1   :  { %3492 = vst.msk [vmem:[%s8719_s1 + $0x216] sm:$0x1] %vm3_vm0, %v1542_v43   ;;  %3493 = vst.msk [vmem:[%s8719_s1 + $0x235] sm:$0x2] %vm3_vm0, %v1542_v43  }
 0x1a2   :  { %3494 = vst.msk [vmem:[%s8719_s1 + $0x254] sm:$0x4] %vm3_vm0, %v1542_v43   ;;  %3495 = vst.msk [vmem:[%s8719_s1 + $0x273] sm:$0x8] %vm3_vm0, %v1542_v43  }
 0x1a3   :  { %3496 = vst.msk [vmem:[%s8719_s1 + $0x292] sm:$0x10] %vm3_vm0, %v1542_v43   ;;  %3497 = vst.msk [vmem:[%s8719_s1 + $0x2b1] sm:$0x20] %vm3_vm0, %v1542_v43  }
 0x1a4   :  { %3498 = vst.msk [vmem:[%s8719_s1 + $0x2d0] sm:$0x40] %vm3_vm0, %v1542_v43   ;;  %3499 = vst.msk [vmem:[%s8719_s1 + $0x2ef] sm:$0x80] %vm3_vm0, %v1542_v43  }
 0x1a5   :  { %3518 = vst.msk [vmem:[%s8719_s1 + $0x108] sm:$0x1] %vm3_vm0, %v1604_v44   ;;  %3519 = vst.msk [vmem:[%s8719_s1 + $0x127] sm:$0x2] %vm3_vm0, %v1604_v44  }
 0x1a6   :  { %3520 = vst.msk [vmem:[%s8719_s1 + $0x146] sm:$0x4] %vm3_vm0, %v1604_v44   ;;  %3521 = vst.msk [vmem:[%s8719_s1 + $0x165] sm:$0x8] %vm3_vm0, %v1604_v44  }
 0x1a7   :  { %3522 = vst.msk [vmem:[%s8719_s1 + $0x184] sm:$0x10] %vm3_vm0, %v1604_v44   ;;  %3523 = vst.msk [vmem:[%s8719_s1 + $0x1a3] sm:$0x20] %vm3_vm0, %v1604_v44  }
 0x1a8   :  { %3524 = vst.msk [vmem:[%s8719_s1 + $0x1c2] sm:$0x40] %vm3_vm0, %v1604_v44   ;;  %3525 = vst.msk [vmem:[%s8719_s1 + $0x1e1] sm:$0x80] %vm3_vm0, %v1604_v44  }
 0x1a9   :  { %3509 = vst.msk [vmem:[%s8719_s1 + $0x8] sm:$0x1] %vm3_vm0, %v1583_v45   ;;  %3510 = vst.msk [vmem:[%s8719_s1 + $0x27] sm:$0x2] %vm3_vm0, %v1583_v45  }
 0x1aa   :  { %3511 = vst.msk [vmem:[%s8719_s1 + $0x46] sm:$0x4] %vm3_vm0, %v1583_v45   ;;  %3512 = vst.msk [vmem:[%s8719_s1 + $0x65] sm:$0x8] %vm3_vm0, %v1583_v45  }
 0x1ab   :  { %3513 = vst.msk [vmem:[%s8719_s1 + $0x84] sm:$0x10] %vm3_vm0, %v1583_v45   ;;  %3514 = vst.msk [vmem:[%s8719_s1 + $0xa3] sm:$0x20] %vm3_vm0, %v1583_v45  }
 0x1ac   :  { %3515 = vst.msk [vmem:[%s8719_s1 + $0xc2] sm:$0x40] %vm3_vm0, %v1583_v45   ;;  %3516 = vst.msk [vmem:[%s8719_s1 + $0xe1] sm:$0x80] %vm3_vm0, %v1583_v45  }
 0x1ad   :  { %3536 = vst.msk [vmem:[%s8719_s1 + $0x308] sm:$0x1] %vm3_vm0, %v1646_v46   ;;  %3537 = vst.msk [vmem:[%s8719_s1 + $0x327] sm:$0x2] %vm3_vm0, %v1646_v46  }
 0x1ae   :  { %3538 = vst.msk [vmem:[%s8719_s1 + $0x346] sm:$0x4] %vm3_vm0, %v1646_v46   ;;  %3539 = vst.msk [vmem:[%s8719_s1 + $0x365] sm:$0x8] %vm3_vm0, %v1646_v46  }
 0x1af   :  { %3540 = vst.msk [vmem:[%s8719_s1 + $0x384] sm:$0x10] %vm3_vm0, %v1646_v46   ;;  %3541 = vst.msk [vmem:[%s8719_s1 + $0x3a3] sm:$0x20] %vm3_vm0, %v1646_v46  }
 0x1b0   :  { %3542 = vst.msk [vmem:[%s8719_s1 + $0x3c2] sm:$0x40] %vm3_vm0, %v1646_v46   ;;  %3543 = vst.msk [vmem:[%s8719_s1 + $0x3e1] sm:$0x80] %vm3_vm0, %v1646_v46  }
 0x1b1   :  { %3527 = vst.msk [vmem:[%s8719_s1 + $0x208] sm:$0x1] %vm3_vm0, %v1625_v47   ;;  %3528 = vst.msk [vmem:[%s8719_s1 + $0x227] sm:$0x2] %vm3_vm0, %v1625_v47  }
 0x1b2   :  { %3529 = vst.msk [vmem:[%s8719_s1 + $0x246] sm:$0x4] %vm3_vm0, %v1625_v47   ;;  %3530 = vst.msk [vmem:[%s8719_s1 + $0x265] sm:$0x8] %vm3_vm0, %v1625_v47  }
 0x1b3   :  { %3531 = vst.msk [vmem:[%s8719_s1 + $0x284] sm:$0x10] %vm3_vm0, %v1625_v47   ;;  %3532 = vst.msk [vmem:[%s8719_s1 + $0x2a3] sm:$0x20] %vm3_vm0, %v1625_v47  }
 0x1b4   :  { %3533 = vst.msk [vmem:[%s8719_s1 + $0x2c2] sm:$0x40] %vm3_vm0, %v1625_v47   ;;  %3534 = vst.msk [vmem:[%s8719_s1 + $0x2e1] sm:$0x80] %vm3_vm0, %v1625_v47  }
 0x1b5   :  { %3554 = vst.msk [vmem:[%s8719_s1 + $0x117] sm:$0x1] %vm3_vm0, %v1688_v48   ;;  %3555 = vst.msk [vmem:[%s8719_s1 + $0x136] sm:$0x2] %vm3_vm0, %v1688_v48  }
 0x1b6   :  { %3556 = vst.msk [vmem:[%s8719_s1 + $0x155] sm:$0x4] %vm3_vm0, %v1688_v48   ;;  %3557 = vst.msk [vmem:[%s8719_s1 + $0x174] sm:$0x8] %vm3_vm0, %v1688_v48  }
 0x1b7   :  { %3558 = vst.msk [vmem:[%s8719_s1 + $0x193] sm:$0x10] %vm3_vm0, %v1688_v48   ;;  %3559 = vst.msk [vmem:[%s8719_s1 + $0x1b2] sm:$0x20] %vm3_vm0, %v1688_v48  }
 0x1b8   :  { %3560 = vst.msk [vmem:[%s8719_s1 + $0x1d1] sm:$0x40] %vm3_vm0, %v1688_v48   ;;  %3561 = vst.msk [vmem:[%s8719_s1 + $0x1f0] sm:$0x80] %vm3_vm0, %v1688_v48  }
 0x1b9   :  { %3545 = vst.msk [vmem:[%s8719_s1 + $0x17] sm:$0x1] %vm3_vm0, %v1667_v49   ;;  %3546 = vst.msk [vmem:[%s8719_s1 + $0x36] sm:$0x2] %vm3_vm0, %v1667_v49  }
 0x1ba   :  { %3547 = vst.msk [vmem:[%s8719_s1 + $0x55] sm:$0x4] %vm3_vm0, %v1667_v49   ;;  %3548 = vst.msk [vmem:[%s8719_s1 + $0x74] sm:$0x8] %vm3_vm0, %v1667_v49  }
 0x1bb   :  { %3549 = vst.msk [vmem:[%s8719_s1 + $0x93] sm:$0x10] %vm3_vm0, %v1667_v49   ;;  %3550 = vst.msk [vmem:[%s8719_s1 + $0xb2] sm:$0x20] %vm3_vm0, %v1667_v49  }
 0x1bc   :  { %3551 = vst.msk [vmem:[%s8719_s1 + $0xd1] sm:$0x40] %vm3_vm0, %v1667_v49   ;;  %3552 = vst.msk [vmem:[%s8719_s1 + $0xf0] sm:$0x80] %vm3_vm0, %v1667_v49  }
 0x1bd   :  { %3572 = vst.msk [vmem:[%s8719_s1 + $0x317] sm:$0x1] %vm3_vm0, %v1730_v50   ;;  %3573 = vst.msk [vmem:[%s8719_s1 + $0x336] sm:$0x2] %vm3_vm0, %v1730_v50  }
 0x1be   :  { %3574 = vst.msk [vmem:[%s8719_s1 + $0x355] sm:$0x4] %vm3_vm0, %v1730_v50   ;;  %3575 = vst.msk [vmem:[%s8719_s1 + $0x374] sm:$0x8] %vm3_vm0, %v1730_v50  }
 0x1bf   :  { %3576 = vst.msk [vmem:[%s8719_s1 + $0x393] sm:$0x10] %vm3_vm0, %v1730_v50   ;;  %3577 = vst.msk [vmem:[%s8719_s1 + $0x3b2] sm:$0x20] %vm3_vm0, %v1730_v50  }
 0x1c0   :  { %3578 = vst.msk [vmem:[%s8719_s1 + $0x3d1] sm:$0x40] %vm3_vm0, %v1730_v50   ;;  %3579 = vst.msk [vmem:[%s8719_s1 + $0x3f0] sm:$0x80] %vm3_vm0, %v1730_v50  }
 0x1c1   :  { %3563 = vst.msk [vmem:[%s8719_s1 + $0x217] sm:$0x1] %vm3_vm0, %v1709_v51   ;;  %3564 = vst.msk [vmem:[%s8719_s1 + $0x236] sm:$0x2] %vm3_vm0, %v1709_v51  }
 0x1c2   :  { %3565 = vst.msk [vmem:[%s8719_s1 + $0x255] sm:$0x4] %vm3_vm0, %v1709_v51   ;;  %3566 = vst.msk [vmem:[%s8719_s1 + $0x274] sm:$0x8] %vm3_vm0, %v1709_v51  }
 0x1c3   :  { %3567 = vst.msk [vmem:[%s8719_s1 + $0x293] sm:$0x10] %vm3_vm0, %v1709_v51   ;;  %3568 = vst.msk [vmem:[%s8719_s1 + $0x2b2] sm:$0x20] %vm3_vm0, %v1709_v51  }
 0x1c4   :  { %3569 = vst.msk [vmem:[%s8719_s1 + $0x2d1] sm:$0x40] %vm3_vm0, %v1709_v51   ;;  %3570 = vst.msk [vmem:[%s8719_s1 + $0x2f0] sm:$0x80] %vm3_vm0, %v1709_v51  }
 0x1c5   :  { %3589 = vst.msk [vmem:[%s8719_s1 + $0x109] sm:$0x1] %vm3_vm0, %v1771_v52   ;;  %3590 = vst.msk [vmem:[%s8719_s1 + $0x128] sm:$0x2] %vm3_vm0, %v1771_v52  }
 0x1c6   :  { %3591 = vst.msk [vmem:[%s8719_s1 + $0x147] sm:$0x4] %vm3_vm0, %v1771_v52   ;;  %3592 = vst.msk [vmem:[%s8719_s1 + $0x166] sm:$0x8] %vm3_vm0, %v1771_v52  }
 0x1c7   :  { %3593 = vst.msk [vmem:[%s8719_s1 + $0x185] sm:$0x10] %vm3_vm0, %v1771_v52   ;;  %3594 = vst.msk [vmem:[%s8719_s1 + $0x1a4] sm:$0x20] %vm3_vm0, %v1771_v52  }
 0x1c8   :  { %3595 = vst.msk [vmem:[%s8719_s1 + $0x1c3] sm:$0x40] %vm3_vm0, %v1771_v52   ;;  %3596 = vst.msk [vmem:[%s8719_s1 + $0x1e2] sm:$0x80] %vm3_vm0, %v1771_v52  }
 0x1c9   :  { %3580 = vst.msk [vmem:[%s8719_s1 + $0x9] sm:$0x1] %vm3_vm0, %v1750_v53   ;;  %3581 = vst.msk [vmem:[%s8719_s1 + $0x28] sm:$0x2] %vm3_vm0, %v1750_v53  }
 0x1ca   :  { %3582 = vst.msk [vmem:[%s8719_s1 + $0x47] sm:$0x4] %vm3_vm0, %v1750_v53   ;;  %3583 = vst.msk [vmem:[%s8719_s1 + $0x66] sm:$0x8] %vm3_vm0, %v1750_v53  }
 0x1cb   :  { %3584 = vst.msk [vmem:[%s8719_s1 + $0x85] sm:$0x10] %vm3_vm0, %v1750_v53   ;;  %3585 = vst.msk [vmem:[%s8719_s1 + $0xa4] sm:$0x20] %vm3_vm0, %v1750_v53  }
 0x1cc   :  { %3586 = vst.msk [vmem:[%s8719_s1 + $0xc3] sm:$0x40] %vm3_vm0, %v1750_v53   ;;  %3587 = vst.msk [vmem:[%s8719_s1 + $0xe2] sm:$0x80] %vm3_vm0, %v1750_v53  }
 0x1cd   :  { %3607 = vst.msk [vmem:[%s8719_s1 + $0x309] sm:$0x1] %vm3_vm0, %v1813_v54   ;;  %3608 = vst.msk [vmem:[%s8719_s1 + $0x328] sm:$0x2] %vm3_vm0, %v1813_v54  }
 0x1ce   :  { %3609 = vst.msk [vmem:[%s8719_s1 + $0x347] sm:$0x4] %vm3_vm0, %v1813_v54   ;;  %3610 = vst.msk [vmem:[%s8719_s1 + $0x366] sm:$0x8] %vm3_vm0, %v1813_v54  }
 0x1cf   :  { %3611 = vst.msk [vmem:[%s8719_s1 + $0x385] sm:$0x10] %vm3_vm0, %v1813_v54   ;;  %3612 = vst.msk [vmem:[%s8719_s1 + $0x3a4] sm:$0x20] %vm3_vm0, %v1813_v54  }
 0x1d0   :  { %3613 = vst.msk [vmem:[%s8719_s1 + $0x3c3] sm:$0x40] %vm3_vm0, %v1813_v54   ;;  %3614 = vst.msk [vmem:[%s8719_s1 + $0x3e2] sm:$0x80] %vm3_vm0, %v1813_v54  }
 0x1d1   :  { %3598 = vst.msk [vmem:[%s8719_s1 + $0x209] sm:$0x1] %vm3_vm0, %v1792_v55   ;;  %3599 = vst.msk [vmem:[%s8719_s1 + $0x228] sm:$0x2] %vm3_vm0, %v1792_v55  }
 0x1d2   :  { %3600 = vst.msk [vmem:[%s8719_s1 + $0x247] sm:$0x4] %vm3_vm0, %v1792_v55   ;;  %3601 = vst.msk [vmem:[%s8719_s1 + $0x266] sm:$0x8] %vm3_vm0, %v1792_v55  }
 0x1d3   :  { %3602 = vst.msk [vmem:[%s8719_s1 + $0x285] sm:$0x10] %vm3_vm0, %v1792_v55   ;;  %3603 = vst.msk [vmem:[%s8719_s1 + $0x2a4] sm:$0x20] %vm3_vm0, %v1792_v55  }
 0x1d4   :  { %3604 = vst.msk [vmem:[%s8719_s1 + $0x2c3] sm:$0x40] %vm3_vm0, %v1792_v55   ;;  %3605 = vst.msk [vmem:[%s8719_s1 + $0x2e2] sm:$0x80] %vm3_vm0, %v1792_v55  }
 0x1d5   :  { %3625 = vst.msk [vmem:[%s8719_s1 + $0x118] sm:$0x1] %vm3_vm0, %v1855_v56   ;;  %3626 = vst.msk [vmem:[%s8719_s1 + $0x137] sm:$0x2] %vm3_vm0, %v1855_v56  }
 0x1d6   :  { %3627 = vst.msk [vmem:[%s8719_s1 + $0x156] sm:$0x4] %vm3_vm0, %v1855_v56   ;;  %3628 = vst.msk [vmem:[%s8719_s1 + $0x175] sm:$0x8] %vm3_vm0, %v1855_v56  }
 0x1d7   :  { %3629 = vst.msk [vmem:[%s8719_s1 + $0x194] sm:$0x10] %vm3_vm0, %v1855_v56   ;;  %3630 = vst.msk [vmem:[%s8719_s1 + $0x1b3] sm:$0x20] %vm3_vm0, %v1855_v56  }
 0x1d8   :  { %3631 = vst.msk [vmem:[%s8719_s1 + $0x1d2] sm:$0x40] %vm3_vm0, %v1855_v56   ;;  %3632 = vst.msk [vmem:[%s8719_s1 + $0x1f1] sm:$0x80] %vm3_vm0, %v1855_v56  }
 0x1d9   :  { %3616 = vst.msk [vmem:[%s8719_s1 + $0x18] sm:$0x1] %vm3_vm0, %v1834_v57   ;;  %3617 = vst.msk [vmem:[%s8719_s1 + $0x37] sm:$0x2] %vm3_vm0, %v1834_v57  }
 0x1da   :  { %3618 = vst.msk [vmem:[%s8719_s1 + $0x56] sm:$0x4] %vm3_vm0, %v1834_v57   ;;  %3619 = vst.msk [vmem:[%s8719_s1 + $0x75] sm:$0x8] %vm3_vm0, %v1834_v57  }
 0x1db   :  { %3620 = vst.msk [vmem:[%s8719_s1 + $0x94] sm:$0x10] %vm3_vm0, %v1834_v57   ;;  %3621 = vst.msk [vmem:[%s8719_s1 + $0xb3] sm:$0x20] %vm3_vm0, %v1834_v57  }
 0x1dc   :  { %3622 = vst.msk [vmem:[%s8719_s1 + $0xd2] sm:$0x40] %vm3_vm0, %v1834_v57   ;;  %3623 = vst.msk [vmem:[%s8719_s1 + $0xf1] sm:$0x80] %vm3_vm0, %v1834_v57  }
 0x1dd   :  { %3643 = vst.msk [vmem:[%s8719_s1 + $0x318] sm:$0x1] %vm3_vm0, %v1897_v58   ;;  %3644 = vst.msk [vmem:[%s8719_s1 + $0x337] sm:$0x2] %vm3_vm0, %v1897_v58  }
 0x1de   :  { %3645 = vst.msk [vmem:[%s8719_s1 + $0x356] sm:$0x4] %vm3_vm0, %v1897_v58   ;;  %3646 = vst.msk [vmem:[%s8719_s1 + $0x375] sm:$0x8] %vm3_vm0, %v1897_v58  }
 0x1df   :  { %3647 = vst.msk [vmem:[%s8719_s1 + $0x394] sm:$0x10] %vm3_vm0, %v1897_v58   ;;  %3648 = vst.msk [vmem:[%s8719_s1 + $0x3b3] sm:$0x20] %vm3_vm0, %v1897_v58  }
 0x1e0   :  { %3649 = vst.msk [vmem:[%s8719_s1 + $0x3d2] sm:$0x40] %vm3_vm0, %v1897_v58   ;;  %3650 = vst.msk [vmem:[%s8719_s1 + $0x3f1] sm:$0x80] %vm3_vm0, %v1897_v58  }
 0x1e1   :  { %3634 = vst.msk [vmem:[%s8719_s1 + $0x218] sm:$0x1] %vm3_vm0, %v1876_v59   ;;  %3635 = vst.msk [vmem:[%s8719_s1 + $0x237] sm:$0x2] %vm3_vm0, %v1876_v59  }
 0x1e2   :  { %3636 = vst.msk [vmem:[%s8719_s1 + $0x256] sm:$0x4] %vm3_vm0, %v1876_v59   ;;  %3637 = vst.msk [vmem:[%s8719_s1 + $0x275] sm:$0x8] %vm3_vm0, %v1876_v59  }
 0x1e3   :  { %3638 = vst.msk [vmem:[%s8719_s1 + $0x294] sm:$0x10] %vm3_vm0, %v1876_v59   ;;  %3639 = vst.msk [vmem:[%s8719_s1 + $0x2b3] sm:$0x20] %vm3_vm0, %v1876_v59  }
 0x1e4   :  { %3640 = vst.msk [vmem:[%s8719_s1 + $0x2d2] sm:$0x40] %vm3_vm0, %v1876_v59   ;;  %3641 = vst.msk [vmem:[%s8719_s1 + $0x2f1] sm:$0x80] %vm3_vm0, %v1876_v59  }
 0x1e5   :  { %3660 = vst.msk [vmem:[%s8719_s1 + $0x10a] sm:$0x1] %vm3_vm0, %v1938_v60   ;;  %3661 = vst.msk [vmem:[%s8719_s1 + $0x129] sm:$0x2] %vm3_vm0, %v1938_v60  }
 0x1e6   :  { %3662 = vst.msk [vmem:[%s8719_s1 + $0x148] sm:$0x4] %vm3_vm0, %v1938_v60   ;;  %3663 = vst.msk [vmem:[%s8719_s1 + $0x167] sm:$0x8] %vm3_vm0, %v1938_v60  }
 0x1e7   :  { %3664 = vst.msk [vmem:[%s8719_s1 + $0x186] sm:$0x10] %vm3_vm0, %v1938_v60   ;;  %3665 = vst.msk [vmem:[%s8719_s1 + $0x1a5] sm:$0x20] %vm3_vm0, %v1938_v60  }
 0x1e8   :  { %3666 = vst.msk [vmem:[%s8719_s1 + $0x1c4] sm:$0x40] %vm3_vm0, %v1938_v60   ;;  %3667 = vst.msk [vmem:[%s8719_s1 + $0x1e3] sm:$0x80] %vm3_vm0, %v1938_v60  }
 0x1e9   :  { %3651 = vst.msk [vmem:[%s8719_s1 + $0xa] sm:$0x1] %vm3_vm0, %v1917_v61   ;;  %3652 = vst.msk [vmem:[%s8719_s1 + $0x29] sm:$0x2] %vm3_vm0, %v1917_v61  }
 0x1ea   :  { %3653 = vst.msk [vmem:[%s8719_s1 + $0x48] sm:$0x4] %vm3_vm0, %v1917_v61   ;;  %3654 = vst.msk [vmem:[%s8719_s1 + $0x67] sm:$0x8] %vm3_vm0, %v1917_v61  }
 0x1eb   :  { %3655 = vst.msk [vmem:[%s8719_s1 + $0x86] sm:$0x10] %vm3_vm0, %v1917_v61   ;;  %3656 = vst.msk [vmem:[%s8719_s1 + $0xa5] sm:$0x20] %vm3_vm0, %v1917_v61  }
 0x1ec   :  { %3657 = vst.msk [vmem:[%s8719_s1 + $0xc4] sm:$0x40] %vm3_vm0, %v1917_v61   ;;  %3658 = vst.msk [vmem:[%s8719_s1 + $0xe3] sm:$0x80] %vm3_vm0, %v1917_v61  }
 0x1ed   :  { %3678 = vst.msk [vmem:[%s8719_s1 + $0x30a] sm:$0x1] %vm3_vm0, %v1980_v62   ;;  %3679 = vst.msk [vmem:[%s8719_s1 + $0x329] sm:$0x2] %vm3_vm0, %v1980_v62  }
 0x1ee   :  { %3680 = vst.msk [vmem:[%s8719_s1 + $0x348] sm:$0x4] %vm3_vm0, %v1980_v62   ;;  %3681 = vst.msk [vmem:[%s8719_s1 + $0x367] sm:$0x8] %vm3_vm0, %v1980_v62  }
 0x1ef   :  { %3682 = vst.msk [vmem:[%s8719_s1 + $0x386] sm:$0x10] %vm3_vm0, %v1980_v62   ;;  %3683 = vst.msk [vmem:[%s8719_s1 + $0x3a5] sm:$0x20] %vm3_vm0, %v1980_v62  }
 0x1f0   :  { %3684 = vst.msk [vmem:[%s8719_s1 + $0x3c4] sm:$0x40] %vm3_vm0, %v1980_v62   ;;  %3685 = vst.msk [vmem:[%s8719_s1 + $0x3e3] sm:$0x80] %vm3_vm0, %v1980_v62  }
 0x1f1   :  { %3669 = vst.msk [vmem:[%s8719_s1 + $0x20a] sm:$0x1] %vm3_vm0, %v1959_v63   ;;  %3670 = vst.msk [vmem:[%s8719_s1 + $0x229] sm:$0x2] %vm3_vm0, %v1959_v63  }
 0x1f2   :  { %3671 = vst.msk [vmem:[%s8719_s1 + $0x248] sm:$0x4] %vm3_vm0, %v1959_v63   ;;  %3672 = vst.msk [vmem:[%s8719_s1 + $0x267] sm:$0x8] %vm3_vm0, %v1959_v63  }
 0x1f3   :  { %3673 = vst.msk [vmem:[%s8719_s1 + $0x286] sm:$0x10] %vm3_vm0, %v1959_v63   ;;  %3674 = vst.msk [vmem:[%s8719_s1 + $0x2a5] sm:$0x20] %vm3_vm0, %v1959_v63  }
 0x1f4   :  { %3675 = vst.msk [vmem:[%s8719_s1 + $0x2c4] sm:$0x40] %vm3_vm0, %v1959_v63   ;;  %3676 = vst.msk [vmem:[%s8719_s1 + $0x2e3] sm:$0x80] %vm3_vm0, %v1959_v63  }
 0x1f5   :  { %3696 = vst.msk [vmem:[%s8719_s1 + $0x119] sm:$0x1] %vm3_vm0, %v2022_v0   ;;  %3697 = vst.msk [vmem:[%s8719_s1 + $0x138] sm:$0x2] %vm3_vm0, %v2022_v0  }
 0x1f6   :  { %3698 = vst.msk [vmem:[%s8719_s1 + $0x157] sm:$0x4] %vm3_vm0, %v2022_v0   ;;  %3699 = vst.msk [vmem:[%s8719_s1 + $0x176] sm:$0x8] %vm3_vm0, %v2022_v0  }
 0x1f7   :  { %3700 = vst.msk [vmem:[%s8719_s1 + $0x195] sm:$0x10] %vm3_vm0, %v2022_v0   ;;  %3701 = vst.msk [vmem:[%s8719_s1 + $0x1b4] sm:$0x20] %vm3_vm0, %v2022_v0  }
 0x1f8   :  { %3702 = vst.msk [vmem:[%s8719_s1 + $0x1d3] sm:$0x40] %vm3_vm0, %v2022_v0   ;;  %3703 = vst.msk [vmem:[%s8719_s1 + $0x1f2] sm:$0x80] %vm3_vm0, %v2022_v0  }
 0x1f9   :  { %3687 = vst.msk [vmem:[%s8719_s1 + $0x19] sm:$0x1] %vm3_vm0, %v2001_v1   ;;  %3688 = vst.msk [vmem:[%s8719_s1 + $0x38] sm:$0x2] %vm3_vm0, %v2001_v1  }
 0x1fa   :  { %3689 = vst.msk [vmem:[%s8719_s1 + $0x57] sm:$0x4] %vm3_vm0, %v2001_v1   ;;  %3690 = vst.msk [vmem:[%s8719_s1 + $0x76] sm:$0x8] %vm3_vm0, %v2001_v1  }
 0x1fb   :  { %3691 = vst.msk [vmem:[%s8719_s1 + $0x95] sm:$0x10] %vm3_vm0, %v2001_v1   ;;  %3692 = vst.msk [vmem:[%s8719_s1 + $0xb4] sm:$0x20] %vm3_vm0, %v2001_v1  }
 0x1fc   :  { %3693 = vst.msk [vmem:[%s8719_s1 + $0xd3] sm:$0x40] %vm3_vm0, %v2001_v1   ;;  %3694 = vst.msk [vmem:[%s8719_s1 + $0xf2] sm:$0x80] %vm3_vm0, %v2001_v1  }
 0x1fd   :  { %3901 = vst.msk [vmem:[%s8719_s1 + $0x1c] sm:$0x1] %vm2507_vm3, %v2506_v2   ;;  %3902 = vst.msk [vmem:[%s8719_s1 + $0x3b] sm:$0x2] %vm2507_vm3, %v2506_v2  }
 0x1fe   :  { %3903 = vst.msk [vmem:[%s8719_s1 + $0x5a] sm:$0x4] %vm2507_vm3, %v2506_v2   ;;  %3904 = vst.msk [vmem:[%s8719_s1 + $0x79] sm:$0x8] %vm2507_vm3, %v2506_v2  }
 0x1ff   :  { %3905 = vst.msk [vmem:[%s8719_s1 + $0x98] sm:$0x10] %vm2507_vm3, %v2506_v2   ;;  %3906 = vst.msk [vmem:[%s8719_s1 + $0xb7] sm:$0x20] %vm2507_vm3, %v2506_v2  }
 0x200   :  { %3907 = vst.msk [vmem:[%s8719_s1 + $0xd6] sm:$0x40] %vm2507_vm3, %v2506_v2   ;;  %3908 = vst.msk [vmem:[%s8719_s1 + $0xf5] sm:$0x80] %vm2507_vm3, %v2506_v2  }
 0x201   :  { %3705 = vst.msk [vmem:[%s8719_s1 + $0x219] sm:$0x1] %vm3_vm0, %v2043_v3   ;;  %3706 = vst.msk [vmem:[%s8719_s1 + $0x238] sm:$0x2] %vm3_vm0, %v2043_v3  }
 0x202   :  { %3707 = vst.msk [vmem:[%s8719_s1 + $0x257] sm:$0x4] %vm3_vm0, %v2043_v3   ;;  %3708 = vst.msk [vmem:[%s8719_s1 + $0x276] sm:$0x8] %vm3_vm0, %v2043_v3  }
 0x203   :  { %3709 = vst.msk [vmem:[%s8719_s1 + $0x295] sm:$0x10] %vm3_vm0, %v2043_v3   ;;  %3710 = vst.msk [vmem:[%s8719_s1 + $0x2b4] sm:$0x20] %vm3_vm0, %v2043_v3  }
 0x204   :  { %3711 = vst.msk [vmem:[%s8719_s1 + $0x2d3] sm:$0x40] %vm3_vm0, %v2043_v3   ;;  %3712 = vst.msk [vmem:[%s8719_s1 + $0x2f2] sm:$0x80] %vm3_vm0, %v2043_v3  }
 0x205   :  { %3909 = vst.msk [vmem:[%s8719_s1 + $0x1c] sm:$0x1] %vm2524_vm4, %v2506_v2   ;;  %3910 = vst.msk [vmem:[%s8719_s1 + $0x3b] sm:$0x2] %vm2524_vm4, %v2506_v2  }
 0x206   :  { %3911 = vst.msk [vmem:[%s8719_s1 + $0x5a] sm:$0x4] %vm2524_vm4, %v2506_v2   ;;  %3912 = vst.msk [vmem:[%s8719_s1 + $0x79] sm:$0x8] %vm2524_vm4, %v2506_v2  }
 0x207   :  { %3913 = vst.msk [vmem:[%s8719_s1 + $0x98] sm:$0x10] %vm2524_vm4, %v2506_v2   ;;  %3914 = vst.msk [vmem:[%s8719_s1 + $0xb7] sm:$0x20] %vm2524_vm4, %v2506_v2  }
 0x208   :  { %3915 = vst.msk [vmem:[%s8719_s1 + $0xd6] sm:$0x40] %vm2524_vm4, %v2506_v2   ;;  %3916 = vst.msk [vmem:[%s8719_s1 + $0xf5] sm:$0x80] %vm2524_vm4, %v2506_v2  }
 0x209   :  { %3937 = vst.msk [vmem:[%s8719_s1 + $0x21c] sm:$0x1] %vm2507_vm3, %v2590_v4   ;;  %3938 = vst.msk [vmem:[%s8719_s1 + $0x23b] sm:$0x2] %vm2507_vm3, %v2590_v4  }
 0x20a   :  { %3939 = vst.msk [vmem:[%s8719_s1 + $0x25a] sm:$0x4] %vm2507_vm3, %v2590_v4   ;;  %3940 = vst.msk [vmem:[%s8719_s1 + $0x279] sm:$0x8] %vm2507_vm3, %v2590_v4  }
 0x20b   :  { %3941 = vst.msk [vmem:[%s8719_s1 + $0x298] sm:$0x10] %vm2507_vm3, %v2590_v4   ;;  %3942 = vst.msk [vmem:[%s8719_s1 + $0x2b7] sm:$0x20] %vm2507_vm3, %v2590_v4  }
 0x20c   :  { %3943 = vst.msk [vmem:[%s8719_s1 + $0x2d6] sm:$0x40] %vm2507_vm3, %v2590_v4   ;;  %3944 = vst.msk [vmem:[%s8719_s1 + $0x2f5] sm:$0x80] %vm2507_vm3, %v2590_v4  }
 0x20d   :  { %3919 = vst.msk [vmem:[%s8719_s1 + $0x11c] sm:$0x1] %vm2507_vm3, %v2548_v5   ;;  %3920 = vst.msk [vmem:[%s8719_s1 + $0x13b] sm:$0x2] %vm2507_vm3, %v2548_v5  }
 0x20e   :  { %3921 = vst.msk [vmem:[%s8719_s1 + $0x15a] sm:$0x4] %vm2507_vm3, %v2548_v5   ;;  %3922 = vst.msk [vmem:[%s8719_s1 + $0x179] sm:$0x8] %vm2507_vm3, %v2548_v5  }
 0x20f   :  { %3923 = vst.msk [vmem:[%s8719_s1 + $0x198] sm:$0x10] %vm2507_vm3, %v2548_v5   ;;  %3924 = vst.msk [vmem:[%s8719_s1 + $0x1b7] sm:$0x20] %vm2507_vm3, %v2548_v5  }
 0x210   :  { %3925 = vst.msk [vmem:[%s8719_s1 + $0x1d6] sm:$0x40] %vm2507_vm3, %v2548_v5   ;;  %3926 = vst.msk [vmem:[%s8719_s1 + $0x1f5] sm:$0x80] %vm2507_vm3, %v2548_v5  }
 0x211   :  { %3945 = vst.msk [vmem:[%s8719_s1 + $0x21c] sm:$0x1] %vm2524_vm4, %v2590_v4   ;;  %3946 = vst.msk [vmem:[%s8719_s1 + $0x23b] sm:$0x2] %vm2524_vm4, %v2590_v4  }
 0x212   :  { %3947 = vst.msk [vmem:[%s8719_s1 + $0x25a] sm:$0x4] %vm2524_vm4, %v2590_v4   ;;  %3948 = vst.msk [vmem:[%s8719_s1 + $0x279] sm:$0x8] %vm2524_vm4, %v2590_v4  }
 0x213   :  { %3949 = vst.msk [vmem:[%s8719_s1 + $0x298] sm:$0x10] %vm2524_vm4, %v2590_v4   ;;  %3950 = vst.msk [vmem:[%s8719_s1 + $0x2b7] sm:$0x20] %vm2524_vm4, %v2590_v4  }
 0x214   :  { %3951 = vst.msk [vmem:[%s8719_s1 + $0x2d6] sm:$0x40] %vm2524_vm4, %v2590_v4   ;;  %3952 = vst.msk [vmem:[%s8719_s1 + $0x2f5] sm:$0x80] %vm2524_vm4, %v2590_v4  }
 0x215   :  { %3927 = vst.msk [vmem:[%s8719_s1 + $0x11c] sm:$0x1] %vm2524_vm4, %v2548_v5   ;;  %3928 = vst.msk [vmem:[%s8719_s1 + $0x13b] sm:$0x2] %vm2524_vm4, %v2548_v5  }
 0x216   :  { %3929 = vst.msk [vmem:[%s8719_s1 + $0x15a] sm:$0x4] %vm2524_vm4, %v2548_v5   ;;  %3930 = vst.msk [vmem:[%s8719_s1 + $0x179] sm:$0x8] %vm2524_vm4, %v2548_v5  }
 0x217   :  { %3931 = vst.msk [vmem:[%s8719_s1 + $0x198] sm:$0x10] %vm2524_vm4, %v2548_v5   ;;  %3932 = vst.msk [vmem:[%s8719_s1 + $0x1b7] sm:$0x20] %vm2524_vm4, %v2548_v5  }
 0x218   :  { %3933 = vst.msk [vmem:[%s8719_s1 + $0x1d6] sm:$0x40] %vm2524_vm4, %v2548_v5   ;;  %3934 = vst.msk [vmem:[%s8719_s1 + $0x1f5] sm:$0x80] %vm2524_vm4, %v2548_v5  }
 0x219   :  { %3972 = vst.msk [vmem:[%s8719_s1 + $0xe] sm:$0x1] %vm2674_vm5, %v2673_v6   ;;  %3973 = vst.msk [vmem:[%s8719_s1 + $0x2d] sm:$0x2] %vm2674_vm5, %v2673_v6  }
 0x21a   :  { %3974 = vst.msk [vmem:[%s8719_s1 + $0x4c] sm:$0x4] %vm2674_vm5, %v2673_v6   ;;  %3975 = vst.msk [vmem:[%s8719_s1 + $0x6b] sm:$0x8] %vm2674_vm5, %v2673_v6  }
 0x21b   :  { %3976 = vst.msk [vmem:[%s8719_s1 + $0x8a] sm:$0x10] %vm2674_vm5, %v2673_v6   ;;  %3977 = vst.msk [vmem:[%s8719_s1 + $0xa9] sm:$0x20] %vm2674_vm5, %v2673_v6  }
 0x21c   :  { %3978 = vst.msk [vmem:[%s8719_s1 + $0xc8] sm:$0x40] %vm2674_vm5, %v2673_v6   ;;  %3979 = vst.msk [vmem:[%s8719_s1 + $0xe7] sm:$0x80] %vm2674_vm5, %v2673_v6  }
 0x21d   :  { %3955 = vst.msk [vmem:[%s8719_s1 + $0x31c] sm:$0x1] %vm2507_vm3, %v2632_v7   ;;  %3956 = vst.msk [vmem:[%s8719_s1 + $0x33b] sm:$0x2] %vm2507_vm3, %v2632_v7  }
 0x21e   :  { %3957 = vst.msk [vmem:[%s8719_s1 + $0x35a] sm:$0x4] %vm2507_vm3, %v2632_v7   ;;  %3958 = vst.msk [vmem:[%s8719_s1 + $0x379] sm:$0x8] %vm2507_vm3, %v2632_v7  }
 0x21f   :  { %3959 = vst.msk [vmem:[%s8719_s1 + $0x398] sm:$0x10] %vm2507_vm3, %v2632_v7   ;;  %3960 = vst.msk [vmem:[%s8719_s1 + $0x3b7] sm:$0x20] %vm2507_vm3, %v2632_v7  }
 0x220   :  { %3961 = vst.msk [vmem:[%s8719_s1 + $0x3d6] sm:$0x40] %vm2507_vm3, %v2632_v7   ;;  %3962 = vst.msk [vmem:[%s8719_s1 + $0x3f5] sm:$0x80] %vm2507_vm3, %v2632_v7  }
 0x221   :  { %3980 = vst.msk [vmem:[%s8719_s1 + $0xe] sm:$0x1] %vm2691_vm6, %v2673_v6   ;;  %3981 = vst.msk [vmem:[%s8719_s1 + $0x2d] sm:$0x2] %vm2691_vm6, %v2673_v6  }
 0x222   :  { %3982 = vst.msk [vmem:[%s8719_s1 + $0x4c] sm:$0x4] %vm2691_vm6, %v2673_v6   ;;  %3983 = vst.msk [vmem:[%s8719_s1 + $0x6b] sm:$0x8] %vm2691_vm6, %v2673_v6  }
 0x223   :  { %3984 = vst.msk [vmem:[%s8719_s1 + $0x8a] sm:$0x10] %vm2691_vm6, %v2673_v6   ;;  %3985 = vst.msk [vmem:[%s8719_s1 + $0xa9] sm:$0x20] %vm2691_vm6, %v2673_v6  }
 0x224   :  { %3986 = vst.msk [vmem:[%s8719_s1 + $0xc8] sm:$0x40] %vm2691_vm6, %v2673_v6   ;;  %3987 = vst.msk [vmem:[%s8719_s1 + $0xe7] sm:$0x80] %vm2691_vm6, %v2673_v6  }
 0x225   :  { %3963 = vst.msk [vmem:[%s8719_s1 + $0x31c] sm:$0x1] %vm2524_vm4, %v2632_v7   ;;  %3964 = vst.msk [vmem:[%s8719_s1 + $0x33b] sm:$0x2] %vm2524_vm4, %v2632_v7  }
 0x226   :  { %3965 = vst.msk [vmem:[%s8719_s1 + $0x35a] sm:$0x4] %vm2524_vm4, %v2632_v7   ;;  %3966 = vst.msk [vmem:[%s8719_s1 + $0x379] sm:$0x8] %vm2524_vm4, %v2632_v7  }
 0x227   :  { %3967 = vst.msk [vmem:[%s8719_s1 + $0x398] sm:$0x10] %vm2524_vm4, %v2632_v7   ;;  %3968 = vst.msk [vmem:[%s8719_s1 + $0x3b7] sm:$0x20] %vm2524_vm4, %v2632_v7  }
 0x228   :  { %3969 = vst.msk [vmem:[%s8719_s1 + $0x3d6] sm:$0x40] %vm2524_vm4, %v2632_v7   ;;  %3970 = vst.msk [vmem:[%s8719_s1 + $0x3f5] sm:$0x80] %vm2524_vm4, %v2632_v7  }
 0x229   :  { %4008 = vst.msk [vmem:[%s8719_s1 + $0x20e] sm:$0x1] %vm2674_vm5, %v2757_v8   ;;  %4009 = vst.msk [vmem:[%s8719_s1 + $0x22d] sm:$0x2] %vm2674_vm5, %v2757_v8  }
 0x22a   :  { %4010 = vst.msk [vmem:[%s8719_s1 + $0x24c] sm:$0x4] %vm2674_vm5, %v2757_v8   ;;  %4011 = vst.msk [vmem:[%s8719_s1 + $0x26b] sm:$0x8] %vm2674_vm5, %v2757_v8  }
 0x22b   :  { %4012 = vst.msk [vmem:[%s8719_s1 + $0x28a] sm:$0x10] %vm2674_vm5, %v2757_v8   ;;  %4013 = vst.msk [vmem:[%s8719_s1 + $0x2a9] sm:$0x20] %vm2674_vm5, %v2757_v8  }
 0x22c   :  { %4014 = vst.msk [vmem:[%s8719_s1 + $0x2c8] sm:$0x40] %vm2674_vm5, %v2757_v8   ;;  %4015 = vst.msk [vmem:[%s8719_s1 + $0x2e7] sm:$0x80] %vm2674_vm5, %v2757_v8  }
 0x22d   :  { %3990 = vst.msk [vmem:[%s8719_s1 + $0x10e] sm:$0x1] %vm2674_vm5, %v2715_v9   ;;  %3991 = vst.msk [vmem:[%s8719_s1 + $0x12d] sm:$0x2] %vm2674_vm5, %v2715_v9  }
 0x22e   :  { %3992 = vst.msk [vmem:[%s8719_s1 + $0x14c] sm:$0x4] %vm2674_vm5, %v2715_v9   ;;  %3993 = vst.msk [vmem:[%s8719_s1 + $0x16b] sm:$0x8] %vm2674_vm5, %v2715_v9  }
 0x22f   :  { %3994 = vst.msk [vmem:[%s8719_s1 + $0x18a] sm:$0x10] %vm2674_vm5, %v2715_v9   ;;  %3995 = vst.msk [vmem:[%s8719_s1 + $0x1a9] sm:$0x20] %vm2674_vm5, %v2715_v9  }
 0x230   :  { %3996 = vst.msk [vmem:[%s8719_s1 + $0x1c8] sm:$0x40] %vm2674_vm5, %v2715_v9   ;;  %3997 = vst.msk [vmem:[%s8719_s1 + $0x1e7] sm:$0x80] %vm2674_vm5, %v2715_v9  }
 0x231   :  { %4016 = vst.msk [vmem:[%s8719_s1 + $0x20e] sm:$0x1] %vm2691_vm6, %v2757_v8   ;;  %4017 = vst.msk [vmem:[%s8719_s1 + $0x22d] sm:$0x2] %vm2691_vm6, %v2757_v8  }
 0x232   :  { %4018 = vst.msk [vmem:[%s8719_s1 + $0x24c] sm:$0x4] %vm2691_vm6, %v2757_v8   ;;  %4019 = vst.msk [vmem:[%s8719_s1 + $0x26b] sm:$0x8] %vm2691_vm6, %v2757_v8  }
 0x233   :  { %4020 = vst.msk [vmem:[%s8719_s1 + $0x28a] sm:$0x10] %vm2691_vm6, %v2757_v8   ;;  %4021 = vst.msk [vmem:[%s8719_s1 + $0x2a9] sm:$0x20] %vm2691_vm6, %v2757_v8  }
 0x234   :  { %4022 = vst.msk [vmem:[%s8719_s1 + $0x2c8] sm:$0x40] %vm2691_vm6, %v2757_v8   ;;  %4023 = vst.msk [vmem:[%s8719_s1 + $0x2e7] sm:$0x80] %vm2691_vm6, %v2757_v8  }
 0x235   :  { %3998 = vst.msk [vmem:[%s8719_s1 + $0x10e] sm:$0x1] %vm2691_vm6, %v2715_v9   ;;  %3999 = vst.msk [vmem:[%s8719_s1 + $0x12d] sm:$0x2] %vm2691_vm6, %v2715_v9  }
 0x236   :  { %4000 = vst.msk [vmem:[%s8719_s1 + $0x14c] sm:$0x4] %vm2691_vm6, %v2715_v9   ;;  %4001 = vst.msk [vmem:[%s8719_s1 + $0x16b] sm:$0x8] %vm2691_vm6, %v2715_v9  }
 0x237   :  { %4002 = vst.msk [vmem:[%s8719_s1 + $0x18a] sm:$0x10] %vm2691_vm6, %v2715_v9   ;;  %4003 = vst.msk [vmem:[%s8719_s1 + $0x1a9] sm:$0x20] %vm2691_vm6, %v2715_v9  }
 0x238   :  { %4004 = vst.msk [vmem:[%s8719_s1 + $0x1c8] sm:$0x40] %vm2691_vm6, %v2715_v9   ;;  %4005 = vst.msk [vmem:[%s8719_s1 + $0x1e7] sm:$0x80] %vm2691_vm6, %v2715_v9  }
 0x239   :  { %3714 = vst.msk [vmem:[%s8719_s1 + $0x319] sm:$0x1] %vm3_vm0, %v2064_v10   ;;  %3715 = vst.msk [vmem:[%s8719_s1 + $0x338] sm:$0x2] %vm3_vm0, %v2064_v10  }
 0x23a   :  { %3716 = vst.msk [vmem:[%s8719_s1 + $0x357] sm:$0x4] %vm3_vm0, %v2064_v10   ;;  %3717 = vst.msk [vmem:[%s8719_s1 + $0x376] sm:$0x8] %vm3_vm0, %v2064_v10  }
 0x23b   :  { %3718 = vst.msk [vmem:[%s8719_s1 + $0x395] sm:$0x10] %vm3_vm0, %v2064_v10   ;;  %3719 = vst.msk [vmem:[%s8719_s1 + $0x3b4] sm:$0x20] %vm3_vm0, %v2064_v10  }
 0x23c   :  { %3720 = vst.msk [vmem:[%s8719_s1 + $0x3d3] sm:$0x40] %vm3_vm0, %v2064_v10   ;;  %3721 = vst.msk [vmem:[%s8719_s1 + $0x3f2] sm:$0x80] %vm3_vm0, %v2064_v10  }
 0x23d   :  { %4026 = vst.msk [vmem:[%s8719_s1 + $0x30e] sm:$0x1] %vm2674_vm5, %v2799_v11   ;;  %4027 = vst.msk [vmem:[%s8719_s1 + $0x32d] sm:$0x2] %vm2674_vm5, %v2799_v11  }
 0x23e   :  { %4028 = vst.msk [vmem:[%s8719_s1 + $0x34c] sm:$0x4] %vm2674_vm5, %v2799_v11   ;;  %4029 = vst.msk [vmem:[%s8719_s1 + $0x36b] sm:$0x8] %vm2674_vm5, %v2799_v11  }
 0x23f   :  { %4030 = vst.msk [vmem:[%s8719_s1 + $0x38a] sm:$0x10] %vm2674_vm5, %v2799_v11   ;;  %4031 = vst.msk [vmem:[%s8719_s1 + $0x3a9] sm:$0x20] %vm2674_vm5, %v2799_v11  }
 0x240   :  { %4032 = vst.msk [vmem:[%s8719_s1 + $0x3c8] sm:$0x40] %vm2674_vm5, %v2799_v11   ;;  %4033 = vst.msk [vmem:[%s8719_s1 + $0x3e7] sm:$0x80] %vm2674_vm5, %v2799_v11  }
 0x241   :  { %4034 = vst.msk [vmem:[%s8719_s1 + $0x30e] sm:$0x1] %vm2691_vm6, %v2799_v11   ;;  %4035 = vst.msk [vmem:[%s8719_s1 + $0x32d] sm:$0x2] %vm2691_vm6, %v2799_v11  }
 0x242   :  { %4036 = vst.msk [vmem:[%s8719_s1 + $0x34c] sm:$0x4] %vm2691_vm6, %v2799_v11   ;;  %4037 = vst.msk [vmem:[%s8719_s1 + $0x36b] sm:$0x8] %vm2691_vm6, %v2799_v11  }
 0x243   :  { %4038 = vst.msk [vmem:[%s8719_s1 + $0x38a] sm:$0x10] %vm2691_vm6, %v2799_v11   ;;  %4039 = vst.msk [vmem:[%s8719_s1 + $0x3a9] sm:$0x20] %vm2691_vm6, %v2799_v11  }
 0x244   :  { %4040 = vst.msk [vmem:[%s8719_s1 + $0x3c8] sm:$0x40] %vm2691_vm6, %v2799_v11   ;;  %4041 = vst.msk [vmem:[%s8719_s1 + $0x3e7] sm:$0x80] %vm2691_vm6, %v2799_v11  }
 0x245   :  { %3731 = vst.msk [vmem:[%s8719_s1 + $0x10b] sm:$0x1] %vm3_vm0, %v2105_v12   ;;  %3732 = vst.msk [vmem:[%s8719_s1 + $0x12a] sm:$0x2] %vm3_vm0, %v2105_v12  }
 0x246   :  { %3733 = vst.msk [vmem:[%s8719_s1 + $0x149] sm:$0x4] %vm3_vm0, %v2105_v12   ;;  %3734 = vst.msk [vmem:[%s8719_s1 + $0x168] sm:$0x8] %vm3_vm0, %v2105_v12  }
 0x247   :  { %3735 = vst.msk [vmem:[%s8719_s1 + $0x187] sm:$0x10] %vm3_vm0, %v2105_v12   ;;  %3736 = vst.msk [vmem:[%s8719_s1 + $0x1a6] sm:$0x20] %vm3_vm0, %v2105_v12  }
 0x248   :  { %3737 = vst.msk [vmem:[%s8719_s1 + $0x1c5] sm:$0x40] %vm3_vm0, %v2105_v12   ;;  %3738 = vst.msk [vmem:[%s8719_s1 + $0x1e4] sm:$0x80] %vm3_vm0, %v2105_v12  }
 0x249   :  { %3722 = vst.msk [vmem:[%s8719_s1 + $0xb] sm:$0x1] %vm3_vm0, %v2084_v13   ;;  %3723 = vst.msk [vmem:[%s8719_s1 + $0x2a] sm:$0x2] %vm3_vm0, %v2084_v13  }
 0x24a   :  { %3724 = vst.msk [vmem:[%s8719_s1 + $0x49] sm:$0x4] %vm3_vm0, %v2084_v13   ;;  %3725 = vst.msk [vmem:[%s8719_s1 + $0x68] sm:$0x8] %vm3_vm0, %v2084_v13  }
 0x24b   :  { %3726 = vst.msk [vmem:[%s8719_s1 + $0x87] sm:$0x10] %vm3_vm0, %v2084_v13   ;;  %3727 = vst.msk [vmem:[%s8719_s1 + $0xa6] sm:$0x20] %vm3_vm0, %v2084_v13  }
 0x24c   :  { %3728 = vst.msk [vmem:[%s8719_s1 + $0xc5] sm:$0x40] %vm3_vm0, %v2084_v13   ;;  %3729 = vst.msk [vmem:[%s8719_s1 + $0xe4] sm:$0x80] %vm3_vm0, %v2084_v13  }
 0x24d   :  { %3749 = vst.msk [vmem:[%s8719_s1 + $0x30b] sm:$0x1] %vm3_vm0, %v2147_v14   ;;  %3750 = vst.msk [vmem:[%s8719_s1 + $0x32a] sm:$0x2] %vm3_vm0, %v2147_v14  }
 0x24e   :  { %3751 = vst.msk [vmem:[%s8719_s1 + $0x349] sm:$0x4] %vm3_vm0, %v2147_v14   ;;  %3752 = vst.msk [vmem:[%s8719_s1 + $0x368] sm:$0x8] %vm3_vm0, %v2147_v14  }
 0x24f   :  { %3753 = vst.msk [vmem:[%s8719_s1 + $0x387] sm:$0x10] %vm3_vm0, %v2147_v14   ;;  %3754 = vst.msk [vmem:[%s8719_s1 + $0x3a6] sm:$0x20] %vm3_vm0, %v2147_v14  }
 0x250   :  { %3755 = vst.msk [vmem:[%s8719_s1 + $0x3c5] sm:$0x40] %vm3_vm0, %v2147_v14   ;;  %3756 = vst.msk [vmem:[%s8719_s1 + $0x3e4] sm:$0x80] %vm3_vm0, %v2147_v14  }
 0x251   :  { %3740 = vst.msk [vmem:[%s8719_s1 + $0x20b] sm:$0x1] %vm3_vm0, %v2126_v15   ;;  %3741 = vst.msk [vmem:[%s8719_s1 + $0x22a] sm:$0x2] %vm3_vm0, %v2126_v15  }
 0x252   :  { %3742 = vst.msk [vmem:[%s8719_s1 + $0x249] sm:$0x4] %vm3_vm0, %v2126_v15   ;;  %3743 = vst.msk [vmem:[%s8719_s1 + $0x268] sm:$0x8] %vm3_vm0, %v2126_v15  }
 0x253   :  { %3744 = vst.msk [vmem:[%s8719_s1 + $0x287] sm:$0x10] %vm3_vm0, %v2126_v15   ;;  %3745 = vst.msk [vmem:[%s8719_s1 + $0x2a6] sm:$0x20] %vm3_vm0, %v2126_v15  }
 0x254   :  { %3746 = vst.msk [vmem:[%s8719_s1 + $0x2c5] sm:$0x40] %vm3_vm0, %v2126_v15   ;;  %3747 = vst.msk [vmem:[%s8719_s1 + $0x2e4] sm:$0x80] %vm3_vm0, %v2126_v15  }
 0x255   :  { %3767 = vst.msk [vmem:[%s8719_s1 + $0x11a] sm:$0x1] %vm3_vm0, %v2189_v16   ;;  %3768 = vst.msk [vmem:[%s8719_s1 + $0x139] sm:$0x2] %vm3_vm0, %v2189_v16  }
 0x256   :  { %3769 = vst.msk [vmem:[%s8719_s1 + $0x158] sm:$0x4] %vm3_vm0, %v2189_v16   ;;  %3770 = vst.msk [vmem:[%s8719_s1 + $0x177] sm:$0x8] %vm3_vm0, %v2189_v16  }
 0x257   :  { %3771 = vst.msk [vmem:[%s8719_s1 + $0x196] sm:$0x10] %vm3_vm0, %v2189_v16   ;;  %3772 = vst.msk [vmem:[%s8719_s1 + $0x1b5] sm:$0x20] %vm3_vm0, %v2189_v16  }
 0x258   :  { %3773 = vst.msk [vmem:[%s8719_s1 + $0x1d4] sm:$0x40] %vm3_vm0, %v2189_v16   ;;  %3774 = vst.msk [vmem:[%s8719_s1 + $0x1f3] sm:$0x80] %vm3_vm0, %v2189_v16  }
 0x259   :  { %3758 = vst.msk [vmem:[%s8719_s1 + $0x1a] sm:$0x1] %vm3_vm0, %v2168_v17   ;;  %3759 = vst.msk [vmem:[%s8719_s1 + $0x39] sm:$0x2] %vm3_vm0, %v2168_v17  }
 0x25a   :  { %3760 = vst.msk [vmem:[%s8719_s1 + $0x58] sm:$0x4] %vm3_vm0, %v2168_v17   ;;  %3761 = vst.msk [vmem:[%s8719_s1 + $0x77] sm:$0x8] %vm3_vm0, %v2168_v17  }
 0x25b   :  { %3762 = vst.msk [vmem:[%s8719_s1 + $0x96] sm:$0x10] %vm3_vm0, %v2168_v17   ;;  %3763 = vst.msk [vmem:[%s8719_s1 + $0xb5] sm:$0x20] %vm3_vm0, %v2168_v17  }
 0x25c   :  { %3764 = vst.msk [vmem:[%s8719_s1 + $0xd4] sm:$0x40] %vm3_vm0, %v2168_v17   ;;  %3765 = vst.msk [vmem:[%s8719_s1 + $0xf3] sm:$0x80] %vm3_vm0, %v2168_v17  }
 0x25d   :  { %3785 = vst.msk [vmem:[%s8719_s1 + $0x31a] sm:$0x1] %vm3_vm0, %v2231_v18   ;;  %3786 = vst.msk [vmem:[%s8719_s1 + $0x339] sm:$0x2] %vm3_vm0, %v2231_v18  }
 0x25e   :  { %3787 = vst.msk [vmem:[%s8719_s1 + $0x358] sm:$0x4] %vm3_vm0, %v2231_v18   ;;  %3788 = vst.msk [vmem:[%s8719_s1 + $0x377] sm:$0x8] %vm3_vm0, %v2231_v18  }
 0x25f   :  { %3789 = vst.msk [vmem:[%s8719_s1 + $0x396] sm:$0x10] %vm3_vm0, %v2231_v18   ;;  %3790 = vst.msk [vmem:[%s8719_s1 + $0x3b5] sm:$0x20] %vm3_vm0, %v2231_v18  }
 0x260   :  { %3791 = vst.msk [vmem:[%s8719_s1 + $0x3d4] sm:$0x40] %vm3_vm0, %v2231_v18   ;;  %3792 = vst.msk [vmem:[%s8719_s1 + $0x3f3] sm:$0x80] %vm3_vm0, %v2231_v18  }
 0x261   :  { %3776 = vst.msk [vmem:[%s8719_s1 + $0x21a] sm:$0x1] %vm3_vm0, %v2210_v19   ;;  %3777 = vst.msk [vmem:[%s8719_s1 + $0x239] sm:$0x2] %vm3_vm0, %v2210_v19  }
 0x262   :  { %3778 = vst.msk [vmem:[%s8719_s1 + $0x258] sm:$0x4] %vm3_vm0, %v2210_v19   ;;  %3779 = vst.msk [vmem:[%s8719_s1 + $0x277] sm:$0x8] %vm3_vm0, %v2210_v19  }
 0x263   :  { %3780 = vst.msk [vmem:[%s8719_s1 + $0x296] sm:$0x10] %vm3_vm0, %v2210_v19   ;;  %3781 = vst.msk [vmem:[%s8719_s1 + $0x2b5] sm:$0x20] %vm3_vm0, %v2210_v19  }
 0x264   :  { %3782 = vst.msk [vmem:[%s8719_s1 + $0x2d4] sm:$0x40] %vm3_vm0, %v2210_v19   ;;  %3783 = vst.msk [vmem:[%s8719_s1 + $0x2f3] sm:$0x80] %vm3_vm0, %v2210_v19  }
 0x265   :  { %3802 = vst.msk [vmem:[%s8719_s1 + $0x10c] sm:$0x1] %vm3_vm0, %v2272_v20   ;;  %3803 = vst.msk [vmem:[%s8719_s1 + $0x12b] sm:$0x2] %vm3_vm0, %v2272_v20  }
 0x266   :  { %3804 = vst.msk [vmem:[%s8719_s1 + $0x14a] sm:$0x4] %vm3_vm0, %v2272_v20   ;;  %3805 = vst.msk [vmem:[%s8719_s1 + $0x169] sm:$0x8] %vm3_vm0, %v2272_v20  }
 0x267   :  { %3806 = vst.msk [vmem:[%s8719_s1 + $0x188] sm:$0x10] %vm3_vm0, %v2272_v20   ;;  %3807 = vst.msk [vmem:[%s8719_s1 + $0x1a7] sm:$0x20] %vm3_vm0, %v2272_v20  }
 0x268   :  { %3808 = vst.msk [vmem:[%s8719_s1 + $0x1c6] sm:$0x40] %vm3_vm0, %v2272_v20   ;;  %3809 = vst.msk [vmem:[%s8719_s1 + $0x1e5] sm:$0x80] %vm3_vm0, %v2272_v20  }
 0x269   :  { %3793 = vst.msk [vmem:[%s8719_s1 + $0xc] sm:$0x1] %vm3_vm0, %v2251_v21   ;;  %3794 = vst.msk [vmem:[%s8719_s1 + $0x2b] sm:$0x2] %vm3_vm0, %v2251_v21  }
 0x26a   :  { %3795 = vst.msk [vmem:[%s8719_s1 + $0x4a] sm:$0x4] %vm3_vm0, %v2251_v21   ;;  %3796 = vst.msk [vmem:[%s8719_s1 + $0x69] sm:$0x8] %vm3_vm0, %v2251_v21  }
 0x26b   :  { %3797 = vst.msk [vmem:[%s8719_s1 + $0x88] sm:$0x10] %vm3_vm0, %v2251_v21   ;;  %3798 = vst.msk [vmem:[%s8719_s1 + $0xa7] sm:$0x20] %vm3_vm0, %v2251_v21  }
 0x26c   :  { %3799 = vst.msk [vmem:[%s8719_s1 + $0xc6] sm:$0x40] %vm3_vm0, %v2251_v21   ;;  %3800 = vst.msk [vmem:[%s8719_s1 + $0xe5] sm:$0x80] %vm3_vm0, %v2251_v21  }
 0x26d   :  { %3820 = vst.msk [vmem:[%s8719_s1 + $0x30c] sm:$0x1] %vm3_vm0, %v2314_v22   ;;  %3821 = vst.msk [vmem:[%s8719_s1 + $0x32b] sm:$0x2] %vm3_vm0, %v2314_v22  }
 0x26e   :  { %3822 = vst.msk [vmem:[%s8719_s1 + $0x34a] sm:$0x4] %vm3_vm0, %v2314_v22   ;;  %3823 = vst.msk [vmem:[%s8719_s1 + $0x369] sm:$0x8] %vm3_vm0, %v2314_v22  }
 0x26f   :  { %3824 = vst.msk [vmem:[%s8719_s1 + $0x388] sm:$0x10] %vm3_vm0, %v2314_v22   ;;  %3825 = vst.msk [vmem:[%s8719_s1 + $0x3a7] sm:$0x20] %vm3_vm0, %v2314_v22  }
 0x270   :  { %3826 = vst.msk [vmem:[%s8719_s1 + $0x3c6] sm:$0x40] %vm3_vm0, %v2314_v22   ;;  %3827 = vst.msk [vmem:[%s8719_s1 + $0x3e5] sm:$0x80] %vm3_vm0, %v2314_v22  }
 0x271   :  { %3811 = vst.msk [vmem:[%s8719_s1 + $0x20c] sm:$0x1] %vm3_vm0, %v2293_v23   ;;  %3812 = vst.msk [vmem:[%s8719_s1 + $0x22b] sm:$0x2] %vm3_vm0, %v2293_v23  }
 0x272   :  { %3813 = vst.msk [vmem:[%s8719_s1 + $0x24a] sm:$0x4] %vm3_vm0, %v2293_v23   ;;  %3814 = vst.msk [vmem:[%s8719_s1 + $0x269] sm:$0x8] %vm3_vm0, %v2293_v23  }
 0x273   :  { %3815 = vst.msk [vmem:[%s8719_s1 + $0x288] sm:$0x10] %vm3_vm0, %v2293_v23   ;;  %3816 = vst.msk [vmem:[%s8719_s1 + $0x2a7] sm:$0x20] %vm3_vm0, %v2293_v23  }
 0x274   :  { %3817 = vst.msk [vmem:[%s8719_s1 + $0x2c6] sm:$0x40] %vm3_vm0, %v2293_v23   ;;  %3818 = vst.msk [vmem:[%s8719_s1 + $0x2e5] sm:$0x80] %vm3_vm0, %v2293_v23  }
 0x275   :  { %3838 = vst.msk [vmem:[%s8719_s1 + $0x11b] sm:$0x1] %vm3_vm0, %v2356_v24   ;;  %3839 = vst.msk [vmem:[%s8719_s1 + $0x13a] sm:$0x2] %vm3_vm0, %v2356_v24  }
 0x276   :  { %3840 = vst.msk [vmem:[%s8719_s1 + $0x159] sm:$0x4] %vm3_vm0, %v2356_v24   ;;  %3841 = vst.msk [vmem:[%s8719_s1 + $0x178] sm:$0x8] %vm3_vm0, %v2356_v24  }
 0x277   :  { %3842 = vst.msk [vmem:[%s8719_s1 + $0x197] sm:$0x10] %vm3_vm0, %v2356_v24   ;;  %3843 = vst.msk [vmem:[%s8719_s1 + $0x1b6] sm:$0x20] %vm3_vm0, %v2356_v24  }
 0x278   :  { %3844 = vst.msk [vmem:[%s8719_s1 + $0x1d5] sm:$0x40] %vm3_vm0, %v2356_v24   ;;  %3845 = vst.msk [vmem:[%s8719_s1 + $0x1f4] sm:$0x80] %vm3_vm0, %v2356_v24  }
 0x279   :  { %3829 = vst.msk [vmem:[%s8719_s1 + $0x1b] sm:$0x1] %vm3_vm0, %v2335_v25   ;;  %3830 = vst.msk [vmem:[%s8719_s1 + $0x3a] sm:$0x2] %vm3_vm0, %v2335_v25  }
 0x27a   :  { %3831 = vst.msk [vmem:[%s8719_s1 + $0x59] sm:$0x4] %vm3_vm0, %v2335_v25   ;;  %3832 = vst.msk [vmem:[%s8719_s1 + $0x78] sm:$0x8] %vm3_vm0, %v2335_v25  }
 0x27b   :  { %3833 = vst.msk [vmem:[%s8719_s1 + $0x97] sm:$0x10] %vm3_vm0, %v2335_v25   ;;  %3834 = vst.msk [vmem:[%s8719_s1 + $0xb6] sm:$0x20] %vm3_vm0, %v2335_v25  }
 0x27c   :  { %3835 = vst.msk [vmem:[%s8719_s1 + $0xd5] sm:$0x40] %vm3_vm0, %v2335_v25   ;;  %3836 = vst.msk [vmem:[%s8719_s1 + $0xf4] sm:$0x80] %vm3_vm0, %v2335_v25  }
 0x27d   :  { %3856 = vst.msk [vmem:[%s8719_s1 + $0x31b] sm:$0x1] %vm3_vm0, %v2398_v26   ;;  %3857 = vst.msk [vmem:[%s8719_s1 + $0x33a] sm:$0x2] %vm3_vm0, %v2398_v26  }
 0x27e   :  { %3858 = vst.msk [vmem:[%s8719_s1 + $0x359] sm:$0x4] %vm3_vm0, %v2398_v26   ;;  %3859 = vst.msk [vmem:[%s8719_s1 + $0x378] sm:$0x8] %vm3_vm0, %v2398_v26  }
 0x27f   :  { %3860 = vst.msk [vmem:[%s8719_s1 + $0x397] sm:$0x10] %vm3_vm0, %v2398_v26   ;;  %3861 = vst.msk [vmem:[%s8719_s1 + $0x3b6] sm:$0x20] %vm3_vm0, %v2398_v26  }
 0x280   :  { %3862 = vst.msk [vmem:[%s8719_s1 + $0x3d5] sm:$0x40] %vm3_vm0, %v2398_v26   ;;  %3863 = vst.msk [vmem:[%s8719_s1 + $0x3f4] sm:$0x80] %vm3_vm0, %v2398_v26  }
 0x281   :  { %3847 = vst.msk [vmem:[%s8719_s1 + $0x21b] sm:$0x1] %vm3_vm0, %v2377_v27   ;;  %3848 = vst.msk [vmem:[%s8719_s1 + $0x23a] sm:$0x2] %vm3_vm0, %v2377_v27  }
 0x282   :  { %3849 = vst.msk [vmem:[%s8719_s1 + $0x259] sm:$0x4] %vm3_vm0, %v2377_v27   ;;  %3850 = vst.msk [vmem:[%s8719_s1 + $0x278] sm:$0x8] %vm3_vm0, %v2377_v27  }
 0x283   :  { %3851 = vst.msk [vmem:[%s8719_s1 + $0x297] sm:$0x10] %vm3_vm0, %v2377_v27   ;;  %3852 = vst.msk [vmem:[%s8719_s1 + $0x2b6] sm:$0x20] %vm3_vm0, %v2377_v27  }
 0x284   :  { %3853 = vst.msk [vmem:[%s8719_s1 + $0x2d5] sm:$0x40] %vm3_vm0, %v2377_v27   ;;  %3854 = vst.msk [vmem:[%s8719_s1 + $0x2f4] sm:$0x80] %vm3_vm0, %v2377_v27  }
 0x285   :  { %3873 = vst.msk [vmem:[%s8719_s1 + $0x10d] sm:$0x1] %vm3_vm0, %v2439_v28   ;;  %3874 = vst.msk [vmem:[%s8719_s1 + $0x12c] sm:$0x2] %vm3_vm0, %v2439_v28  }
 0x286   :  { %3875 = vst.msk [vmem:[%s8719_s1 + $0x14b] sm:$0x4] %vm3_vm0, %v2439_v28   ;;  %3876 = vst.msk [vmem:[%s8719_s1 + $0x16a] sm:$0x8] %vm3_vm0, %v2439_v28  }
 0x287   :  { %3877 = vst.msk [vmem:[%s8719_s1 + $0x189] sm:$0x10] %vm3_vm0, %v2439_v28   ;;  %3878 = vst.msk [vmem:[%s8719_s1 + $0x1a8] sm:$0x20] %vm3_vm0, %v2439_v28  }
 0x288   :  { %3879 = vst.msk [vmem:[%s8719_s1 + $0x1c7] sm:$0x40] %vm3_vm0, %v2439_v28   ;;  %3880 = vst.msk [vmem:[%s8719_s1 + $0x1e6] sm:$0x80] %vm3_vm0, %v2439_v28  }
 0x289   :  { %3864 = vst.msk [vmem:[%s8719_s1 + $0xd] sm:$0x1] %vm3_vm0, %v2418_v29   ;;  %3865 = vst.msk [vmem:[%s8719_s1 + $0x2c] sm:$0x2] %vm3_vm0, %v2418_v29  }
 0x28a   :  { %3866 = vst.msk [vmem:[%s8719_s1 + $0x4b] sm:$0x4] %vm3_vm0, %v2418_v29   ;;  %3867 = vst.msk [vmem:[%s8719_s1 + $0x6a] sm:$0x8] %vm3_vm0, %v2418_v29  }
 0x28b   :  { %3868 = vst.msk [vmem:[%s8719_s1 + $0x89] sm:$0x10] %vm3_vm0, %v2418_v29   ;;  %3869 = vst.msk [vmem:[%s8719_s1 + $0xa8] sm:$0x20] %vm3_vm0, %v2418_v29  }
 0x28c   :  { %3870 = vst.msk [vmem:[%s8719_s1 + $0xc7] sm:$0x40] %vm3_vm0, %v2418_v29   ;;  %3871 = vst.msk [vmem:[%s8719_s1 + $0xe6] sm:$0x80] %vm3_vm0, %v2418_v29  }
 0x28d   :  { %3891 = vst.msk [vmem:[%s8719_s1 + $0x30d] sm:$0x1] %vm3_vm0, %v2481_v30   ;;  %3892 = vst.msk [vmem:[%s8719_s1 + $0x32c] sm:$0x2] %vm3_vm0, %v2481_v30  }
 0x28e   :  { %3893 = vst.msk [vmem:[%s8719_s1 + $0x34b] sm:$0x4] %vm3_vm0, %v2481_v30   ;;  %3894 = vst.msk [vmem:[%s8719_s1 + $0x36a] sm:$0x8] %vm3_vm0, %v2481_v30  }
 0x28f   :  { %3895 = vst.msk [vmem:[%s8719_s1 + $0x389] sm:$0x10] %vm3_vm0, %v2481_v30   ;;  %3896 = vst.msk [vmem:[%s8719_s1 + $0x3a8] sm:$0x20] %vm3_vm0, %v2481_v30  }
 0x290   :  { %3897 = vst.msk [vmem:[%s8719_s1 + $0x3c7] sm:$0x40] %vm3_vm0, %v2481_v30   ;;  %3898 = vst.msk [vmem:[%s8719_s1 + $0x3e6] sm:$0x80] %vm3_vm0, %v2481_v30  }
 0x291   :  { %3882 = vst.msk [vmem:[%s8719_s1 + $0x20d] sm:$0x1] %vm3_vm0, %v2460_v31   ;;  %3883 = vst.msk [vmem:[%s8719_s1 + $0x22c] sm:$0x2] %vm3_vm0, %v2460_v31  }
 0x292   :  { %3884 = vst.msk [vmem:[%s8719_s1 + $0x24b] sm:$0x4] %vm3_vm0, %v2460_v31   ;;  %3885 = vst.msk [vmem:[%s8719_s1 + $0x26a] sm:$0x8] %vm3_vm0, %v2460_v31  }
 0x293   :  { %3886 = vst.msk [vmem:[%s8719_s1 + $0x289] sm:$0x10] %vm3_vm0, %v2460_v31   ;;  %3887 = vst.msk [vmem:[%s8719_s1 + $0x2a8] sm:$0x20] %vm3_vm0, %v2460_v31  }
 0x294   :  { %3888 = vst.msk [vmem:[%s8719_s1 + $0x2c7] sm:$0x40] %vm3_vm0, %v2460_v31   ;;  %3889 = vst.msk [vmem:[%s8719_s1 + $0x2e6] sm:$0x80] %vm3_vm0, %v2460_v31  }

// kernel: afno2d_forward.1
= control target key start
LH: loop header
LB: loop body
LE: loop exit
PB: predicated region body
PF: predicated region fallthrough
CT: control target
= control target key end

     0   :  { %s868_s18 = smov 0   ;;  %s997_s0 = inlined_call_operand.vmem [shape: bf16[288,128], index: 0, kind: input, shape index: {}]   ;;  %s998_s1 = inlined_call_operand.vmem [shape: bf16[1,128,128], index: 1, kind: input, shape index: {}]   ;;  %s999_s2 = inlined_call_operand.vmem [shape: bf16[1,128,128], index: 2, kind: input, shape index: {}]   ;;  %s1000_s3 = inlined_call_operand.vmem [shape: f32[1,1,128], index: 3, kind: input, shape index: {}]   ;;  %s1001_s4 = inlined_call_operand.vmem [shape: f32[1,1,128], index: 4, kind: input, shape index: {}]   ;;  %s1002_s5 = inlined_call_operand.vmem [shape: f32[288,128], index: 5, kind: output, shape index: {}]  }
   0x1 LB: > { %s658_s19 = sadd.s32 4294967295, %s834_s18   ;;  %p662_p0 = scmp.ge.s32.totalorder %s834_s18, 1  ;;  %s834_s18 = sphi %s868_s18, %s15_s18  }
   0x2   : > { %p188_p1 = scmp.lt.s32.totalorder %s834_s18, 5 }
   0x4   : > { %p189_p2 = pnand %p662_p0, %p188_p1 }
   0x5   : > { %s216_s24 = smul.u32 (!%p189_p2), 9, %s658_s19 }
   0x6   : > { %192 = sbr.rel (%p189_p2) target bundleno = 479 (0x1df), region = 40 }
   0x7   : > { %p217_p3 = scmp.lt.s32.totalorder (!%p189_p2), %s216_s24, 35 }
   0xb   : > { %v807_v0 = vld [vmem:[%s998_s1 + $0x38] sm:$0xff]   ;;  %v836_v1 = vmov 0.0   ;;  %v808_v2 = vld [vmem:[%s998_s1 + $0x30] sm:$0xff]   ;;  %vm837_vm0 = vmmov 0   ;;  %v809_v3 = vld [vmem:[%s998_s1 + $0x28] sm:$0xff]   ;;  %s1004_s24 = smov (!%p217_p3, %s216_s24), 35 }
   0xc   : > { %725 = vmatprep.subr.bf16.mxu0 %v836_v1  ;;  %761 = vmatprep.subr.bf16.mxu1 %v836_v1  ;;  %s663_s27 = sshll.u32 %s1004_s24, 2  ;;  %v820_v4 = vld [vmem:[%s999_s2 + $0x38] sm:$0xff]   ;;  %v810_v5 = vld [vmem:[%s998_s1 + $0x20] sm:$0xff]   ;;  %v821_v6 = vld [vmem:[%s999_s2 + $0x30] sm:$0xff]   ;;  %s664_s13 = sshll.u32 %s1004_s24, 3 }
   0xd   : > { %726 = vmatpush3.bf16.msra.mxu0 %v807_v0  ;;  %741 = vmatprep.mubr.msk.bf16.mxu0 %vm837_vm0, %v836_v1  ;;  %s905_s9 = scalar_lea.vmem %s997_s0, %s663_s27  ;;  %v811_v7 = vld [vmem:[%s998_s1 + $0x18] sm:$0xff]   ;;  %v822_v8 = vld [vmem:[%s999_s2 + $0x28] sm:$0xff]   ;;  %v812_v9 = vld [vmem:[%s998_s1 + $0x10] sm:$0xff]   ;;  %s983_s16 = scalar_lea.vmem %s1002_s5, %s664_s13 }
   0xe   : > { %727 = vmatprep.subr.bf16.mxu0 %v836_v1  ;;  %777 = vmatprep.mubr.msk.bf16.mxu1 %vm837_vm0, %v836_v1  ;;  %v823_v10 = vld [vmem:[%s999_s2 + $0x20] sm:$0xff]   ;;  %v813_v11 = vld [vmem:[%s998_s1 + $0x8] sm:$0xff]   ;;  %v824_v12 = vld [vmem:[%s999_s2 + $0x18] sm:$0xff]  }
   0xf   : > { %762 = vmatpush3.bf16.msra.mxu1 %v820_v4  ;;  %v814_v13 = vld [vmem:[%s998_s1] sm:$0xff]   ;;  %v816_v15 = vld [vmem:[%s905_s9 + $0x8] sm:$0xff]   ;;  %v817_v16 = vld [vmem:[%s905_s9 + $0x10] sm:$0xff]  }
  0x10   : > { %763 = vmatprep.subr.bf16.mxu1 %v836_v1  ;;  %v815_v14 = vld [vmem:[%s905_s9] sm:$0xff]   ;;  %v818_v17 = vld [vmem:[%s905_s9 + $0x18] sm:$0xff]   ;;  %v825_v19 = vld [vmem:[%s999_s2 + $0x10] sm:$0xff]  }
  0x11   : > { %728 = vmatpush3.bf16.msra.mxu0 %v808_v2  ;;  %v819_v18 = vld [vmem:[%s905_s9 + $0x20] ss:$0 sps:$4 sm:$0xff]   ;;  %v826_v20 = vld [vmem:[%s999_s2 + $0x8] sm:$0xff]  }
  0x12   : > { %729 = vmatprep.subr.bf16.mxu0 %v836_v1  ;;  %v827_v21 = vld [vmem:[%s999_s2] sm:$0xff]  }
  0x13   : > { %764 = vmatpush3.bf16.msra.mxu1 %v821_v6  ;;  %v665_v22 = vld [vmem:[%s1000_s3] ss:$0 sm:$0xff] }
  0x14   : > { %765 = vmatprep.subr.bf16.mxu1 %v836_v1 }
  0x15   : > { %730 = vmatpush3.bf16.msra.mxu0 %v809_v3  ;;  %v679_v3 = vld [vmem:[%s1001_s4] ss:$0 sm:$0xff] }
  0x16   : > { %731 = vmatprep.subr.bf16.mxu0 %v836_v1 }
  0x17   : > { %766 = vmatpush3.bf16.msra.mxu1 %v822_v8 }
  0x18   : > { %767 = vmatprep.subr.bf16.mxu1 %v836_v1 }
  0x19   : > { %732 = vmatpush3.bf16.msra.mxu0 %v810_v5 }
  0x1a   : > { %733 = vmatprep.subr.bf16.mxu0 %v836_v1 }
  0x1b   : > { %768 = vmatpush3.bf16.msra.mxu1 %v823_v10 }
  0x1c   : > { %769 = vmatprep.subr.bf16.mxu1 %v836_v1 }
  0x1d   : > { %734 = vmatpush3.bf16.msra.mxu0 %v811_v7 }
  0x1e   : > { %735 = vmatprep.subr.bf16.mxu0 %v836_v1 }
  0x1f   : > { %770 = vmatpush3.bf16.msra.mxu1 %v824_v12 }
  0x20   : > { %771 = vmatprep.subr.bf16.mxu1 %v836_v1 }
  0x21   : > { %736 = vmatpush3.bf16.msra.mxu0 %v812_v9 }
  0x22   : > { %737 = vmatprep.subr.bf16.mxu0 %v836_v1 }
  0x23   : > { %772 = vmatpush3.bf16.msra.mxu1 %v825_v19 }
  0x24   : > { %773 = vmatprep.subr.bf16.mxu1 %v836_v1 }
  0x25   : > { %738 = vmatpush3.bf16.msra.mxu0 %v813_v11 }
  0x26   : > { %739 = vmatprep.subr.bf16.mxu0 %v836_v1 }
  0x27   : > { %774 = vmatpush3.bf16.msra.mxu1 %v826_v20 }
  0x28   : > { %775 = vmatprep.subr.bf16.mxu1 %v836_v1 }
  0x29   : > { %740 = vmatpush3.bf16.msra.mxu0 %v814_v13 }
  0x2b   : > { %776 = vmatpush3.bf16.msra.mxu1 %v827_v21 }
  0x2c   : > { %742 = vmatmul.mubr.bf16.vlgmr.msra.gmra.mxu0 %v815_v14 }
  0x2d   : > { %745 = vmatprep.mubr.msk.bf16.mxu0 %vm837_vm0, %v836_v1 }
  0x34   : > { %746 = vmatmul.mubr.bf16.gmra.mxu0 %v816_v15 }
  0x35   : > { %749 = vmatprep.mubr.msk.bf16.mxu0 %vm837_vm0, %v836_v1 }
  0x3c   : > { %750 = vmatmul.mubr.bf16.gmra.mxu0 %v817_v16 }
  0x3d   : > { %753 = vmatprep.mubr.msk.bf16.mxu0 %vm837_vm0, %v836_v1 }
  0x44   : > { %754 = vmatmul.mubr.bf16.gmra.mxu0 %v818_v17 }
  0x45   : > { %757 = vmatprep.mubr.msk.bf16.mxu0 %vm837_vm0, %v836_v1 }
  0x4c   : > { %758 = vmatmul.mubr.bf16.gmra.mxu0 %v819_v18 }
  0xec   : > { %v371_v23 = vpop.f32.mrf.mxu0 }
  0xed   : > { %v372_v25 = vadd.f32 %v665_v22, %v371_v23 }
  0xee   : > { %v743_v24 = vpop.f32.mrf.mxu0 }
  0xef   : > { %v409_v29 = vmax.f32 %v372_v25, 0.0 }
  0xf0   : > { %v374_v26 = vpop.f32.mrf.mxu0 }
  0xf1   : > { %v375_v27 = vadd.f32 %v665_v22, %v374_v26 }
  0xf2   : > { %v744_v28 = vpop.f32.mrf.mxu0 }
  0xf3   : > { %v410_v30 = vmax.f32 %v375_v27, 0.0 }
  0xf4   : > { %v379_v31 = vpop.f32.mrf.mxu0 }
  0xf5   : > { %v418_v32 = vpack.c.bf16 %v410_v30, %v409_v29  ;;  %v380_v34 = vadd.f32 %v665_v22, %v379_v31 }
  0xf6   : > { %v747_v33 = vpop.f32.mrf.mxu0 }
  0xf7   : > { %778 = vmatmul.mubr.bf16.vlgmr.msra.gmra.mxu1 %v418_v32  ;;  %v411_v38 = vmax.f32 %v380_v34, 0.0 }
  0xf8   : > { %v382_v35 = vpop.f32.mrf.mxu0  ;;  %781 = vmatprep.mubr.msk.bf16.mxu1 %vm837_vm0, %v836_v1 }
  0xf9   : > { %v383_v36 = vadd.f32 %v665_v22, %v382_v35 }
  0xfa   : > { %v748_v37 = vpop.f32.mrf.mxu0 }
  0xfb   : > { %v412_v39 = vmax.f32 %v383_v36, 0.0 }
  0xfc   : > { %v387_v40 = vpop.f32.mrf.mxu0 }
  0xfd   : > { %v419_v41 = vpack.c.bf16 %v412_v39, %v411_v38  ;;  %v388_v43 = vadd.f32 %v665_v22, %v387_v40 }
  0xfe   : > { %v751_v42 = vpop.f32.mrf.mxu0 }
  0xff   : > { %782 = vmatmul.mubr.bf16.gmra.mxu1 %v419_v41  ;;  %v413_v47 = vmax.f32 %v388_v43, 0.0 }
 0x100   : > { %v390_v44 = vpop.f32.mrf.mxu0  ;;  %785 = vmatprep.mubr.msk.bf16.mxu1 %vm837_vm0, %v836_v1 }
 0x101   : > { %v391_v45 = vadd.f32 %v665_v22, %v390_v44 }
 0x102   : > { %v752_v46 = vpop.f32.mrf.mxu0 }
 0x103   : > { %v414_v48 = vmax.f32 %v391_v45, 0.0 }
 0x104   : > { %v395_v49 = vpop.f32.mrf.mxu0 }
 0x105   : > { %v420_v50 = vpack.c.bf16 %v414_v48, %v413_v47  ;;  %v396_v52 = vadd.f32 %v665_v22, %v395_v49 }
 0x106   : > { %v755_v51 = vpop.f32.mrf.mxu0 }
 0x107   : > { %786 = vmatmul.mubr.bf16.gmra.mxu1 %v420_v50  ;;  %v415_v56 = vmax.f32 %v396_v52, 0.0 }
 0x108   : > { %v398_v53 = vpop.f32.mrf.mxu0  ;;  %789 = vmatprep.mubr.msk.bf16.mxu1 %vm837_vm0, %v836_v1 }
 0x109   : > { %v399_v54 = vadd.f32 %v665_v22, %v398_v53 }
 0x10a   : > { %v756_v55 = vpop.f32.mrf.mxu0 }
 0x10b   : > { %v416_v57 = vmax.f32 %v399_v54, 0.0 }
 0x10c   : > { %v403_v58 = vpop.f32.mrf.mxu0 }
 0x10d   : > { %v421_v59 = vpack.c.bf16 %v416_v57, %v415_v56  ;;  %v404_v60 = vadd.f32 %v665_v22, %v403_v58 }
 0x10e   : > { %v759_v61 = vpop.f32.mrf.mxu0 }
 0x10f   : > { %v417_v62 = vmax.f32 %v404_v60, 0.0  ;;  %790 = vmatmul.mubr.bf16.gmra.mxu1 %v421_v59 }
 0x110   : > { %v406_v63 = vpop.f32.mrf.mxu0  ;;  %793 = vmatprep.mubr.msk.bf16.mxu1 %vm837_vm0, %v836_v1 }
 0x111   : > { %v422_v2 = vpack.c.bf16 %v417_v62, %v417_v62 }
 0x112   : > { %v760_v0 = vpop.f32.mrf.mxu0 }
 0x117   : > { %794 = vmatmul.mubr.bf16.gmra.mxu1 %v422_v2 }
 0x1b7   : > { %v528_v4 = vpop.f32.mrf.mxu1 }
 0x1b8   : > { %v529_v5 = vadd.f32 %v679_v3, %v528_v4 }
 0x1b9   : > { %v779_v6 = vpop.f32.mrf.mxu1 }
 0x1ba   : > { %v688_v7 = vclamps-f32 %v529_v5, 0.01 }
 0x1bb   : > { %v531_v1 = vpop.f32.mrf.mxu1 }
 0x1bc   : > { %v584_v8 = vsub.f32 %v529_v5, %v688_v7  ;;  %v532_v9 = vadd.f32 %v679_v3, %v531_v1 }
 0x1bd   : > { %v780_v10 = vpop.f32.mrf.mxu1 }
 0x1be   : > { %593 = vst [vmem:[%s983_s16] sm:$0xff] %v584_v8  ;;  %v689_v11 = vclamps-f32 %v532_v9, 0.01 }
 0x1bf   : > { %v536_v12 = vpop.f32.mrf.mxu1 }
 0x1c0   : > { %v585_v13 = vsub.f32 %v532_v9, %v689_v11  ;;  %v537_v14 = vadd.f32 %v679_v3, %v536_v12 }
 0x1c1   : > { %v783_v15 = vpop.f32.mrf.mxu1 }
 0x1c2   : > { %594 = vst [vmem:[%s983_s16 + $0x8] sm:$0xff] %v585_v13  ;;  %v690_v16 = vclamps-f32 %v537_v14, 0.01 }
 0x1c3   : > { %v539_v17 = vpop.f32.mrf.mxu1 }
 0x1c4   : > { %v586_v18 = vsub.f32 %v537_v14, %v690_v16  ;;  %v540_v19 = vadd.f32 %v679_v3, %v539_v17 }
 0x1c5   : > { %v784_v20 = vpop.f32.mrf.mxu1 }
 0x1c6   : > { %595 = vst [vmem:[%s983_s16 + $0x10] sm:$0xff] %v586_v18  ;;  %v691_v21 = vclamps-f32 %v540_v19, 0.01 }
 0x1c7   : > { %v544_v22 = vpop.f32.mrf.mxu1 }
 0x1c8   : > { %v587_v23 = vsub.f32 %v540_v19, %v691_v21  ;;  %v545_v24 = vadd.f32 %v679_v3, %v544_v22 }
 0x1c9   : > { %v787_v25 = vpop.f32.mrf.mxu1 }
 0x1ca   : > { %596 = vst [vmem:[%s983_s16 + $0x18] sm:$0xff] %v587_v23  ;;  %v692_v26 = vclamps-f32 %v545_v24, 0.01 }
 0x1cb   : > { %v547_v27 = vpop.f32.mrf.mxu1 }
 0x1cc   : > { %v588_v28 = vsub.f32 %v545_v24, %v692_v26  ;;  %v548_v29 = vadd.f32 %v679_v3, %v547_v27 }
 0x1cd   : > { %v788_v30 = vpop.f32.mrf.mxu1 }
 0x1ce   : > { %597 = vst [vmem:[%s983_s16 + $0x20] sm:$0xff] %v588_v28  ;;  %v693_v31 = vclamps-f32 %v548_v29, 0.01 }
 0x1cf   : > { %v552_v32 = vpop.f32.mrf.mxu1 }
 0x1d0   : > { %v589_v33 = vsub.f32 %v548_v29, %v693_v31  ;;  %v553_v34 = vadd.f32 %v679_v3, %v552_v32 }
 0x1d1   : > { %v791_v35 = vpop.f32.mrf.mxu1 }
 0x1d2   : > { %598 = vst [vmem:[%s983_s16 + $0x28] sm:$0xff] %v589_v33  ;;  %v694_v36 = vclamps-f32 %v553_v34, 0.01 }
 0x1d3   : > { %v555_v37 = vpop.f32.mrf.mxu1 }
 0x1d4   : > { %v590_v38 = vsub.f32 %v553_v34, %v694_v36  ;;  %v556_v39 = vadd.f32 %v679_v3, %v555_v37 }
 0x1d5   : > { %v792_v40 = vpop.f32.mrf.mxu1 }
 0x1d6   : > { %599 = vst [vmem:[%s983_s16 + $0x30] sm:$0xff] %v590_v38  ;;  %v695_v41 = vclamps-f32 %v556_v39, 0.01 }
 0x1d7   : > { %v560_v42 = vpop.f32.mrf.mxu1 }
 0x1d8   : > { %v591_v43 = vsub.f32 %v556_v39, %v695_v41  ;;  %v561_v44 = vadd.f32 %v679_v3, %v560_v42 }
 0x1d9   : > { %v795_v45 = vpop.f32.mrf.mxu1 }
 0x1da   : > { %600 = vst [vmem:[%s983_s16 + $0x38] sm:$0xff] %v591_v43  ;;  %v696_v46 = vclamps-f32 %v561_v44, 0.01 }
 0x1db   : > { %v563_v47 = vpop.f32.mrf.mxu1 }
 0x1dc   : > { %v592_v48 = vsub.f32 %v561_v44, %v696_v46 }
 0x1dd   : > { %v796_v49 = vpop.f32.mrf.mxu1 }
 0x1de   : > { %601 = vst [vmem:[%s983_s16 + $0x40] sm:$0xff] %v592_v48 }
 0x1df PF: > { %s15_s18 = sadd.s32 1, %s834_s18  }
 0x1e0   : > { %p12_p4 = scmp.ge.s32.totalorder %s15_s18, 6  }
 0x1e2   :  { %14 = sbr.rel (!%p12_p4) target bundleno = 1 (0x1), region = 70 }

// kernel: reverse.1
= control target key start
LH: loop header
LB: loop body
LE: loop exit
PB: predicated region body
PF: predicated region fallthrough
CT: control target
= control target key end

     0   :  { %s344_s0 = inlined_call_operand.vmem [shape: f32[2,32,16,7], index: 0, kind: input, shape index: {}]   ;;  %s345_s1 = inlined_call_operand.vmem [shape: f32[2,32,16,7], index: 1, kind: output, shape index: {}]  }
   0x1   :  { %v112_v0 = vld [vmem:[%s344_s0 + $0x60] sm:$0xff]  ;;  %v113_v1 = vld [vmem:[%s344_s0 + $0xd0] sm:$0xff]  ;;  %v138_v14 = vld [vmem:[%s344_s0 + $0x68] sm:$0xff] }
   0x2   :  { %v115_v2 = vld [vmem:[%s344_s0 + $0x50] sm:$0xff]  ;;  %4 = vst [vmem:[%s345_s1] sm:$0xff] %v112_v0  ;;  %114 = vst [vmem:[%s345_s1 + $0x70] sm:$0xff] %v113_v1  ;;  %v117_v3 = vld [vmem:[%s344_s0 + $0xc0] sm:$0xff] }
   0x3   :  { %116 = vst [vmem:[%s345_s1 + $0x10] sm:$0xff] %v115_v2  ;;  %v119_v4 = vld [vmem:[%s344_s0 + $0x40] sm:$0xff]  ;;  %v121_v5 = vld [vmem:[%s344_s0 + $0xb0] sm:$0xff]  ;;  %118 = vst [vmem:[%s345_s1 + $0x80] sm:$0xff] %v117_v3 }
   0x4   :  { %120 = vst [vmem:[%s345_s1 + $0x20] sm:$0xff] %v119_v4  ;;  %122 = vst [vmem:[%s345_s1 + $0x90] sm:$0xff] %v121_v5  ;;  %v123_v6 = vld [vmem:[%s344_s0 + $0x30] sm:$0xff]  ;;  %v125_v7 = vld [vmem:[%s344_s0 + $0xa0] sm:$0xff] }
   0x5   :  { %v127_v8 = vld [vmem:[%s344_s0 + $0x20] sm:$0xff]  ;;  %124 = vst [vmem:[%s345_s1 + $0x30] sm:$0xff] %v123_v6  ;;  %126 = vst [vmem:[%s345_s1 + $0xa0] sm:$0xff] %v125_v7  ;;  %v129_v9 = vld [vmem:[%s344_s0 + $0x90] sm:$0xff] }
   0x6   :  { %128 = vst [vmem:[%s345_s1 + $0x40] sm:$0xff] %v127_v8  ;;  %v131_v10 = vld [vmem:[%s344_s0 + $0x10] sm:$0xff]  ;;  %v133_v11 = vld [vmem:[%s344_s0 + $0x80] sm:$0xff]  ;;  %130 = vst [vmem:[%s345_s1 + $0xb0] sm:$0xff] %v129_v9 }
   0x7   :  { %132 = vst [vmem:[%s345_s1 + $0x50] sm:$0xff] %v131_v10  ;;  %134 = vst [vmem:[%s345_s1 + $0xc0] sm:$0xff] %v133_v11  ;;  %v49_v12 = vld [vmem:[%s344_s0] sm:$0xff]  ;;  %v136_v13 = vld [vmem:[%s344_s0 + $0x70] sm:$0xff] }
   0x8   :  { %135 = vst [vmem:[%s345_s1 + $0x60] sm:$0xff] %v49_v12  ;;  %137 = vst [vmem:[%s345_s1 + $0xd0] sm:$0xff] %v136_v13  ;;  %v140_v15 = vld [vmem:[%s344_s0 + $0xd8] sm:$0xff]  ;;  %v144_v17 = vld [vmem:[%s344_s0 + $0xc8] sm:$0xff] }
   0x9   :  { %139 = vst [vmem:[%s345_s1 + $0x8] sm:$0xff] %v138_v14  ;;  %v142_v16 = vld [vmem:[%s344_s0 + $0x58] sm:$0xff]  ;;  %141 = vst [vmem:[%s345_s1 + $0x78] sm:$0xff] %v140_v15  ;;  %v146_v18 = vld [vmem:[%s344_s0 + $0x48] sm:$0xff] }
   0xa   :  { %143 = vst [vmem:[%s345_s1 + $0x18] sm:$0xff] %v142_v16  ;;  %145 = vst [vmem:[%s345_s1 + $0x88] sm:$0xff] %v144_v17  ;;  %v148_v19 = vld [vmem:[%s344_s0 + $0xb8] sm:$0xff]  ;;  %v152_v21 = vld [vmem:[%s344_s0 + $0xa8] sm:$0xff] }
   0xb   :  { %v150_v20 = vld [vmem:[%s344_s0 + $0x38] sm:$0xff]  ;;  %147 = vst [vmem:[%s345_s1 + $0x28] sm:$0xff] %v146_v18  ;;  %149 = vst [vmem:[%s345_s1 + $0x98] sm:$0xff] %v148_v19  ;;  %v154_v22 = vld [vmem:[%s344_s0 + $0x28] sm:$0xff] }
   0xc   :  { %151 = vst [vmem:[%s345_s1 + $0x38] sm:$0xff] %v150_v20  ;;  %v156_v23 = vld [vmem:[%s344_s0 + $0x98] sm:$0xff]  ;;  %153 = vst [vmem:[%s345_s1 + $0xa8] sm:$0xff] %v152_v21  ;;  %v160_v25 = vld [vmem:[%s344_s0 + $0x88] sm:$0xff] }
   0xd   :  { %155 = vst [vmem:[%s345_s1 + $0x48] sm:$0xff] %v154_v22  ;;  %157 = vst [vmem:[%s345_s1 + $0xb8] sm:$0xff] %v156_v23  ;;  %v158_v24 = vld [vmem:[%s344_s0 + $0x18] sm:$0xff]  ;;  %v162_v26 = vld [vmem:[%s344_s0 + $0x8] sm:$0xff] }
   0xe   :  { %159 = vst [vmem:[%s345_s1 + $0x58] sm:$0xff] %v158_v24  ;;  %161 = vst [vmem:[%s345_s1 + $0xc8] sm:$0xff] %v160_v25  ;;  %v164_v27 = vld [vmem:[%s344_s0 + $0x78] sm:$0xff] }
   0xf   :  { %163 = vst [vmem:[%s345_s1 + $0x68] sm:$0xff] %v162_v26  ;;  %165 = vst [vmem:[%s345_s1 + $0xd8] sm:$0xff] %v164_v27 }

</bundles_post_ra>
